<compile_context>
chip_gen: v5e
topology: v5e:2x2
jax: 0.10.0
libtpu: 0.0.40
codegen_flags: <defaults>
</compile_context>

<pallas_src>
import functools

import jax
import jax.numpy as jnp
from jax.experimental import pallas as pl
from jax.experimental.pallas import tpu as pltpu


def _round_up(x, m):
    return (x + m - 1) // m * m


def _vmem_limit_bytes():
    """Generation-aware VMEM limit: ~5/8 of physical (40 MiB on v7x, 80 MiB on v5e/v6e)."""
    try:
        cap = pltpu.get_tpu_info().vmem_capacity_bytes
    except Exception:
        cap = 64 * 1024 * 1024          # conservative (v7x-sized) fallback
    return int(min(cap * 5 // 8, 96 * 1024 * 1024))


def _pick_row_tile(n, h, wf, cin, c1, c2, itemsize, budget):
    """Largest row tile whose per-step VMEM working set fits the budget.  Single-image
    calls force >= 2 row tiles so both v7x TensorCores get work via the parallel grid."""
    min_tiles = 2 if n == 1 else 1

    def est(th):
        lh = (th + 3) * wf
        return (2 * cin * (h + 6) * wf * itemsize   # resident input frame (double-buffered)
                + 9 * cin * lh * itemsize           # packed K=27 conv1 operand
                + c1 * lh * (4 + itemsize)          # conv1 f32 result + cast intermediate
                + 9 * c2 * lh * 4                   # conv2 M=27 f32 result
                + 2 * c2 * th * wf * 4)             # double-buffered output block

    cands = [t for t in (512, 256, 128, 64, 32, 16, 8)
             if t <= h and h % t == 0 and h // t >= min_tiles]
    for t in cands:
        if est(t) <= budget:
            return t
    # Fallback: SMALLEST legal tile (bounded intermediate), never the whole image.
    return cands[-1] if cands else h


def _fused_conv_kernel(x_ref, cmask_ref, w1_ref, b1_ref, w2_ref, b2_ref, o_ref,
                       *, wf, th, n_row_tiles, cdtype):
    # x_ref:   (1, Cin, (H+6)*Wf)  flattened zero-padded input frame (whole image, resident)
    # cmask:   (1, (TH+3)*Wf)      column-validity mask for the intermediate (f32, resident)
    # w1_ref:  (C1, 9*Cin)         conv1 weights, column k = (dh*3 + dw)*Cin + cin
    # b1_ref:  (C1, 1)             f32
    # w2_ref:  (9*C2, C1)          conv2 weights, row k = (dh*3 + dw)*C2 + cout
    # b2_ref:  (C2, 1)             f32
    # o_ref:   (1, C2, TH*Wf)      lane-dense output tile (reshapes directly to NCHW)
    t = pl.program_id(1)
    c1 = w1_ref.shape[0]
    c2 = b2_ref.shape[0]
    lh = (th + 3) * wf            # intermediate tile length (TH rows + halo/slack rows)
    lo = th * wf                  # output tile length
    base = pl.multiple_of(t * (th * wf), 128)

    # ---- conv1 as a single K = 9*Cin contraction (one MXU matmul) --------------------
    taps = []
    for dh in range(3):
        start = pl.multiple_of(base + dh * wf, 128)
        row = x_ref[0, :, pl.ds(start, lh + 128)]          # (Cin, lh + 128), lane-aligned
        for dw in range(3):
            taps.append(row[:, dw:dw + lh])                 # (Cin, lh), static lane shift
    x27 = jnp.concatenate(taps, axis=0)                     # (9*Cin, lh)
    acc1 = jnp.dot(w1_ref[...], x27,
                   preferred_element_type=jnp.float32)      # (C1, lh) f32

    # ---- bias + ReLU + combined validity mask (single multiply) ----------------------
    # columns outside the image are always masked; halo rows only on the first/last tile.
    jh = jax.lax.broadcasted_iota(jnp.int32, (1, lh), 1)
    row_bad = ((t == 0) & (jh < wf)) | (
        (t == n_row_tiles - 1) & (jh >= (th + 1) * wf))
    mask = jnp.where(row_bad, 0.0, cmask_ref[...])          # (1, lh), cheap
    hmid = (jnp.maximum(acc1 + b1_ref[...], 0.0) * mask).astype(cdtype)   # (C1, lh)

    # ---- conv2 as a single M = 9*C2 matmul + shifted-add epilogue --------------------
    y27 = jnp.dot(w2_ref[...], hmid,
                  preferred_element_type=jnp.float32)       # (9*C2, lh) f32
    acc2 = jnp.zeros((c2, lo), jnp.float32)
    for dh in range(3):
        for dw in range(3):
            k = dh * 3 + dw
            off = dh * wf + dw
            acc2 = acc2 + y27[k * c2:(k + 1) * c2, off:off + lo]
    o_ref[0] = (acc2 + b2_ref[...]).astype(o_ref.dtype)


def style_transfer_net(x, params, *, compute_dtype=jnp.bfloat16, row_tile=None):
    """Fused relu(conv1(x)) -> conv2 (3x3, stride 1, padding 1), NCHW in/out."""
    n, cin, h, w = x.shape
    w1, b1, w2, b2 = params["w1"], params["b1"], params["w2"], params["b2"]
    c1, c2 = w1.shape[0], w2.shape[0]
    assert w1.shape == (c1, cin, 3, 3) and w2.shape == (c2, c1, 3, 3)

    itemsize = jnp.dtype(compute_dtype).itemsize
    wf = _round_up(w + 4, 128)                 # lane-aligned frame width (>= W + 4)
    vmem_limit = _vmem_limit_bytes()
    if row_tile is None:
        th = _pick_row_tile(n, h, wf, cin, c1, c2, itemsize, budget=(vmem_limit * 3) // 4)
    else:
        assert h % row_tile == 0
        th = row_tile
    n_row_tiles = h // th
    lh = (th + 3) * wf
    fl = (h + 6) * wf                          # flattened frame length per channel

    # ---- glue (plain JAX, input/output-sized copies only; no 9x im2col in HBM) -------
    # frame: 2 zero rows on top, 4 below; 2 zero cols left, (wf - w - 2) right; flatten.
    xf = jnp.pad(x.astype(compute_dtype),
                 ((0, 0), (0, 0), (2, 4), (2, wf - w - 2))).reshape(n, cin, fl)

    # conv1 weights -> (C1, 9*Cin), columns ordered (dh, dw, cin)   [cross-correlation]
    w1t = jnp.transpose(w1, (0, 2, 3, 1)).reshape(c1, 9 * cin).astype(compute_dtype)
    # conv2 weights -> (9*C2, C1), rows ordered (dh, dw, cout)
    w2t = jnp.transpose(w2, (2, 3, 0, 1)).reshape(9 * c2, c1).astype(compute_dtype)
    b1c = b1.reshape(c1, 1).astype(jnp.float32)
    b2c = b2.reshape(c2, 1).astype(jnp.float32)

    # column mask for the intermediate frame (frame col c <-> image col c - 1)
    col = jnp.arange(wf)
    cmask = jnp.tile(((col >= 1) & (col <= w)).astype(jnp.float32), th + 3).reshape(1, lh)

    kernel = functools.partial(_fused_conv_kernel, wf=wf, th=th,
                               n_row_tiles=n_row_tiles, cdtype=compute_dtype)

    flops = 2 * n * h * w * 9 * (cin * c1 + c1 * c2)
    bytes_accessed = int(n * cin * fl * itemsize + n * c2 * h * wf * 4
                         + 9 * (cin * c1 + c1 * c2) * itemsize + lh * 4)

    out_flat = pl.pallas_call(
        kernel,
        out_shape=jax.ShapeDtypeStruct((n, c2, h * wf), x.dtype),
        grid_spec=pltpu.PrefetchScalarGridSpec(
            num_scalar_prefetch=0,
            grid=(n, n_row_tiles),
            in_specs=[
                pl.BlockSpec((1, cin, fl), lambda i, t: (i, 0, 0)),    # whole frame/image
                pl.BlockSpec((1, lh), lambda i, t: (0, 0)),            # column mask
                pl.BlockSpec((c1, 9 * cin), lambda i, t: (0, 0)),      # resident weights
                pl.BlockSpec((c1, 1), lambda i, t: (0, 0)),
                pl.BlockSpec((9 * c2, c1), lambda i, t: (0, 0)),
                pl.BlockSpec((c2, 1), lambda i, t: (0, 0)),
            ],
            out_specs=pl.BlockSpec((1, c2, th * wf), lambda i, t: (i, 0, t)),
        ),
        compiler_params=pltpu.CompilerParams(
            dimension_semantics=("parallel", "parallel"),
            vmem_limit_bytes=int(vmem_limit),
        ),
        cost_estimate=pl.CostEstimate(flops=flops, transcendentals=0,
                                      bytes_accessed=bytes_accessed),
    )(xf, cmask, w1t, b1c, w2t, b2c)

    # (N, C2, H*Wf) -> NCHW, dropping the frame's padded columns.
    return out_flat.reshape(n, c2, h, wf)[:, :, :, :w]


def _reference_forward(x, params):
    def conv(xx, wt, b):
        y = jax.lax.conv_general_dilated(
            xx, wt, window_strides=(1, 1), padding=((1, 1), (1, 1)),
            dimension_numbers=("NCHW", "OIHW", "NCHW"),
            precision=jax.lax.Precision.HIGHEST)
        return y + b[None, :, None, None]

    hid = jnp.maximum(conv(x, params["w1"], params["b1"]), 0.0)
    return conv(hid, params["w2"], params["b2"])


if __name__ == "__main__":
    key = jax.random.PRNGKey(0)
    k1, k2, k3, k4, kx1, kx2 = jax.random.split(key, 6)

    # Deterministic synthetic parameters (shapes from StyleTransferNet.__init__)
    params = {
        "w1": 0.1 * jax.random.normal(k1, (64, 3, 3, 3), jnp.float32),
        "b1": 0.1 * jax.random.normal(k2, (64,), jnp.float32),
        "w2": 0.1 * jax.random.normal(k3, (3, 64, 3, 3), jnp.float32),
        "b2": 0.1 * jax.random.normal(k4, (3,), jnp.float32),
    }

    # A) small NCHW input, single row tile, f32 operand path (tight check)
    xa = jax.random.normal(kx1, (2, 3, 16, 16), jnp.float32)
    ref_a = jax.block_until_ready(_reference_forward(xa, params))
    run_f32 = jax.jit(functools.partial(style_transfer_net, compute_dtype=jnp.float32))
    out_a = jax.block_until_ready(run_f32(xa, params))
    assert out_a.shape == (2, 3, 16, 16)
    assert jnp.allclose(out_a, ref_a, atol=1e-4, rtol=1e-4)

    # B) multi-row-tile path: 4 tiles (top halo / 2 interior / bottom halo), f32, tight
    xb = jax.random.normal(kx2, (1, 3, 32, 48), jnp.float32)
    ref_b = jax.block_until_ready(_reference_forward(xb, params))
    run_tiled = jax.jit(functools.partial(style_transfer_net,
                                          compute_dtype=jnp.float32, row_tile=8))
    out_b = jax.block_until_ready(run_tiled(xb, params))
    assert out_b.shape == (1, 3, 32, 48)
    assert jnp.allclose(out_b, ref_b, atol=1e-4, rtol=1e-4)

    # C) default bf16 matmul operands, f32 accumulation/epilogue (looser check)
    run_bf16 = jax.jit(style_transfer_net)
    out_c = jax.block_until_ready(run_bf16(xa, params))
    assert jnp.allclose(out_c, ref_a, atol=3e-2, rtol=3e-2)

    print("KERNEL_OK")
</pallas_src>

<mosaic_0001>
module attributes {stable_mosaic.version = 11 : i64} {
  func.func @_fused_conv_kernel(%arg0: i32, %arg1: i32, %arg2: memref<1x3x2816xf32, #tpu.memory_space<vmem>>, %arg3: memref<1x2432xf32, #tpu.memory_space<vmem>>, %arg4: memref<64x27xf32, #tpu.memory_space<vmem>>, %arg5: memref<64x1xf32, #tpu.memory_space<vmem>>, %arg6: memref<27x64xf32, #tpu.memory_space<vmem>>, %arg7: memref<3x1xf32, #tpu.memory_space<vmem>>, %arg8: memref<1x3x2048xf32, #tpu.memory_space<vmem>>) attributes {dimension_semantics = [#tpu.dimension_semantics<parallel>, #tpu.dimension_semantics<parallel>], iteration_bounds = array<i64: 2, 1>, scalar_prefetch = 0 : i64, scratch_operands = 0 : i64, tpu.core_type = #tpu.core_type<tc>, window_params = [{transform_indices = @transform_0, window_bounds = array<i64: 1, 3, 2816>}, {pipeline_mode = #tpu.pipeline_mode<synchronous>, transform_indices = @transform_1, window_bounds = array<i64: 1, 2432>}, {pipeline_mode = #tpu.pipeline_mode<synchronous>, transform_indices = @transform_2, window_bounds = array<i64: 64, 27>}, {pipeline_mode = #tpu.pipeline_mode<synchronous>, transform_indices = @transform_3, window_bounds = array<i64: 64, 1>}, {pipeline_mode = #tpu.pipeline_mode<synchronous>, transform_indices = @transform_4, window_bounds = array<i64: 27, 64>}, {pipeline_mode = #tpu.pipeline_mode<synchronous>, transform_indices = @transform_5, window_bounds = array<i64: 3, 1>}, {transform_indices = @transform_6, window_bounds = array<i64: 1, 3, 2048>}]} {
    %c2048_i32 = arith.constant 2048 : i32
    %0 = arith.muli %arg1, %c2048_i32 : i32
    %1 = tpu.assume_multiple %0, 128 : i32
    %c0_i32 = arith.constant 0 : i32
    %2 = arith.addi %1, %c0_i32 : i32
    %3 = tpu.assume_multiple %2, 128 : i32
    %c0 = arith.constant 0 : index
    %c0_0 = arith.constant 0 : index
    %4 = arith.index_cast %3 : i32 to index
    %5 = vector.load %arg2[%c0, %c0_0, %4] : memref<1x3x2816xf32, #tpu.memory_space<vmem>>, vector<1x3x2560xf32>
    %6 = vector.shape_cast %5 : vector<1x3x2560xf32> to vector<3x2560xf32>
    %7 = vector.extract_strided_slice %6 {offsets = [0, 0], sizes = [3, 2432], strides = [1, 1]} : vector<3x2560xf32> to vector<3x2432xf32>
    %8 = vector.extract_strided_slice %6 {offsets = [0, 1], sizes = [3, 2432], strides = [1, 1]} : vector<3x2560xf32> to vector<3x2432xf32>
    %9 = vector.extract_strided_slice %6 {offsets = [0, 2], sizes = [3, 2432], strides = [1, 1]} : vector<3x2560xf32> to vector<3x2432xf32>
    %c128_i32 = arith.constant 128 : i32
    %10 = arith.addi %1, %c128_i32 : i32
    %11 = tpu.assume_multiple %10, 128 : i32
    %c0_1 = arith.constant 0 : index
    %c0_2 = arith.constant 0 : index
    %12 = arith.index_cast %11 : i32 to index
    %13 = vector.load %arg2[%c0_1, %c0_2, %12] : memref<1x3x2816xf32, #tpu.memory_space<vmem>>, vector<1x3x2560xf32>
    %14 = vector.shape_cast %13 : vector<1x3x2560xf32> to vector<3x2560xf32>
    %15 = vector.extract_strided_slice %14 {offsets = [0, 0], sizes = [3, 2432], strides = [1, 1]} : vector<3x2560xf32> to vector<3x2432xf32>
    %16 = vector.extract_strided_slice %14 {offsets = [0, 1], sizes = [3, 2432], strides = [1, 1]} : vector<3x2560xf32> to vector<3x2432xf32>
    %17 = vector.extract_strided_slice %14 {offsets = [0, 2], sizes = [3, 2432], strides = [1, 1]} : vector<3x2560xf32> to vector<3x2432xf32>
    %c256_i32 = arith.constant 256 : i32
    %18 = arith.addi %1, %c256_i32 : i32
    %19 = tpu.assume_multiple %18, 128 : i32
    %c0_3 = arith.constant 0 : index
    %c0_4 = arith.constant 0 : index
    %20 = arith.index_cast %19 : i32 to index
    %21 = vector.load %arg2[%c0_3, %c0_4, %20] : memref<1x3x2816xf32, #tpu.memory_space<vmem>>, vector<1x3x2560xf32>
    %22 = vector.shape_cast %21 : vector<1x3x2560xf32> to vector<3x2560xf32>
    %23 = vector.extract_strided_slice %22 {offsets = [0, 0], sizes = [3, 2432], strides = [1, 1]} : vector<3x2560xf32> to vector<3x2432xf32>
    %24 = vector.extract_strided_slice %22 {offsets = [0, 1], sizes = [3, 2432], strides = [1, 1]} : vector<3x2560xf32> to vector<3x2432xf32>
    %25 = vector.extract_strided_slice %22 {offsets = [0, 2], sizes = [3, 2432], strides = [1, 1]} : vector<3x2560xf32> to vector<3x2432xf32>
    %26 = tpu.concatenate %7, %8, %9, %15, %16, %17, %23, %24, %25 in 0 : vector<3x2432xf32>, vector<3x2432xf32>, vector<3x2432xf32>, vector<3x2432xf32>, vector<3x2432xf32>, vector<3x2432xf32>, vector<3x2432xf32>, vector<3x2432xf32>, vector<3x2432xf32> -> vector<27x2432xf32>
    %c0_5 = arith.constant 0 : index
    %c0_6 = arith.constant 0 : index
    %27 = vector.load %arg4[%c0_5, %c0_6] : memref<64x27xf32, #tpu.memory_space<vmem>>, vector<64x27xf32>
    %cst = arith.constant dense<0.000000e+00> : vector<64x2432xf32>
    %28 = tpu.matmul %27, %26, %cst {dimension_numbers = #tpu.dot_dimension_numbers<[1], [0], [0], [1], [0, 0, 1, 1], [], []>} : vector<64x27xf32>, vector<27x2432xf32>, vector<64x2432xf32> -> vector<64x2432xf32>
    %29 = tpu.iota {dimensions = array<i32: 1>} : vector<1x2432xi32>
    %c0_i32_7 = arith.constant 0 : i32
    %30 = arith.cmpi eq, %arg1, %c0_i32_7 : i32
    %c128_i32_8 = arith.constant 128 : i32
    %31 = vector.broadcast %c128_i32_8 : i32 to vector<1x2432xi32>
    %32 = arith.cmpi slt, %29, %31 : vector<1x2432xi32>
    %33 = vector.broadcast %30 : i1 to vector<1x2432xi1>
    %34 = arith.andi %33, %32 : vector<1x2432xi1>
    %c0_i32_9 = arith.constant 0 : i32
    %35 = arith.cmpi eq, %arg1, %c0_i32_9 : i32
    %c2176_i32 = arith.constant 2176 : i32
    %36 = vector.broadcast %c2176_i32 : i32 to vector<1x2432xi32>
    %37 = arith.cmpi sge, %29, %36 : vector<1x2432xi32>
    %38 = vector.broadcast %35 : i1 to vector<1x2432xi1>
    %39 = arith.andi %38, %37 : vector<1x2432xi1>
    %40 = arith.ori %34, %39 : vector<1x2432xi1>
    %c0_10 = arith.constant 0 : index
    %c0_11 = arith.constant 0 : index
    %41 = vector.load %arg3[%c0_10, %c0_11] : memref<1x2432xf32, #tpu.memory_space<vmem>>, vector<1x2432xf32>
    %cst_12 = arith.constant 0.000000e+00 : f32
    %42 = vector.broadcast %cst_12 : f32 to vector<1x2432xf32>
    %43 = arith.select %40, %42, %41 : vector<1x2432xi1>, vector<1x2432xf32>
    %c0_13 = arith.constant 0 : index
    %c0_14 = arith.constant 0 : index
    %44 = vector.load %arg5[%c0_13, %c0_14] : memref<64x1xf32, #tpu.memory_space<vmem>>, vector<64x1xf32>
    %45 = vector.broadcast %44 : vector<64x1xf32> to vector<64x2432xf32>
    %46 = arith.addf %28, %45 : vector<64x2432xf32>
    %cst_15 = arith.constant 0.000000e+00 : f32
    %47 = vector.broadcast %cst_15 : f32 to vector<64x2432xf32>
    %48 = arith.maximumf %46, %47 : vector<64x2432xf32>
    %49 = vector.broadcast %43 : vector<1x2432xf32> to vector<64x2432xf32>
    %50 = arith.mulf %48, %49 : vector<64x2432xf32>
    %c0_16 = arith.constant 0 : index
    %c0_17 = arith.constant 0 : index
    %51 = vector.load %arg6[%c0_16, %c0_17] : memref<27x64xf32, #tpu.memory_space<vmem>>, vector<27x64xf32>
    %cst_18 = arith.constant dense<0.000000e+00> : vector<27x2432xf32>
    %52 = tpu.matmul %51, %50, %cst_18 {dimension_numbers = #tpu.dot_dimension_numbers<[1], [0], [0], [1], [0, 0, 1, 1], [], []>} : vector<27x64xf32>, vector<64x2432xf32>, vector<27x2432xf32> -> vector<27x2432xf32>
    %cst_19 = arith.constant 0.000000e+00 : f32
    %53 = vector.broadcast %cst_19 : f32 to vector<3x2048xf32>
    %54 = vector.extract_strided_slice %52 {offsets = [0, 0], sizes = [3, 2048], strides = [1, 1]} : vector<27x2432xf32> to vector<3x2048xf32>
    %55 = arith.addf %53, %54 : vector<3x2048xf32>
    %56 = vector.extract_strided_slice %52 {offsets = [3, 1], sizes = [3, 2048], strides = [1, 1]} : vector<27x2432xf32> to vector<3x2048xf32>
    %57 = arith.addf %55, %56 : vector<3x2048xf32>
    %58 = vector.extract_strided_slice %52 {offsets = [6, 2], sizes = [3, 2048], strides = [1, 1]} : vector<27x2432xf32> to vector<3x2048xf32>
    %59 = arith.addf %57, %58 : vector<3x2048xf32>
    %60 = vector.extract_strided_slice %52 {offsets = [9, 128], sizes = [3, 2048], strides = [1, 1]} : vector<27x2432xf32> to vector<3x2048xf32>
    %61 = arith.addf %59, %60 : vector<3x2048xf32>
    %62 = vector.extract_strided_slice %52 {offsets = [12, 129], sizes = [3, 2048], strides = [1, 1]} : vector<27x2432xf32> to vector<3x2048xf32>
    %63 = arith.addf %61, %62 : vector<3x2048xf32>
    %64 = vector.extract_strided_slice %52 {offsets = [15, 130], sizes = [3, 2048], strides = [1, 1]} : vector<27x2432xf32> to vector<3x2048xf32>
    %65 = arith.addf %63, %64 : vector<3x2048xf32>
    %66 = vector.extract_strided_slice %52 {offsets = [18, 256], sizes = [3, 2048], strides = [1, 1]} : vector<27x2432xf32> to vector<3x2048xf32>
    %67 = arith.addf %65, %66 : vector<3x2048xf32>
    %68 = vector.extract_strided_slice %52 {offsets = [21, 257], sizes = [3, 2048], strides = [1, 1]} : vector<27x2432xf32> to vector<3x2048xf32>
    %69 = arith.addf %67, %68 : vector<3x2048xf32>
    %70 = vector.extract_strided_slice %52 {offsets = [24, 258], sizes = [3, 2048], strides = [1, 1]} : vector<27x2432xf32> to vector<3x2048xf32>
    %71 = arith.addf %69, %70 : vector<3x2048xf32>
    %c0_20 = arith.constant 0 : index
    %c0_21 = arith.constant 0 : index
    %72 = vector.load %arg7[%c0_20, %c0_21] : memref<3x1xf32, #tpu.memory_space<vmem>>, vector<3x1xf32>
    %73 = vector.broadcast %72 : vector<3x1xf32> to vector<3x2048xf32>
    %74 = arith.addf %71, %73 : vector<3x2048xf32>
    %c0_22 = arith.constant 0 : index
    %c0_23 = arith.constant 0 : index
    %c0_24 = arith.constant 0 : index
    %75 = vector.load %arg8[%c0_22, %c0_23, %c0_24] : memref<1x3x2048xf32, #tpu.memory_space<vmem>>, vector<1x3x2048xf32>
    %76 = vector.shape_cast %75 : vector<1x3x2048xf32> to vector<3x2048xf32>
    %77 = vector.shape_cast %74 : vector<3x2048xf32> to vector<1x3x2048xf32>
    tpu.vector_store %arg8[%c0_22, %c0_23, %c0_24], %77 {strides = array<i32>} : memref<1x3x2048xf32, #tpu.memory_space<vmem>>, vector<1x3x2048xf32>,
    return
  }
  func.func @transform_0(%arg0: i32, %arg1: i32) -> (i32, i32, i32) {
    %c0_i32 = arith.constant 0 : i32
    %c0_i32_0 = arith.constant 0 : i32
    %c0_i32_1 = arith.constant 0 : i32
    return %arg0, %c0_i32, %c0_i32_0 : i32, i32, i32
  }
  func.func @transform_1(%arg0: i32, %arg1: i32) -> (i32, i32) {
    %c0_i32 = arith.constant 0 : i32
    %c0_i32_0 = arith.constant 0 : i32
    %c0_i32_1 = arith.constant 0 : i32
    return %c0_i32, %c0_i32_0 : i32, i32
  }
  func.func @transform_2(%arg0: i32, %arg1: i32) -> (i32, i32) {
    %c0_i32 = arith.constant 0 : i32
    %c0_i32_0 = arith.constant 0 : i32
    %c0_i32_1 = arith.constant 0 : i32
    return %c0_i32, %c0_i32_0 : i32, i32
  }
  func.func @transform_3(%arg0: i32, %arg1: i32) -> (i32, i32) {
    %c0_i32 = arith.constant 0 : i32
    %c0_i32_0 = arith.constant 0 : i32
    %c0_i32_1 = arith.constant 0 : i32
    return %c0_i32, %c0_i32_0 : i32, i32
  }
  func.func @transform_4(%arg0: i32, %arg1: i32) -> (i32, i32) {
    %c0_i32 = arith.constant 0 : i32
    %c0_i32_0 = arith.constant 0 : i32
    %c0_i32_1 = arith.constant 0 : i32
    return %c0_i32, %c0_i32_0 : i32, i32
  }
  func.func @transform_5(%arg0: i32, %arg1: i32) -> (i32, i32) {
    %c0_i32 = arith.constant 0 : i32
    %c0_i32_0 = arith.constant 0 : i32
    %c0_i32_1 = arith.constant 0 : i32
    return %c0_i32, %c0_i32_0 : i32, i32
  }
  func.func @transform_6(%arg0: i32, %arg1: i32) -> (i32, i32, i32) {
    %c0_i32 = arith.constant 0 : i32
    %c0_i32_0 = arith.constant 0 : i32
    return %arg0, %c0_i32, %arg1 : i32, i32, i32
  }
}

</mosaic_0001>

<bundles_post_ra>
// kernel: style_transfer_net.1
= control target key start
LH: loop header
LB: loop body
LE: loop exit
PB: predicated region body
PF: predicated region fallthrough
CT: control target
= control target key end

     0   :  { %s5012_s21 = smov 0   ;;  %s5014_s22 = smov 0   ;;  %s8229_s0 = inlined_call_operand.vmem [shape: f32[2,3,2816], index: 0, kind: input, shape index: {}]   ;;  %s8230_s1 = inlined_call_operand.vmem [shape: f32[1,2432], index: 1, kind: input, shape index: {}]   ;;  %s8231_s2 = inlined_call_operand.vmem [shape: f32[64,27], index: 2, kind: input, shape index: {}]   ;;  %s8232_s3 = inlined_call_operand.vmem [shape: f32[64,1], index: 3, kind: input, shape index: {}]   ;;  %s8233_s4 = inlined_call_operand.vmem [shape: f32[27,64], index: 4, kind: input, shape index: {}]   ;;  %s8234_s5 = inlined_call_operand.vmem [shape: f32[3,1], index: 5, kind: input, shape index: {}]   ;;  %s8235_s6 = inlined_call_operand.vmem [shape: f32[2,3,2048], index: 6, kind: output, shape index: {}]  }
   0x1   :  { %s5016_s23 = smov 0  }
   0x2 LB: > { %s28_s24 = sadd.s32 1, %s4967_s22  ;;  %p4364_p0 = scmp.ge.s32.totalorder %s4971_s23, 1  ;;  %s4971_s23 = sphi %s5016_s23, %s16_s23   ;;  %s4967_s22 = sphi %s5014_s22, %s8431_s22   ;;  %s4963_s21 = sphi %s5012_s21, %s8430_s21  }
   0x3   : > { %p30_p1 = scmp.ge.s32.totalorder %s28_s24, 2  ;;  %p226_p2 = scmp.lt.s32.totalorder %s4971_s23, 3 }
   0x5   : > { %s8433_s24 = smov (%p30_p1, %s28_s24), 0  ;;  %p227_p3 = pnand %p4364_p0, %p226_p2 }
   0x7   : > { %230 = sbr.rel (%p227_p3) target bundleno = 1232 (0x4d0), region = 44 }
   0xc   : > { %p260_p4 = scmp.lt.s32.totalorder %s4963_s21, 1  ;;  %s4973_s29 = smov 127   ;;  %vm606_vm0 = vcmask 1031168   ;;  %vm474_vm1 = vcmask 1039360   ;;  %vm1311_vm2 = vcmask 1040384   ;;  %vm1371_vm3 = vcmask 1041408  }
   0xd   : > { %s4974_s30 = smov 126   ;;  %vm1271_vm4 = vcmask 1042432   ;;  %vm1331_vm5 = vcmask 1043456   ;;  %vm1391_vm6 = vcmask 1044480   ;;  %vm1351_vm7 = vcmask 1046528  }
   0xe   : > { %s8435_s21 = smov (!%p260_p4, %s4963_s21), 1  ;;  %vm1291_vm8 = vcmask 1045504   ;;  %vm1649_vm9 = vcmask 220160   ;;  %vm2818_vm10 = vcmask 523264  }
   0xf   : > { %s4654_s25 = smul.u32 88, %s8435_s21  ;;  %s4637_s7 = sshll.u32 %s8435_s21, 6 }
  0x10   : > { %s273_s9 = scalar_lea.vmem %s8235_s6, %s4637_s7 }
  0x11   : > { %s5036_s28 = scalar_lea.vmem %s8229_s0, %s4654_s25 }
  0x12   : > { %v280_v0 = vld [vmem:[%s5036_s28] sm:$0x77]  ;;  %v281_v1 = vld [vmem:[%s5036_s28 + $0x8] sm:$0x77]  ;;  %v282_v39 = vld [vmem:[%s5036_s28 + $0x10] sm:$0x77] }
  0x13   : > { %330 = vst [vmem:[#allocation1] ss:$2 sm:$0xff] %v280_v0  ;;  %v284_v2 = vld [vmem:[%s5036_s28 + $0x20] sm:$0x77]  ;;  %v285_v3 = vld [vmem:[%s5036_s28 + $0x28] sm:$0x77] }
  0x14   : > { %332 = vst [vmem:[#allocation1 + $0x10] ss:$2 sm:$0xff] %v281_v1  ;;  %v288_v8 = vld [vmem:[%s5036_s28 + $0x40] sm:$0x77]  ;;  %v289_v9 = vld [vmem:[%s5036_s28 + $0x48] sm:$0x77] }
  0x15   : > { %334 = vst [vmem:[#allocation1 + $0x20] ss:$2 sm:$0xff] %v282_v39  ;;  %v5102_v44 = vld [vmem:[%s5036_s28 + $0x4] sm:$0x77]  ;;  %v286_v45 = vld [vmem:[%s5036_s28 + $0x30] sm:$0x77] }
  0x16   : > { %v283_v48 = vld [vmem:[%s5036_s28 + $0x18] sm:$0x77]  ;;  %v5116_v51 = vld [vmem:[%s5036_s28 + $0xc] sm:$0x77]  ;;  %v5123_v54 = vld [vmem:[%s5036_s28 + $0x24] sm:$0x77] }
  0x17   : > { %336 = vst [vmem:[#allocation1 + $0x30] ss:$2 sm:$0xff] %v283_v48  ;;  %v287_v57 = vld [vmem:[%s5036_s28 + $0x38] sm:$0x77]  ;;  %v5139_v61 = vld [vmem:[%s5036_s28 + $0x2c] sm:$0x77] }
  0x1a   : > { %v5042_v4 = vld.sshfl [vmem:[#allocation1] sm:$0xff pattern:$0x75316420]  ;;  %v5044_v5 = vld.sshfl [vmem:[#allocation1 + $0x8] sm:$0xff pattern:$0x75316420] }
  0x1b   : > { %8236 = vst [vmem:[#allocation2_spill] sm:$0xff] %v5042_v4  ;;  %v5046_v6 = vld.sshfl [vmem:[#allocation1 + $0x10] sm:$0xff pattern:$0x75316420]  ;;  %v4381_v4 = vld [vmem:[%s5036_s28 + $0x20] sm:$0x77] }
  0x1c   : > { %8237 = vst [vmem:[#allocation3_spill] sm:$0xff] %v5044_v5  ;;  %v5048_v7 = vld.sshfl [vmem:[#allocation1 + $0x18] sm:$0xff pattern:$0x75316420] }
  0x1d   : > { %345 = vst [vmem:[#allocation1] ss:$2 sm:$0xff] %v284_v2  ;;  %v5105_v46 = vld.sshfl [vmem:[#allocation1 + $0x20] sm:$0xff pattern:$0x75316420] }
  0x1e   : > { %8238 = vst [vmem:[#allocation4_spill] sm:$0xff] %v5046_v6  ;;  %v5107_v47 = vld.sshfl [vmem:[#allocation1 + $0x28] sm:$0xff pattern:$0x75316420] }
  0x1f   : > { %8239 = vst [vmem:[#allocation5_spill] sm:$0xff] %v5048_v7  ;;  %v5136_v60 = vld.sshfl [vmem:[#allocation1 + $0x30] sm:$0xff pattern:$0x75316420] }
  0x20   : > { %346 = vst [vmem:[#allocation1 + $0x10] ss:$2 sm:$0xff] %v285_v3  ;;  %v5141_v62 = vld.sshfl [vmem:[#allocation1 + $0x38] sm:$0xff pattern:$0x75316420] }
  0x21   : > { %8253 = vst [vmem:[#allocation19_spill] sm:$0xff] %v5105_v46 }
  0x22   : > { %8254 = vst [vmem:[#allocation20_spill] sm:$0xff] %v5107_v47 }
  0x23   : > { %347 = vst [vmem:[#allocation1 + $0x20] ss:$2 sm:$0xff] %v286_v45 }
  0x24   : > { %v5052_v10 = vld.sshfl [vmem:[#allocation1] sm:$0xff pattern:$0x75316420]  ;;  %v5054_v11 = vld.sshfl [vmem:[#allocation1 + $0x8] sm:$0xff pattern:$0x75316420] }
  0x25   : > { %8240 = vst [vmem:[#allocation6_spill] sm:$0xff] %v5052_v10 }
  0x26   : > { %8241 = vst [vmem:[#allocation7_spill] sm:$0xff] %v5054_v11 }
  0x27   : > { %357 = vst [vmem:[#allocation1] ss:$2 sm:$0xff] %v288_v8  ;;  %v5056_v12 = vld.sshfl [vmem:[#allocation1 + $0x10] sm:$0xff pattern:$0x75316420] }
  0x28   : > { %8242 = vst [vmem:[#allocation8_spill] sm:$0xff] %v5056_v12  ;;  %v5058_v13 = vld.sshfl [vmem:[#allocation1 + $0x18] sm:$0xff pattern:$0x75316420] }
  0x29   : > { %8243 = vst [vmem:[#allocation9_spill] sm:$0xff] %v5058_v13 }
  0x2a   : > { %358 = vst [vmem:[#allocation1 + $0x10] ss:$2 sm:$0xff] %v289_v9  ;;  %v5126_v55 = vld.sshfl [vmem:[#allocation1 + $0x20] sm:$0xff pattern:$0x75316420] }
  0x2b   : > { %8259 = vst [vmem:[#allocation25_spill] sm:$0xff] %v5126_v55  ;;  %v5128_v56 = vld.sshfl [vmem:[#allocation1 + $0x28] sm:$0xff pattern:$0x75316420]  ;;  %v5207_v55 = vld [vmem:[%s5036_s28 + $0x14] sm:$0x77] }
  0x2c   : > { %8260 = vst [vmem:[#allocation26_spill] sm:$0xff] %v5128_v56 }
  0x2d   : > { %385 = vst [vmem:[#allocation1 + $0x20] ss:$2 sm:$0xff] %v282_v39 }
  0x2e   : > { %v5060_v14 = vld.sshfl [vmem:[#allocation1] sm:$0xff pattern:$0x75316420]  ;;  %v5062_v15 = vld.sshfl [vmem:[#allocation1 + $0x8] sm:$0xff pattern:$0x75316420] }
  0x2f   : > { %8244 = vst [vmem:[#allocation10_spill] sm:$0xff] %v5060_v14 }
  0x30   : > { %8245 = vst [vmem:[#allocation11_spill] sm:$0xff] %v5062_v15 }
  0x31   : > { %381 = vst [vmem:[#allocation1] ss:$2 sm:$0xff] %v280_v0  ;;  %v5064_v16 = vld.sshfl [vmem:[#allocation1 + $0x10] sm:$0xff pattern:$0x75316420] }
  0x32   : > { %8246 = vst [vmem:[#allocation12_spill] sm:$0xff] %v5064_v16 }
  0x33   : > { %383 = vst [vmem:[#allocation1 + $0x10] ss:$2 sm:$0xff] %v281_v1 }
  0x34   : > { %8263 = vst [vmem:[#allocation29_spill] sm:$0xff] %v5136_v60  ;;  %v5237_v60 = vld [vmem:[%s5036_s28 + $0x1c] sm:$0x77] }
  0x35   : > { %8264 = vst [vmem:[#allocation30_spill] sm:$0xff] %v5141_v62 }
  0x36   : > { %348 = vst [vmem:[#allocation1 + $0x30] ss:$2 sm:$0xff] %v287_v57 }
  0x38   : > { %v388_v17 = vld.sshfl [vmem:[#allocation1] sm:$0xff pattern:$0x75316420]  ;;  %v389_v18 = vld.sshfl [vmem:[#allocation1 + $0x8] sm:$0xff pattern:$0x75316420] }
  0x39   : > { %v414_v19 = vrot.slane %v388_v17, 5  ;;  %v415_v20 = vrot.slane %v389_v18, 5  ;;  %396 = vst [vmem:[#allocation1] ss:$2 sm:$0xff] %v284_v2  ;;  %v5161_v17 = vld [vmem:[%s5036_s28 + $0x4c] sm:$0x77] }
  0x3a   : > { %v5066_v22 = vld.sshfl [vmem:[#allocation1 + $0x10] sm:$0xff pattern:$0x75316420]  ;;  %v5068_v23 = vld.sshfl [vmem:[#allocation1 + $0x18] sm:$0xff pattern:$0x75316420] }
  0x3b   : > { %v4683_v21 = vpack.i.bf16 %v415_v20, %v414_v19  ;;  %397 = vst [vmem:[#allocation1 + $0x10] ss:$2 sm:$0xff] %v285_v3 }
  0x3d   : > { %4684 = vrot.lane.b32.xlu0 %v4683_v21, %s4973_s29  ;;  %v5163_v18 = vld.sshfl [vmem:[#allocation1 + $0x30] sm:$0xff pattern:$0x75316420]  ;;  %v5165_v19 = vld.sshfl [vmem:[#allocation1 + $0x38] sm:$0xff pattern:$0x75316420] }
  0x3e   : > { %8269 = vst [vmem:[#allocation35_spill] sm:$0xff] %v5163_v18 }
  0x3f   : > { %8270 = vst [vmem:[#allocation36_spill] sm:$0xff] %v5165_v19 }
  0x40   : > { %v5071_v24 = vld.sshfl [vmem:[#allocation1] sm:$0xff pattern:$0x75316420]  ;;  %v5073_v25 = vld.sshfl [vmem:[#allocation1 + $0x8] sm:$0xff pattern:$0x75316420] }
  0x41   : > { %408 = vst [vmem:[#allocation1] ss:$2 sm:$0xff] %v288_v8 }
  0x42   : > { %v5075_v26 = vld.sshfl [vmem:[#allocation1 + $0x10] sm:$0xff pattern:$0x75316420]  ;;  %v5077_v27 = vld.sshfl [vmem:[#allocation1 + $0x18] sm:$0xff pattern:$0x75316420] }
  0x43   : > { %8247 = vst [vmem:[#allocation13_spill] sm:$0xff] %v5075_v26 }
  0x44   : > { %8248 = vst [vmem:[#allocation14_spill] sm:$0xff] %v5077_v27 }
  0x45   : > { %409 = vst [vmem:[#allocation1 + $0x10] ss:$2 sm:$0xff] %v289_v9 }
  0x46   : > { %387 = vst [vmem:[#allocation1 + $0x30] ss:$2 sm:$0xff] %v283_v48 }
  0x48   : > { %v5079_v28 = vld.sshfl [vmem:[#allocation1] sm:$0xff pattern:$0x75316420]  ;;  %v5081_v29 = vld.sshfl [vmem:[#allocation1 + $0x8] sm:$0xff pattern:$0x75316420] }
  0x49   : > { %8249 = vst [vmem:[#allocation15_spill] sm:$0xff] %v5079_v28 }
  0x4a   : > { %8250 = vst [vmem:[#allocation16_spill] sm:$0xff] %v5081_v29 }
  0x4b   : > { %513 = vst [vmem:[#allocation1] ss:$2 sm:$0xff] %v280_v0 }
  0x4c   : > { %v5083_v30 = vld.sshfl [vmem:[#allocation1 + $0x10] sm:$0xff pattern:$0x75316420]  ;;  %v5085_v31 = vld.sshfl [vmem:[#allocation1 + $0x18] sm:$0xff pattern:$0x75316420] }
  0x4d   : > { %8251 = vst [vmem:[#allocation17_spill] sm:$0xff] %v5083_v30  ;;  %v5183_v16 = vld.sshfl [vmem:[#allocation1 + $0x38] sm:$0xff pattern:$0x75316420] }
  0x4e   : > { %8252 = vst [vmem:[#allocation18_spill] sm:$0xff] %v5085_v31 }
  0x4f   : > { %515 = vst [vmem:[#allocation1 + $0x10] ss:$2 sm:$0xff] %v281_v1  ;;  %v5148_v1 = vld [vmem:[%s5036_s28 + $0x44] sm:$0x77] }
  0x52   : > { %v520_v32 = vld.sshfl [vmem:[#allocation1] sm:$0xff pattern:$0x75316420]  ;;  %v521_v33 = vld.sshfl [vmem:[#allocation1 + $0x8] sm:$0xff pattern:$0x75316420] }
  0x53   : > { %v546_v34 = vrot.slane %v520_v32, 2  ;;  %v547_v35 = vrot.slane %v521_v33, 2  ;;  %528 = vst [vmem:[#allocation1] ss:$2 sm:$0xff] %v284_v2 }
  0x54   : > { %v5151_v2 = vld.sshfl [vmem:[#allocation1 + $0x20] sm:$0xff pattern:$0x75316420] }
  0x55   : > { %v4688_v36 = vpack.i.bf16 %v547_v35, %v546_v34 }
  0x56   : > { %v5087_v37 = vld.sshfl [vmem:[#allocation1 + $0x10] sm:$0xff pattern:$0x75316420]  ;;  %v5089_v38 = vld.sshfl [vmem:[#allocation1 + $0x18] sm:$0xff pattern:$0x75316420] }
  0x57   : > { %4689 = vrot.lane.b32.xlu1 %v4688_v36, %s4974_s30  ;;  %529 = vst [vmem:[#allocation1 + $0x10] ss:$2 sm:$0xff] %v285_v3  ;;  %v5153_v3 = vld.sshfl [vmem:[#allocation1 + $0x28] sm:$0xff pattern:$0x75316420] }
  0x58   : > { %398 = vst [vmem:[#allocation1 + $0x20] ss:$2 sm:$0xff] %v286_v45  ;;  %v5181_v36 = vld.sshfl [vmem:[#allocation1 + $0x30] sm:$0xff pattern:$0x75316420] }
  0x59   : > { %399 = vst [vmem:[#allocation1 + $0x30] ss:$2 sm:$0xff] %v287_v57 }
  0x5a   : > { %v5093_v40 = vld.sshfl [vmem:[#allocation1] sm:$0xff pattern:$0x75316420]  ;;  %v5095_v41 = vld.sshfl [vmem:[#allocation1 + $0x8] sm:$0xff pattern:$0x75316420] }
  0x5b   : > { %540 = vst [vmem:[#allocation1] ss:$2 sm:$0xff] %v288_v8 }
  0x5e   : > { %v5097_v42 = vld.sshfl [vmem:[#allocation1 + $0x10] sm:$0xff pattern:$0x75316420]  ;;  %v5099_v43 = vld.sshfl [vmem:[#allocation1 + $0x18] sm:$0xff pattern:$0x75316420] }
  0x5f   : > { %541 = vst [vmem:[#allocation1 + $0x10] ss:$2 sm:$0xff] %v289_v9  ;;  %v5172_v32 = vld.sshfl [vmem:[#allocation1 + $0x20] sm:$0xff pattern:$0x75316420] }
  0x60   : > { %8273 = vst [vmem:[#allocation39_spill] sm:$0xff] %v5172_v32  ;;  %v5174_v33 = vld.sshfl [vmem:[#allocation1 + $0x28] sm:$0xff pattern:$0x75316420] }
  0x61   : > { %8274 = vst [vmem:[#allocation40_spill] sm:$0xff] %v5174_v33  ;;  %v5199_v18 = vld.sshfl [vmem:[#allocation1 + $0x38] sm:$0xff pattern:$0x75316420] }
  0x62   : > { %v5110_v49 = vld.sshfl [vmem:[#allocation1] sm:$0xff pattern:$0x75316420]  ;;  %v5112_v50 = vld.sshfl [vmem:[#allocation1 + $0x8] sm:$0xff pattern:$0x75316420] }
  0x63   : > { %8255 = vst [vmem:[#allocation21_spill] sm:$0xff] %v5110_v49  ;;  %v4380_v49 = vld [vmem:[%s5036_s28 + $0x18] sm:$0x77] }
  0x64   : > { %8256 = vst [vmem:[#allocation22_spill] sm:$0xff] %v5112_v50 }
  0x65   : > { %655 = vst [vmem:[#allocation1] ss:$2 sm:$0xff] %v5102_v44 }
  0x66   : > { %v5118_v52 = vld.sshfl [vmem:[#allocation1 + $0x10] sm:$0xff pattern:$0x75316420]  ;;  %v5120_v53 = vld.sshfl [vmem:[#allocation1 + $0x18] sm:$0xff pattern:$0x75316420] }
  0x67   : > { %8257 = vst [vmem:[#allocation23_spill] sm:$0xff] %v5118_v52 }
  0x68   : > { %8258 = vst [vmem:[#allocation24_spill] sm:$0xff] %v5120_v53 }
  0x69   : > { %657 = vst [vmem:[#allocation1 + $0x10] ss:$2 sm:$0xff] %v5116_v51 }
  0x6a   : > { %517 = vst [vmem:[#allocation1 + $0x20] ss:$2 sm:$0xff] %v282_v39 }
  0x6b   : > { %8279 = vst [vmem:[#allocation45_spill] sm:$0xff] %v5199_v18 }
  0x6c   : > { %v5131_v58 = vld.sshfl [vmem:[#allocation1] sm:$0xff pattern:$0x75316420]  ;;  %v5133_v59 = vld.sshfl [vmem:[#allocation1 + $0x8] sm:$0xff pattern:$0x75316420] }
  0x6d   : > { %8261 = vst [vmem:[#allocation27_spill] sm:$0xff] %v5131_v58 }
  0x6e   : > { %8262 = vst [vmem:[#allocation28_spill] sm:$0xff] %v5133_v59 }
  0x6f   : > { %670 = vst [vmem:[#allocation1] ss:$2 sm:$0xff] %v5123_v54 }
  0x70   : > { %v5143_v63 = vld.sshfl [vmem:[#allocation1 + $0x10] sm:$0xff pattern:$0x75316420]  ;;  %v5145_v0 = vld.sshfl [vmem:[#allocation1 + $0x18] sm:$0xff pattern:$0x75316420] }
  0x71   : > { %8265 = vst [vmem:[#allocation31_spill] sm:$0xff] %v5143_v63  ;;  %v5188_v14 = vld.sshfl [vmem:[#allocation1 + $0x20] sm:$0xff pattern:$0x75316420] }
  0x72   : > { %8266 = vst [vmem:[#allocation32_spill] sm:$0xff] %v5145_v0  ;;  %v5190_v19 = vld.sshfl [vmem:[#allocation1 + $0x28] sm:$0xff pattern:$0x75316420] }
  0x73   : > { %671 = vst [vmem:[#allocation1 + $0x10] ss:$2 sm:$0xff] %v5139_v61 }
  0x74   : > { %530 = vst [vmem:[#allocation1 + $0x20] ss:$2 sm:$0xff] %v286_v45 }
  0x76   : > { %v5155_v8 = vld.sshfl [vmem:[#allocation1] sm:$0xff pattern:$0x75316420]  ;;  %v5157_v9 = vld.sshfl [vmem:[#allocation1 + $0x8] sm:$0xff pattern:$0x75316420] }
  0x77   : > { %8267 = vst [vmem:[#allocation33_spill] sm:$0xff] %v5155_v8 }
  0x78   : > { %8268 = vst [vmem:[#allocation34_spill] sm:$0xff] %v5157_v9 }
  0x79   : > { %682 = vst [vmem:[#allocation1] ss:$2 sm:$0xff] %v5148_v1 }
  0x7a   : > { %v5167_v20 = vld.sshfl [vmem:[#allocation1 + $0x10] sm:$0xff pattern:$0x75316420]  ;;  %v5169_v21 = vld.sshfl [vmem:[#allocation1 + $0x18] sm:$0xff pattern:$0x75316420] }
  0x7b   : > { %8271 = vst [vmem:[#allocation37_spill] sm:$0xff] %v5167_v20  ;;  %v5209_v45 = vld.sshfl [vmem:[#allocation1 + $0x20] sm:$0xff pattern:$0x75316420]  ;;  %v5229_v20 = vld [vmem:[%s5036_s28 + $0x34] sm:$0x77] }
  0x7c   : > { %8272 = vst [vmem:[#allocation38_spill] sm:$0xff] %v5169_v21  ;;  %v5211_v13 = vld.sshfl [vmem:[#allocation1 + $0x28] sm:$0xff pattern:$0x75316420] }
  0x7d   : > { %683 = vst [vmem:[#allocation1 + $0x10] ss:$2 sm:$0xff] %v5161_v17 }
  0x7e   : > { %8280 = vst [vmem:[#allocation46_spill] sm:$0xff] %v5209_v45 }
  0x7f   : > { %8281 = vst [vmem:[#allocation47_spill] sm:$0xff] %v5211_v13 }
  0x80   : > { %v5176_v34 = vld.sshfl [vmem:[#allocation1] sm:$0xff pattern:$0x75316420]  ;;  %v5178_v35 = vld.sshfl [vmem:[#allocation1 + $0x8] sm:$0xff pattern:$0x75316420] }
  0x81   : > { %8275 = vst [vmem:[#allocation41_spill] sm:$0xff] %v5176_v34  ;;  %v5197_v34 = vld.sshfl [vmem:[#allocation1 + $0x30] sm:$0xff pattern:$0x75316420] }
  0x82   : > { %8276 = vst [vmem:[#allocation42_spill] sm:$0xff] %v5178_v35 }
  0x83   : > { %726 = vst [vmem:[#allocation1 + $0x1] ss:$2 sm:$0xff] %v5102_v44 }
  0x84   : > { %v5185_v15 = vld.sshfl [vmem:[#allocation1 + $0x10] sm:$0xff pattern:$0x75316420]  ;;  %8278 = vst [vmem:[#allocation44_spill] sm:$0xff] %v5197_v34 }
  0x85   : > { %8277 = vst [vmem:[#allocation43_spill] sm:$0xff] %v5185_v15 }
  0x86   : > { %728 = vst [vmem:[#allocation1 + $0x11] ss:$2 sm:$0xff] %v5116_v51 }
  0x87   : > { %519 = vst [vmem:[#allocation1 + $0x30] ss:$2 sm:$0xff] %v283_v48 }
  0x88   : > { %659 = vst [vmem:[#allocation1 + $0x20] ss:$2 sm:$0xff] %v5207_v55 }
  0x8a   : > { %v5192_v39 = vld.sshfl [vmem:[#allocation1] sm:$0xff pattern:$0x75316420]  ;;  %v5194_v35 = vld.sshfl [vmem:[#allocation1 + $0x8] sm:$0xff pattern:$0x75316420] }
  0x8b   : > { %741 = vst [vmem:[#allocation1 + $0x1] ss:$2 sm:$0xff] %v5123_v54 }
  0x8d   : > { %v5201_v56 = vld.sshfl [vmem:[#allocation1 + $0x10] sm:$0xff pattern:$0x75316420]  ;;  %v5203_v15 = vld.sshfl [vmem:[#allocation1 + $0x18] sm:$0xff pattern:$0x75316420] }
  0x8e   : > { %742 = vst [vmem:[#allocation1 + $0x11] ss:$2 sm:$0xff] %v5139_v61  ;;  %v5219_v48 = vld.sshfl [vmem:[#allocation1 + $0x30] sm:$0xff pattern:$0x75316420] }
  0x8f   : > { %v5221_v10 = vld.sshfl [vmem:[#allocation1 + $0x38] sm:$0xff pattern:$0x75316420]  ;;  %v5231_v8 = vld.sshfl [vmem:[#allocation1 + $0x20] sm:$0xff pattern:$0x75316420] }
  0x90   : > { %531 = vst [vmem:[#allocation1 + $0x30] ss:$2 sm:$0xff] %v287_v57  ;;  %v5233_v62 = vld.sshfl [vmem:[#allocation1 + $0x28] sm:$0xff pattern:$0x75316420] }
  0x91   : > { %8282 = vst [vmem:[#allocation48_spill] sm:$0xff] %v5231_v8 }
  0x92   : > { %v5214_v21 = vld.sshfl [vmem:[#allocation1] sm:$0xff pattern:$0x75316420]  ;;  %v5216_v11 = vld.sshfl [vmem:[#allocation1 + $0x8] sm:$0xff pattern:$0x75316420] }
  0x93   : > { %753 = vst [vmem:[#allocation1 + $0x1] ss:$2 sm:$0xff] %v5148_v1 }
  0x94   : > { %8283 = vst [vmem:[#allocation49_spill] sm:$0xff] %v5233_v62 }
  0x95   : > { %v5223_v12 = vld.sshfl [vmem:[#allocation1 + $0x10] sm:$0xff pattern:$0x75316420]  ;;  %v5225_v9 = vld.sshfl [vmem:[#allocation1 + $0x18] sm:$0xff pattern:$0x75316420] }
  0x96   : > { %754 = vst [vmem:[#allocation1 + $0x11] ss:$2 sm:$0xff] %v5161_v17 }
  0x97   : > { %672 = vst [vmem:[#allocation1 + $0x20] ss:$2 sm:$0xff] %v5229_v20  ;;  %v5244_v29 = vld.sshfl [vmem:[#allocation1 + $0x30] sm:$0xff pattern:$0x75316420] }
  0x98   : > { %8286 = vst [vmem:[#allocation52_spill] sm:$0xff] %v5244_v29  ;;  %v5246_v46 = vld.sshfl [vmem:[#allocation1 + $0x38] sm:$0xff pattern:$0x75316420] }
  0x99   : > { %8287 = vst [vmem:[#allocation53_spill] sm:$0xff] %v5246_v46 }
  0x9a   : > { %v5239_v47 = vld.sshfl [vmem:[#allocation1] sm:$0xff pattern:$0x75316420]  ;;  %v5241_v57 = vld.sshfl [vmem:[#allocation1 + $0x8] sm:$0xff pattern:$0x75316420] }
  0x9b   : > { %8284 = vst [vmem:[#allocation50_spill] sm:$0xff] %v5239_v47 }
  0x9c   : > { %8285 = vst [vmem:[#allocation51_spill] sm:$0xff] %v5241_v57  ;;  %v5260_v57 = vld [vmem:[%s5036_s28 + $0x3c] sm:$0x77] }
  0x9d   : > { %837 = vst [vmem:[#allocation1] ss:$2 sm:$0xff] %v5102_v44  ;;  %v5249_v31 = vld.sshfl [vmem:[#allocation1 + $0x10] sm:$0xff pattern:$0x75316420] }
  0x9e   : > { %661 = vst [vmem:[#allocation1 + $0x30] ss:$2 sm:$0xff] %v5237_v60  ;;  %v5251_v30 = vld.sshfl [vmem:[#allocation1 + $0x18] sm:$0xff pattern:$0x75316420] }
  0x9f   : > { %8288 = vst [vmem:[#allocation54_spill] sm:$0xff] %v5249_v31  ;;  %v5254_v62 = vld.sshfl [vmem:[#allocation1 + $0x20] sm:$0xff pattern:$0x75316420] }
  0xa0   : > { %8289 = vst [vmem:[#allocation55_spill] sm:$0xff] %v5251_v30  ;;  %v5256_v8 = vld.sshfl [vmem:[#allocation1 + $0x28] sm:$0xff pattern:$0x75316420] }
  0xa1   : > { %839 = vst [vmem:[#allocation1 + $0x10] ss:$2 sm:$0xff] %v5116_v51 }
  0xa2   : > { %8290 = vst [vmem:[#allocation56_spill] sm:$0xff] %v5254_v62 }
  0xa3   : > { %8291 = vst [vmem:[#allocation57_spill] sm:$0xff] %v5256_v8 }
  0xa4   : > { %730 = vst [vmem:[#allocation1 + $0x21] ss:$2 sm:$0xff] %v5207_v55  ;;  %v844_v44 = vld.sshfl [vmem:[#allocation1] sm:$0xff pattern:$0x75316420] }
  0xa5   : > { %v845_v7 = vld.sshfl [vmem:[#allocation1 + $0x8] sm:$0xff pattern:$0x75316420]  ;;  %v870_v52 = vrot.slane %v844_v44, 1 }
  0xa6   : > { %v871_v50 = vrot.slane %v845_v7, 1  ;;  %852 = vst [vmem:[#allocation1] ss:$2 sm:$0xff] %v5123_v54  ;;  %v5263_v28 = vld.sshfl [vmem:[#allocation1 + $0x30] sm:$0xff pattern:$0x75316420] }
  0xa7   : > { %8292 = vst [vmem:[#allocation58_spill] sm:$0xff] %v5263_v28  ;;  %v5265_v31 = vld.sshfl [vmem:[#allocation1 + $0x38] sm:$0xff pattern:$0x75316420] }
  0xa8   : > { %8293 = vst [vmem:[#allocation59_spill] sm:$0xff] %v5265_v31  ;;  %v4698_v30 = vpack.i.bf16 %v871_v50, %v870_v52  ;;  %v846_v51 = vld.sshfl [vmem:[#allocation1 + $0x10] sm:$0xff pattern:$0x75316420]  ;;  %v4693_v50 = vpack.i.bf16 %v5194_v35, %v5192_v39 }
  0xa9   : > { %673 = vst [vmem:[#allocation1 + $0x30] ss:$2 sm:$0xff] %v5260_v57  ;;  %v847_v62 = vld.sshfl [vmem:[#allocation1 + $0x18] sm:$0xff pattern:$0x75316420]  ;;  %v872_v52 = vrot.slane %v846_v51, 1 }
  0xaa   : > { %4699 = vrot.lane.b32.xlu0 %v4698_v30, %s4974_s30  ;;  %853 = vst [vmem:[#allocation1 + $0x10] ss:$2 sm:$0xff] %v5139_v61  ;;  %v873_v30 = vrot.slane %v847_v62, 1  ;;  %4694 = vrot.lane.b32.xlu2 %v4693_v50, %s4973_s29  ;;  %v5308_v50 = vld [vmem:[%s5036_s28 + $0x10] sm:$0x77] }
  0xab   : > { %v5270_v8 = vld.sshfl [vmem:[#allocation1 + $0x20] sm:$0xff pattern:$0x75316420]  ;;  %v5272_v44 = vld.sshfl [vmem:[#allocation1 + $0x28] sm:$0xff pattern:$0x75316420] }
  0xac   : > { %743 = vst [vmem:[#allocation1 + $0x21] ss:$2 sm:$0xff] %v5229_v20  ;;  %v4703_v28 = vpack.i.bf16 %v873_v30, %v872_v52 }
  0xad   : > { %v5275_v7 = vld.sshfl [vmem:[#allocation1] sm:$0xff pattern:$0x75316420]  ;;  %v5277_v54 = vld.sshfl [vmem:[#allocation1 + $0x8] sm:$0xff pattern:$0x75316420] }
  0xae   : > { %864 = vst [vmem:[#allocation1] ss:$2 sm:$0xff] %v5148_v1  ;;  %v5293_v1 = vld [vmem:[%s5036_s28 + $0x8] sm:$0x77]  ;;  %4704 = vrot.lane.b32.xlu1 %v4703_v28, %s4974_s30 }
  0xb0   : > { %v5282_v31 = vld.sshfl [vmem:[#allocation1 + $0x30] sm:$0xff pattern:$0x75316420]  ;;  %v5284_v61 = vld.sshfl [vmem:[#allocation1 + $0x38] sm:$0xff pattern:$0x75316420] }
  0xb1   : > { %8294 = vst [vmem:[#allocation60_spill] sm:$0xff] %v5282_v31  ;;  %v5288_v0 = vld.sshfl [vmem:[#allocation1 + $0x10] sm:$0xff pattern:$0x75316420] }
  0xb2   : > { %8295 = vst [vmem:[#allocation61_spill] sm:$0xff] %v5284_v61  ;;  %v5290_v53 = vld.sshfl [vmem:[#allocation1 + $0x18] sm:$0xff pattern:$0x75316420] }
  0xb3   : > { %732 = vst [vmem:[#allocation1 + $0x31] ss:$2 sm:$0xff] %v5237_v60  ;;  %v5297_v62 = vld.sshfl [vmem:[#allocation1 + $0x20] sm:$0xff pattern:$0x75316420] }
  0xb4   : > { %865 = vst [vmem:[#allocation1 + $0x10] ss:$2 sm:$0xff] %v5161_v17  ;;  %v5299_v35 = vld.sshfl [vmem:[#allocation1 + $0x28] sm:$0xff pattern:$0x75316420] }
  0xb5   : > { %8296 = vst [vmem:[#allocation62_spill] sm:$0xff] %v5297_v62  ;;  %v5302_v39 = vld.sshfl [vmem:[#allocation1] sm:$0xff pattern:$0x75316420] }
  0xb6   : > { %8297 = vst [vmem:[#allocation63_spill] sm:$0xff] %v5299_v35  ;;  %v5304_v51 = vld.sshfl [vmem:[#allocation1 + $0x8] sm:$0xff pattern:$0x75316420] }
  0xb7   : > { %841 = vst [vmem:[#allocation1 + $0x20] ss:$2 sm:$0xff] %v5207_v55  ;;  %v5320_v55 = vld [vmem:[%s5036_s28 + $0x28] sm:$0x77] }
  0xb8   : > { %8298 = vst [vmem:[#allocation64_spill] sm:$0xff] %v5302_v39 }
  0xb9   : > { %8299 = vst [vmem:[#allocation65_spill] sm:$0xff] %v5304_v51 }
  0xba   : > { %978 = vst [vmem:[#allocation1] ss:$2 sm:$0xff] %v5293_v1  ;;  %v5310_v52 = vld.sshfl [vmem:[#allocation1 + $0x30] sm:$0xff pattern:$0x75316420] }
  0xbb   : > { %v5312_v17 = vld.sshfl [vmem:[#allocation1 + $0x38] sm:$0xff pattern:$0x75316420]  ;;  %v5315_v28 = vld.sshfl [vmem:[#allocation1 + $0x10] sm:$0xff pattern:$0x75316420] }
  0xbc   : > { %744 = vst [vmem:[#allocation1 + $0x31] ss:$2 sm:$0xff] %v5260_v57  ;;  %v5317_v30 = vld.sshfl [vmem:[#allocation1 + $0x18] sm:$0xff pattern:$0x75316420] }
  0xbd   : > { %8300 = vst [vmem:[#allocation66_spill] sm:$0xff] %v5315_v28  ;;  %v5334_v28 = vld [vmem:[%s5036_s28 + $0x30] sm:$0x77] }
  0xbe   : > { %8301 = vst [vmem:[#allocation67_spill] sm:$0xff] %v5317_v30  ;;  %v5323_v61 = vld.sshfl [vmem:[#allocation1 + $0x20] sm:$0xff pattern:$0x75316420] }
  0xbf   : > { %980 = vst [vmem:[#allocation1 + $0x10] ss:$2 sm:$0xff] %v5308_v50  ;;  %v5325_v31 = vld.sshfl [vmem:[#allocation1 + $0x28] sm:$0xff pattern:$0x75316420] }
  0xc0   : > { %854 = vst [vmem:[#allocation1 + $0x20] ss:$2 sm:$0xff] %v5229_v20  ;;  %v5346_v20 = vld [vmem:[%s5036_s28 + $0x48] sm:$0x77] }
  0xc1   : > { %v5328_v51 = vld.sshfl [vmem:[#allocation1] sm:$0xff pattern:$0x75316420]  ;;  %v5330_v6 = vld.sshfl [vmem:[#allocation1 + $0x8] sm:$0xff pattern:$0x75316420] }
  0xc2   : > { %8302 = vst [vmem:[#allocation68_spill] sm:$0xff] %v5328_v51 }
  0xc3   : > { %8303 = vst [vmem:[#allocation69_spill] sm:$0xff] %v5330_v6  ;;  %v5336_v30 = vld.sshfl [vmem:[#allocation1 + $0x30] sm:$0xff pattern:$0x75316420]  ;;  %v5398_v6 = vld [vmem:[%s5036_s28 + $0x40] sm:$0x77] }
  0xc4   : > { %993 = vst [vmem:[#allocation1] ss:$2 sm:$0xff] %v5320_v55  ;;  %v5338_v5 = vld.sshfl [vmem:[#allocation1 + $0x38] sm:$0xff pattern:$0x75316420] }
  0xc5   : > { %8304 = vst [vmem:[#allocation70_spill] sm:$0xff] %v5336_v30 }
  0xc6   : > { %8305 = vst [vmem:[#allocation71_spill] sm:$0xff] %v5338_v5  ;;  %v5341_v47 = vld.sshfl [vmem:[#allocation1 + $0x10] sm:$0xff pattern:$0x75316420] }
  0xc7   : > { %843 = vst [vmem:[#allocation1 + $0x30] ss:$2 sm:$0xff] %v5237_v60  ;;  %v5343_v39 = vld.sshfl [vmem:[#allocation1 + $0x18] sm:$0xff pattern:$0x75316420] }
  0xc8   : > { %8306 = vst [vmem:[#allocation72_spill] sm:$0xff] %v5341_v47  ;;  %v5350_v63 = vld.sshfl [vmem:[#allocation1 + $0x20] sm:$0xff pattern:$0x75316420]  ;;  %v5360_v60 = vld [vmem:[%s5036_s28 + $0x50] sm:$0x77] }
  0xc9   : > { %8307 = vst [vmem:[#allocation73_spill] sm:$0xff] %v5343_v39  ;;  %v5352_v59 = vld.sshfl [vmem:[#allocation1 + $0x28] sm:$0xff pattern:$0x75316420]  ;;  %v5373_v47 = vld [vmem:[%s5036_s28 + $0x38] sm:$0x77] }
  0xca   : > { %994 = vst [vmem:[#allocation1 + $0x10] ss:$2 sm:$0xff] %v5334_v28 }
  0xcb   : > { %8308 = vst [vmem:[#allocation74_spill] sm:$0xff] %v5350_v63  ;;  %v5354_v30 = vld.sshfl [vmem:[#allocation1] sm:$0xff pattern:$0x75316420] }
  0xcc   : > { %8309 = vst [vmem:[#allocation75_spill] sm:$0xff] %v5352_v59  ;;  %v5356_v5 = vld.sshfl [vmem:[#allocation1 + $0x8] sm:$0xff pattern:$0x75316420] }
  0xcd   : > { %982 = vst [vmem:[#allocation1 + $0x20] ss:$2 sm:$0xff] %v4380_v49 }
  0xce   : > { %8310 = vst [vmem:[#allocation76_spill] sm:$0xff] %v5354_v30  ;;  %v5362_v39 = vld.sshfl [vmem:[#allocation1 + $0x30] sm:$0xff pattern:$0x75316420] }
  0xcf   : > { %8311 = vst [vmem:[#allocation77_spill] sm:$0xff] %v5356_v5  ;;  %v5364_v18 = vld.sshfl [vmem:[#allocation1 + $0x38] sm:$0xff pattern:$0x75316420] }
  0xd0   : > { %1005 = vst [vmem:[#allocation1] ss:$2 sm:$0xff] %v5346_v20 }
  0xd1   : > { %855 = vst [vmem:[#allocation1 + $0x30] ss:$2 sm:$0xff] %v5260_v57  ;;  %v5367_v34 = vld.sshfl [vmem:[#allocation1 + $0x10] sm:$0xff pattern:$0x75316420] }
  0xd2   : > { %8312 = vst [vmem:[#allocation78_spill] sm:$0xff] %v5367_v34  ;;  %v5369_v33 = vld.sshfl [vmem:[#allocation1 + $0x18] sm:$0xff pattern:$0x75316420] }
  0xd3   : > { %8313 = vst [vmem:[#allocation79_spill] sm:$0xff] %v5369_v33 }
  0xd4   : > { %1006 = vst [vmem:[#allocation1 + $0x10] ss:$2 sm:$0xff] %v5360_v60  ;;  %v5375_v5 = vld.sshfl [vmem:[#allocation1 + $0x20] sm:$0xff pattern:$0x75316420] }
  0xd5   : > { %8314 = vst [vmem:[#allocation80_spill] sm:$0xff] %v5375_v5  ;;  %v5377_v30 = vld.sshfl [vmem:[#allocation1 + $0x28] sm:$0xff pattern:$0x75316420] }
  0xd6   : > { %8315 = vst [vmem:[#allocation81_spill] sm:$0xff] %v5377_v30 }
  0xd7   : > { %995 = vst [vmem:[#allocation1 + $0x20] ss:$2 sm:$0xff] %v5373_v47  ;;  %v5381_v35 = vld.sshfl [vmem:[#allocation1] sm:$0xff pattern:$0x75316420] }
  0xd8   : > { %8316 = vst [vmem:[#allocation82_spill] sm:$0xff] %v5381_v35  ;;  %v5383_v46 = vld.sshfl [vmem:[#allocation1 + $0x8] sm:$0xff pattern:$0x75316420] }
  0xd9   : > { %8317 = vst [vmem:[#allocation83_spill] sm:$0xff] %v5383_v46  ;;  %v5386_v57 = vld.sshfl [vmem:[#allocation1 + $0x30] sm:$0xff pattern:$0x75316420] }
  0xda   : > { %1048 = vst [vmem:[#allocation1] ss:$2 sm:$0xff] %v5293_v1  ;;  %v5388_v33 = vld.sshfl [vmem:[#allocation1 + $0x38] sm:$0xff pattern:$0x75316420] }
  0xdb   : > { %8318 = vst [vmem:[#allocation84_spill] sm:$0xff] %v5386_v57  ;;  %v5390_v34 = vld.sshfl [vmem:[#allocation1 + $0x10] sm:$0xff pattern:$0x75316420] }
  0xdc   : > { %8319 = vst [vmem:[#allocation85_spill] sm:$0xff] %v5388_v33 }
  0xdd   : > { %984 = vst [vmem:[#allocation1 + $0x30] ss:$2 sm:$0xff] %v4381_v4 }
  0xde   : > { %8320 = vst [vmem:[#allocation86_spill] sm:$0xff] %v5390_v34  ;;  %v5393_v5 = vld.sshfl [vmem:[#allocation1 + $0x20] sm:$0xff pattern:$0x75316420] }
  0xdf   : > { %1050 = vst [vmem:[#allocation1 + $0x10] ss:$2 sm:$0xff] %v5308_v50  ;;  %v5395_v30 = vld.sshfl [vmem:[#allocation1 + $0x28] sm:$0xff pattern:$0x75316420] }
  0xe0   : > { %8321 = vst [vmem:[#allocation87_spill] sm:$0xff] %v5393_v5 }
  0xe1   : > { %8322 = vst [vmem:[#allocation88_spill] sm:$0xff] %v5395_v30  ;;  %v1055_v35 = vld.sshfl [vmem:[#allocation1] sm:$0xff pattern:$0x75316420] }
  0xe2   : > { %1052 = vst [vmem:[#allocation1 + $0x20] ss:$2 sm:$0xff] %v4380_v49  ;;  %v1056_v46 = vld.sshfl [vmem:[#allocation1 + $0x8] sm:$0xff pattern:$0x75316420]  ;;  %v1081_v51 = vrot.slane %v1055_v35, 3 }
  0xe3   : > { %v1082_v58 = vrot.slane %v1056_v46, 3  ;;  %1063 = vst [vmem:[#allocation1] ss:$2 sm:$0xff] %v5320_v55 }
  0xe4   : > { %v5401_v29 = vld.sshfl [vmem:[#allocation1 + $0x30] sm:$0xff pattern:$0x75316420]  ;;  %v5403_v33 = vld.sshfl [vmem:[#allocation1 + $0x38] sm:$0xff pattern:$0x75316420] }
  0xe5   : > { %8323 = vst [vmem:[#allocation89_spill] sm:$0xff] %v5401_v29  ;;  %v4708_v34 = vpack.i.bf16 %v1082_v58, %v1081_v51 }
  0xe6   : > { %8324 = vst [vmem:[#allocation90_spill] sm:$0xff] %v5403_v33  ;;  %v1057_v13 = vld.sshfl [vmem:[#allocation1 + $0x10] sm:$0xff pattern:$0x75316420] }
  0xe7   : > { %996 = vst [vmem:[#allocation1 + $0x30] ss:$2 sm:$0xff] %v5398_v6  ;;  %v1058_v5 = vld.sshfl [vmem:[#allocation1 + $0x18] sm:$0xff pattern:$0x75316420]  ;;  %4709 = vrot.lane.b32.xlu2 %v4708_v34, %s4973_s29 }
  0xe8   : > { %1064 = vst [vmem:[#allocation1 + $0x10] ss:$2 sm:$0xff] %v5334_v28 }
  0xe9   : > { %v5408_v30 = vld.sshfl [vmem:[#allocation1 + $0x28] sm:$0xff pattern:$0x75316420]  ;;  %v5410_v57 = vld.sshfl [vmem:[#allocation1 + $0x20] sm:$0xff pattern:$0x75316420] }
  0xea   : > { %1065 = vst [vmem:[#allocation1 + $0x20] ss:$2 sm:$0xff] %v5373_v47  ;;  %v5413_v46 = vld.sshfl [vmem:[#allocation1] sm:$0xff pattern:$0x75316420] }
  0xeb   : > { %v5415_v35 = vld.sshfl [vmem:[#allocation1 + $0x8] sm:$0xff pattern:$0x75316420] }
  0xec   : > { %1075 = vst [vmem:[#allocation1] ss:$2 sm:$0xff] %v5346_v20 }
  0xee   : > { %v5418_v58 = vld.sshfl [vmem:[#allocation1 + $0x30] sm:$0xff pattern:$0x75316420]  ;;  %v5420_v51 = vld.sshfl [vmem:[#allocation1 + $0x38] sm:$0xff pattern:$0x75316420] }
  0xef   : > { %8325 = vst [vmem:[#allocation91_spill] sm:$0xff] %v5418_v58  ;;  %v5422_v33 = vld.sshfl [vmem:[#allocation1 + $0x10] sm:$0xff pattern:$0x75316420] }
  0xf0   : > { %8326 = vst [vmem:[#allocation92_spill] sm:$0xff] %v5420_v51  ;;  %v5424_v34 = vld.sshfl [vmem:[#allocation1 + $0x18] sm:$0xff pattern:$0x75316420] }
  0xf1   : > { %1054 = vst [vmem:[#allocation1 + $0x30] ss:$2 sm:$0xff] %v4381_v4  ;;  %v5427_v29 = vld.sshfl [vmem:[#allocation1 + $0x20] sm:$0xff pattern:$0x75316420] }
  0xf2   : > { %1076 = vst [vmem:[#allocation1 + $0x10] ss:$2 sm:$0xff] %v5360_v60  ;;  %v5429_v59 = vld.sshfl [vmem:[#allocation1 + $0x28] sm:$0xff pattern:$0x75316420] }
  0xf3   : > { %8327 = vst [vmem:[#allocation93_spill] sm:$0xff] %v5427_v29  ;;  %v5431_v32 = vld.sshfl [vmem:[#allocation1] sm:$0xff pattern:$0x75316420] }
  0xf4   : > { %8328 = vst [vmem:[#allocation94_spill] sm:$0xff] %v5429_v59  ;;  %v5433_v62 = vld.sshfl [vmem:[#allocation1 + $0x8] sm:$0xff pattern:$0x75316420] }
  0xf5   : > { %1183 = vst [vmem:[#allocation1 + $0x20] ss:$2 sm:$0xff] %v4380_v49 }
  0xf6   : > { %8329 = vst [vmem:[#allocation95_spill] sm:$0xff] %v5431_v32  ;;  %v875_v32 = vrot.slane %v5325_v31, 1 }
  0xf7   : > { %8330 = vst [vmem:[#allocation96_spill] sm:$0xff] %v5433_v62  ;;  %v549_v62 = vrot.slane %v5089_v38, 2 }
  0xf8   : > { %1179 = vst [vmem:[#allocation1] ss:$2 sm:$0xff] %v5293_v1  ;;  %v5436_v58 = vld.sshfl [vmem:[#allocation1 + $0x30] sm:$0xff pattern:$0x75316420]  ;;  %v548_v1 = vrot.slane %v5087_v37, 2 }
  0xf9   : > { %v5438_v51 = vld.sshfl [vmem:[#allocation1 + $0x38] sm:$0xff pattern:$0x75316420]  ;;  %v5441_v63 = vld.sshfl [vmem:[#allocation1 + $0x10] sm:$0xff pattern:$0x75316420] }
  0xfa   : > { %1066 = vst [vmem:[#allocation1 + $0x30] ss:$2 sm:$0xff] %v5398_v6  ;;  %v5443_v45 = vld.sshfl [vmem:[#allocation1 + $0x18] sm:$0xff pattern:$0x75316420]  ;;  %v4713_v37 = vpack.i.bf16 %v549_v62, %v548_v1  ;;  %v1085_v62 = vrot.slane %v5410_v57, 3 }
  0xfb   : > { %8331 = vst [vmem:[#allocation97_spill] sm:$0xff] %v5441_v63  ;;  %v876_v63 = vrot.slane %v5362_v39, 1  ;;  %v420_v1 = vrot.slane %v5181_v36, 5  ;;  %v1090_v36 = vrot.slane %v5415_v35, 3  ;;  %v881_v35 = vrot.slane %v5290_v53, 1 }
  0xfc   : > { %8332 = vst [vmem:[#allocation98_spill] sm:$0xff] %v5443_v45  ;;  %v1190_v27 = vld.sshfl [vmem:[#allocation1 + $0x20] sm:$0xff pattern:$0x75316420] }
  0xfd   : > { %1181 = vst [vmem:[#allocation1 + $0x10] ss:$2 sm:$0xff] %v5308_v50  ;;  %v1083_v50 = vrot.slane %v1057_v13, 3  ;;  %v1191_v38 = vld.sshfl [vmem:[#allocation1 + $0x28] sm:$0xff pattern:$0x75316420] }
  0xfe   : > { %1196 = vst [vmem:[#allocation1 + $0x20] ss:$2 sm:$0xff] %v5373_v47  ;;  %v416_v13 = vrot.slane %v5066_v22, 5 }
  0xff   : > { %v1187_v59 = vld.sshfl [vmem:[#allocation1 + $0x8] sm:$0xff pattern:$0x75316420]  ;;  %v1186_v49 = vld.sshfl [vmem:[#allocation1] sm:$0xff pattern:$0x75316420] }
 0x100   : > { %1214 = vrot.lane.b32.xlu1 %v1187_v59, %s4974_s30  ;;  %1212 = vrot.lane.b32.xlu0 %v1186_v49, %s4974_s30  ;;  %1194 = vst [vmem:[#allocation1] ss:$2 sm:$0xff] %v5320_v55  ;;  %v4748_v59 = vpack.i.bf16 %v876_v63, %v875_v32  ;;  %v1084_v55 = vrot.slane %v1058_v5, 3  ;;  %v874_v5 = vrot.slane %v5323_v61, 1  ;;  %v4723_v32 = vpack.i.bf16 %v5203_v15, %v5201_v56 }
 0x101   : > { %v5453_v29 = vld.sshfl [vmem:[#allocation1 + $0x30] sm:$0xff pattern:$0x75316420]  ;;  %v5455_v45 = vld.sshfl [vmem:[#allocation1 + $0x38] sm:$0xff pattern:$0x75316420]  ;;  %v4738_v61 = vpack.i.bf16 %v5270_v8, %v1085_v62 }
 0x102   : > { %1185 = vst [vmem:[#allocation1 + $0x30] ss:$2 sm:$0xff] %v4381_v4  ;;  %v4718_v31 = vpack.i.bf16 %v1084_v55, %v1083_v50  ;;  %v417_v4 = vrot.slane %v5068_v23, 5  ;;  %v418_v23 = vrot.slane %v5151_v2, 5  ;;  %v553_v56 = vrot.slane %v5221_v10, 2  ;;  %v8337_v62 = vld [vmem:[#allocation93_spill] sm:$0xff] }
 0x103   : > { %v877_v2 = vrot.slane %v5364_v18, 1  ;;  %v552_v8 = vrot.slane %v5219_v48, 2  ;;  %v1088_v10 = vrot.slane %v5438_v51, 3  ;;  %v419_v18 = vrot.slane %v5153_v3, 5 }
 0x104   : > { %v1188_v26 = vld.sshfl [vmem:[#allocation1 + $0x10] sm:$0xff pattern:$0x75316420]  ;;  %v1189_v49 = vld.sshfl [vmem:[#allocation1 + $0x18] sm:$0xff pattern:$0x75316420]  ;;  %v4728_v63 = vpack.i.bf16 %v417_v4, %v416_v13 }
 0x105   : > { %1216 = vrot.lane.b32.xlu2 %v1188_v26, %s4974_s30  ;;  %1195 = vst [vmem:[#allocation1 + $0x10] ss:$2 sm:$0xff] %v5334_v28  ;;  %v550_v26 = vrot.slane %v5188_v14, 2  ;;  %v1086_v14 = vrot.slane %v5408_v30, 3  ;;  %v551_v28 = vrot.slane %v5190_v19, 2  ;;  %v4758_v30 = vpack.i.bf16 %v553_v56, %v877_v2  ;;  %v8333_v13 = vld [vmem:[#allocation13_spill] sm:$0xff] }
 0x106   : > { %v4768_v19 = vpack.i.bf16 %v1088_v10, %v5310_v52  ;;  %v554_v48 = vrot.slane %v5093_v40, 2  ;;  %v4773_v50 = vpack.i.bf16 %v419_v18, %v5312_v17  ;;  %v1089_v17 = vrot.slane %v5413_v46, 3  ;;  %v8339_v56 = vld [vmem:[#allocation39_spill] sm:$0xff] }
 0x107   : > { %v4733_v47 = vpack.i.bf16 %v550_v26, %v874_v5  ;;  %v4743_v15 = vpack.i.bf16 %v1086_v14, %v418_v23  ;;  %v1198_v51 = vld.sshfl [vmem:[#allocation1] sm:$0xff pattern:$0x75316420]  ;;  %v879_v55 = vrot.slane %v5277_v54, 1  ;;  %v555_v54 = vrot.slane %v5095_v41, 2  ;;  %v8334_v26 = vld [vmem:[#allocation14_spill] sm:$0xff]  ;;  %v5547_v23 = vpop.permute.xlu1 %4689  ;;  %v5549_v14 = vpop.permute.xlu0 %4684 }
 0x108   : > { %4714 = vrot.lane.b32.xlu1 %v4713_v37, %s4974_s30  ;;  %1218 = vrot.lane.b32.xlu0 %v1189_v49, %s4974_s30  ;;  %v880_v37 = vrot.slane %v5288_v0, 1  ;;  %v556_v0 = vrot.slane %v5097_v42, 2  ;;  %v424_v4 = vrot.slane %v8333_v13, 5  ;;  %v425_v5 = vrot.slane %v8334_v26, 5 }
 0x109   : > { %v1192_v22 = vld.sshfl [vmem:[#allocation1 + $0x30] sm:$0xff pattern:$0x75316420]  ;;  %v1193_v39 = vld.sshfl [vmem:[#allocation1 + $0x38] sm:$0xff pattern:$0x75316420] }
 0x10a   : > { %1197 = vst [vmem:[#allocation1 + $0x30] ss:$2 sm:$0xff] %v5398_v6  ;;  %v1087_v6 = vrot.slane %v5436_v58, 3  ;;  %v878_v58 = vrot.slane %v5275_v7, 1  ;;  %v4798_v46 = vpack.i.bf16 %v880_v37, %v879_v55  ;;  %v426_v2 = vrot.slane %v8339_v56, 5 }
 0x10c   : > { %v4763_v57 = vpack.i.bf16 %v5272_v44, %v1087_v6  ;;  %v421_v44 = vrot.slane %v5183_v16, 5  ;;  %v1200_v3 = vld.sshfl [vmem:[#allocation1 + $0x10] sm:$0xff pattern:$0x75316420]  ;;  %v4783_v40 = vpack.i.bf16 %v554_v48, %v878_v58  ;;  %v422_v16 = vrot.slane %v5071_v24, 5 }
 0x10d   : > { %4719 = vrot.lane.b32.xlu2 %v4718_v31, %s4973_s29  ;;  %v1201_v52 = vld.sshfl [vmem:[#allocation1 + $0x18] sm:$0xff pattern:$0x75316420]  ;;  %v557_v24 = vrot.slane %v5099_v43, 2  ;;  %v4803_v31 = vpack.i.bf16 %v556_v0, %v555_v54  ;;  %v1092_v43 = vrot.slane %v5424_v34, 3  ;;  %v8341_v6 = vld [vmem:[#allocation75_spill] sm:$0xff] }
 0x10e   : > { %v4778_v7 = vpack.i.bf16 %v421_v44, %v420_v1  ;;  %1207 = vst [vmem:[#allocation1 + $0x10] ss:$2 sm:$0xff] %v5360_v60  ;;  %v4793_v49 = vpack.i.bf16 %v1090_v36, %v422_v16  ;;  %v1091_v60 = vrot.slane %v5422_v33, 3  ;;  %v5525_v33 = vpop.permute.xlu2 %4694  ;;  %v8343_v58 = vld [vmem:[#allocation47_spill] sm:$0xff]  ;;  %v8344_v44 = vld [vmem:[#allocation52_spill] sm:$0xff]  ;;  %v4687_v16 = vunpack.i.h.bf16 %v5549_v14  ;;  %v8347_v0 = vld [vmem:[#allocation69_spill] sm:$0xff] }
 0x10f   : > { %v4818_v53 = vpack.i.bf16 %v1092_v43, %v5223_v12  ;;  %v1202_v12 = vld.sshfl [vmem:[#allocation1 + $0x20] sm:$0xff pattern:$0x75316420]  ;;  %v559_v1 = vrot.slane %v8343_v58, 2  ;;  %v8352_v58 = vld [vmem:[#allocation72_spill] sm:$0xff] }
 0x110   : > { %4729 = vrot.lane.b32.xlu1 %v4728_v63, %s4973_s29  ;;  %4724 = vrot.lane.b32.xlu0 %v4723_v32, %s4973_s29  ;;  %v8335_v63 = vld [vmem:[#allocation46_spill] sm:$0xff] }
 0x111   : > { %v8336_v32 = vld [vmem:[#allocation74_spill] sm:$0xff] }
 0x112   : > { %v882_v34 = vrot.slane %v8336_v32, 1 }
 0x115   : > { %4734 = vrot.lane.b32.xlu2 %v4733_v47, %s4974_s30  ;;  %v4828_v47 = vpack.i.bf16 %v425_v5, %v424_v4  ;;  %v1095_v5 = vrot.slane %v5453_v29, 3 }
 0x118   : > { %4739 = vrot.lane.b32.xlu1 %v4738_v61, %s4973_s29  ;;  %1220 = vrot.lane.b32.xlu0 %v1190_v27, %s4974_s30  ;;  %v4753_v27 = vpack.i.bf16 %v552_v8, %v551_v28  ;;  %v8338_v61 = vld [vmem:[#allocation62_spill] sm:$0xff] }
 0x119   : > { %v8340_v28 = vld [vmem:[#allocation94_spill] sm:$0xff] }
 0x11a   : > { %v1094_v8 = vrot.slane %v8340_v28, 3  ;;  %v8350_v28 = vld [vmem:[#allocation63_spill] sm:$0xff] }
 0x11c   : > { %v4843_v10 = vpack.i.bf16 %v1094_v8, %v426_v2  ;;  %v4863_v8 = vpack.i.bf16 %v8350_v28, %v1095_v5  ;;  %v8358_v5 = vld [vmem:[#allocation28_spill] sm:$0xff] }
 0x11d   : > { %4744 = vrot.lane.b32.xlu2 %v4743_v15, %s4973_s29 }
 0x120   : > { %1222 = vrot.lane.b32.xlu1 %v1191_v38, %s4974_s30  ;;  %4749 = vrot.lane.b32.xlu0 %v4748_v59, %s4974_s30  ;;  %v1199_v59 = vld.sshfl [vmem:[#allocation1 + $0x8] sm:$0xff pattern:$0x75316420]  ;;  %v4813_v38 = vpack.i.bf16 %v5216_v11, %v1091_v60  ;;  %v423_v11 = vrot.slane %v5073_v25, 5  ;;  %v558_v25 = vrot.slane %v8335_v63, 2  ;;  %v5561_v48 = vpop.permute.xlu1 %4704 }
 0x121   : > { %1206 = vst [vmem:[#allocation1] ss:$2 sm:$0xff] %v5346_v20  ;;  %v4788_v20 = vpack.i.bf16 %v5214_v21, %v1089_v17  ;;  %v4808_v21 = vpack.i.bf16 %v557_v24, %v881_v35  ;;  %v4706_v36 = vunpack.i.l.bf16 %v5561_v48  ;;  %v4686_v17 = vunpack.i.l.bf16 %v5549_v14  ;;  %v1204_v24 = vld.sshfl [vmem:[#allocation1 + $0x30] sm:$0xff pattern:$0x75316420] }
 0x122   : > { %v4823_v42 = vpack.i.bf16 %v423_v11, %v5225_v9  ;;  %v4833_v9 = vpack.i.bf16 %v558_v25, %v882_v34  ;;  %v8345_v35 = vld [vmem:[#allocation27_spill] sm:$0xff] }
 0x123   : > { %v475_v63 = vsel %vm474_vm1, %v4686_v17, %v4687_v16 }
 0x125   : > { %1224 = vrot.lane.b32.xlu2 %v1192_v22, %s4974_s30  ;;  %v1093_v22 = vrot.slane %v8337_v62, 3  ;;  %v8348_v62 = vld [vmem:[#allocation53_spill] sm:$0xff] }
 0x127   : > { %v4838_v15 = vpack.i.bf16 %v8338_v61, %v1093_v22  ;;  %v561_v22 = vrot.slane %v8348_v62, 2  ;;  %v8349_v61 = vld [vmem:[#allocation85_spill] sm:$0xff] }
 0x128   : > { %4759 = vrot.lane.b32.xlu1 %v4758_v30, %s4974_s30  ;;  %4754 = vrot.lane.b32.xlu0 %v4753_v27, %s4974_s30  ;;  %v883_v30 = vrot.slane %v8341_v6, 1  ;;  %v8342_v27 = vld [vmem:[#allocation84_spill] sm:$0xff] }
 0x12d   : > { %4764 = vrot.lane.b32.xlu2 %v4763_v57, %s4973_s29  ;;  %v884_v57 = vrot.slane %v8342_v27, 1 }
 0x12f   : > { %v4848_v18 = vpack.i.bf16 %v884_v57, %v883_v30  ;;  %v1205_v57 = vld.sshfl [vmem:[#allocation1 + $0x38] sm:$0xff pattern:$0x75316420] }
 0x130   : > { %4769 = vrot.lane.b32.xlu1 %v4768_v19, %s4973_s29  ;;  %1226 = vrot.lane.b32.xlu0 %v1193_v39, %s4974_s30 }
 0x135   : > { %4774 = vrot.lane.b32.xlu2 %v4773_v50, %s4973_s29  ;;  %v560_v50 = vrot.slane %v8344_v44, 2 }
 0x137   : > { %v4853_v55 = vpack.i.bf16 %v560_v50, %v559_v1  ;;  %v1012_v1 = vrot.slane %v8352_v58, 6 }
 0x138   : > { %4784 = vrot.lane.b32.xlu1 %v4783_v40, %s4974_s30  ;;  %4779 = vrot.lane.b32.xlu0 %v4778_v7, %s4973_s29  ;;  %v4691_v40 = vunpack.i.l.bf16 %v5547_v23  ;;  %v4696_v7 = vunpack.i.l.bf16 %v5525_v33 }
 0x13d   : > { %1228 = vrot.lane.b32.xlu2 %v1198_v51, %s4974_s30  ;;  %v4700_v51 = vpop.permute.xlu0 %4699 }
 0x140   : > { %4794 = vrot.lane.b32.xlu1 %v4793_v49, %s4973_s29  ;;  %4789 = vrot.lane.b32.xlu0 %v4788_v20, %s4973_s29  ;;  %v4702_v49 = vunpack.i.h.bf16 %v4700_v51  ;;  %v4701_v20 = vunpack.i.l.bf16 %v4700_v51 }
 0x141   : > { %v5532_v41 = vpop.permute.xlu2 %4709 }
 0x142   : > { %v4712_v37 = vunpack.i.h.bf16 %v5532_v41  ;;  %v4711_v60 = vunpack.i.l.bf16 %v5532_v41  ;;  %v5588_v41 = vsel %vm606_vm0, %v4702_v49, %v4706_v36 }
 0x144   : > { %v1141_v4 = vsel %vm474_vm1, %v4711_v60, %v4712_v37 }
 0x145   : > { %4799 = vrot.lane.b32.xlu2 %v4798_v46, %s4974_s30  ;;  %v687_v46 = vrot.slane %v8345_v35, 7 }
 0x148   : > { %4814 = vrot.lane.b32.xlu1 %v4813_v38, %s4973_s29  ;;  %4809 = vrot.lane.b32.xlu0 %v4808_v21, %s4974_s30  ;;  %v8346_v21 = vld [vmem:[#allocation68_spill] sm:$0xff] }
 0x149   : > { %v1010_v54 = vrot.slane %v8346_v21, 6 }
 0x14d   : > { %4804 = vrot.lane.b32.xlu2 %v4803_v31, %s4974_s30  ;;  %v1011_v31 = vrot.slane %v8347_v0, 6  ;;  %v8356_v0 = vld [vmem:[#allocation71_spill] sm:$0xff] }
 0x150   : > { %1232 = vrot.lane.b32.xlu1 %v1200_v3, %s4974_s30  ;;  %1230 = vrot.lane.b32.xlu0 %v1199_v59, %s4974_s30  ;;  %v1203_v59 = vld.sshfl [vmem:[#allocation1 + $0x28] sm:$0xff pattern:$0x75316420]  ;;  %v4697_v3 = vunpack.i.h.bf16 %v5525_v33 }
 0x152   : > { %v799_v13 = vsel %vm474_vm1, %v4696_v7, %v4697_v3 }
 0x155   : > { %1234 = vrot.lane.b32.xlu2 %v1201_v52, %s4974_s30  ;;  %v4692_v52 = vunpack.i.h.bf16 %v5547_v23 }
 0x157   : > { %v607_v11 = vsel %vm606_vm0, %v4691_v40, %v4692_v52  ;;  %v8353_v40 = vld [vmem:[#allocation40_spill] sm:$0xff] }
 0x158   : > { %4824 = vrot.lane.b32.xlu1 %v4823_v42, %s4973_s29  ;;  %4819 = vrot.lane.b32.xlu0 %v4818_v53, %s4973_s29  ;;  %v4707_v42 = vunpack.i.h.bf16 %v5561_v48  ;;  %v930_v53 = vsel %vm606_vm0, %v4701_v20, %v4702_v49  ;;  %v1312_v26 = vsel %vm1311_vm2, %v607_v11, %v687_v46  ;;  %v427_v7 = vrot.slane %v8353_v40, 5  ;;  %v8354_v49 = vld [vmem:[#allocation44_spill] sm:$0xff]  ;;  %v8355_v20 = vld [vmem:[#allocation45_spill] sm:$0xff] }
 0x159   : > { %v1372_v34 = vsel %vm1371_vm3, %v930_v53, %v1010_v54  ;;  %v1332_v56 = vsel %vm1331_vm5, %v1312_v26, %v799_v13  ;;  %v5654_v46 = vld [vmem:[%s8231_s2 + $0x38] sm:$0xff]  ;;  %v1096_v54 = vrot.slane %v5455_v45, 3  ;;  %v5676_v45 = vld [vmem:[%s8231_s2 + $0x8] sm:$0xff] }
 0x15a   : > { %v1392_v2 = vsel %vm1391_vm6, %v1372_v34, %v1141_v4  ;;  %v1352_v44 = vsel %vm1351_vm7, %v1332_v56, %v930_v53  ;;  %v5629_v50 = vsel %vm606_vm0, %v4706_v36, %v4707_v42  ;;  %v428_v36 = vrot.slane %v8354_v49, 5  ;;  %v8360_v34 = vld [vmem:[#allocation95_spill] sm:$0xff]  ;;  %v1208_v49 = vld.sshfl [vmem:[#allocation1] sm:$0xff pattern:$0x75316420] }
 0x15b   : > { %v1374_v35 = vsel %vm1371_vm3, %v5629_v50, %v1012_v1 }
 0x15d   : > { %4829 = vrot.lane.b32.xlu2 %v4828_v47, %s4973_s29  ;;  %v1373_v47 = vsel %vm1371_vm3, %v5588_v41, %v1011_v31  ;;  %v4873_v31 = vpack.i.bf16 %v427_v7, %v8356_v0  ;;  %v8368_v0 = vld [vmem:[#allocation66_spill] sm:$0xff] }
 0x15f   : > { %v5545_v39 = vpop.permute.xlu2 %1216 }
 0x160   : > { %4834 = vrot.lane.b32.xlu0 %v4833_v9, %s4974_s30  ;;  %1236 = vrot.lane.b32.xlu1 %v1202_v12, %s4974_s30 }
 0x165   : > { %4839 = vrot.lane.b32.xlu2 %v4838_v15, %s4973_s29  ;;  %v885_v15 = vrot.slane %v8349_v61, 1 }
 0x167   : > { %v5559_v19 = vpop.permute.xlu2 %4719  ;;  %v4858_v51 = vpack.i.bf16 %v561_v22, %v885_v15  ;;  %v8362_v15 = vld [vmem:[#allocation64_spill] sm:$0xff] }
 0x168   : > { %4844 = vrot.lane.b32.xlu0 %v4843_v10, %s4973_s29  ;;  %4849 = vrot.lane.b32.xlu1 %v4848_v18, %s4974_s30  ;;  %v4721_v43 = vunpack.i.l.bf16 %v5559_v19  ;;  %v4722_v6 = vunpack.i.h.bf16 %v5559_v19  ;;  %v8351_v10 = vld [vmem:[#allocation2_spill] sm:$0xff]  ;;  %v886_v56 = vrot.slane %v8362_v15, 1 }
 0x169   : > { %v1272_v18 = vsel %vm1271_vm4, %v8351_v10, %v475_v63  ;;  %v688_v63 = vrot.slane %v8358_v5, 7  ;;  %v8363_v10 = vld [vmem:[#allocation50_spill] sm:$0xff]  ;;  %v8371_v5 = vld [vmem:[#allocation32_spill] sm:$0xff] }
 0x16a   : > { %v1142_v29 = vsel %vm474_vm1, %v4712_v37, %v4721_v43  ;;  %v1292_v17 = vsel %vm1291_vm8, %v1272_v18, %v607_v11 }
 0x16b   : > { %v1393_v27 = vsel %vm1391_vm6, %v1373_v47, %v1142_v29  ;;  %v1097_v47 = vrot.slane %v8360_v34, 3  ;;  %v8361_v29 = vld [vmem:[#allocation21_spill] sm:$0xff] }
 0x16c   : > { %v562_v61 = vrot.slane %v8361_v29, 2 }
 0x16d   : > { %1238 = vrot.lane.b32.xlu2 %v1203_v59, %s4974_s30  ;;  %v5634_v59 = vld [vmem:[%s8231_s2] sm:$0xff]  ;;  %v4888_v18 = vpack.i.bf16 %v8363_v10, %v1097_v47 }
 0x16f   : > { %v5578_v38 = vpop.permute.xlu2 %4734 }
 0x170   : > { %1240 = vrot.lane.b32.xlu0 %v1204_v24, %s4974_s30  ;;  %4854 = vrot.lane.b32.xlu1 %v4853_v55, %s4974_s30  ;;  %v429_v55 = vrot.slane %v8355_v20, 5  ;;  %v1143_v24 = vsel %vm474_vm1, %v4721_v43, %v4722_v6  ;;  %v4736_v23 = vunpack.i.l.bf16 %v5578_v38  ;;  %v4737_v40 = vunpack.i.h.bf16 %v5578_v38  ;;  %v8365_v20 = vld [vmem:[#allocation4_spill] sm:$0xff] }
 0x171   : > { %v1394_v53 = vsel %vm1391_vm6, %v1374_v35, %v1143_v24  ;;  %v8366_v24 = vld [vmem:[#allocation73_spill] sm:$0xff] }
 0x172   : > { %v1215_v25 = vpop.permute.xlu1 %1214  ;;  %v1213_v32 = vpop.permute.xlu0 %1212  ;;  %v4878_v13 = vpack.i.bf16 %v429_v55, %v428_v36  ;;  %v1013_v35 = vrot.slane %v8366_v24, 6 }
 0x173   : > { %v1252_v9 = vsel %vm606_vm0, %v1213_v32, %v1215_v25  ;;  %v1253_v12 = vsel %vm606_vm0, %v1215_v25, %v5545_v39  ;;  %v8359_v25 = vld [vmem:[#allocation31_spill] sm:$0xff] }
 0x174   : > { %4388 = vmatpush.msk.msra.mxu0 %vm1271_vm4, %v1252_v9  ;;  %4638 = vmatpush.msk.msra.mxu2 %vm1271_vm4, %v1252_v9  ;;  %v689_v32 = vrot.slane %v8359_v25, 7 }
 0x175   : > { %4397 = vmatpush.msk.msra.mxu1 %vm1271_vm4, %v1253_v12  ;;  %4642 = vmatpush.msk.msra.mxu3 %vm1271_vm4, %v1253_v12 }
 0x176   : > { %1725 = vmatpush.msra.mxu0 %v1392_v2  ;;  %4639 = vmatpush.msra.mxu2 %v1392_v2 }
 0x177   : > { %v5619_v30 = vpop.permute.xlu2 %4744  ;;  %1766 = vmatpush.msra.mxu1 %v1393_v27  ;;  %4643 = vmatpush.msra.mxu3 %v1393_v27 }
 0x178   : > { %1726 = vmatpush.msra.mxu0 %v1352_v44  ;;  %4640 = vmatpush.msra.mxu2 %v1352_v44  ;;  %v4746_v25 = vunpack.i.l.bf16 %v5619_v30 }
 0x179   : > { %4864 = vrot.lane.b32.xlu0 %v4863_v8, %s4973_s29  ;;  %1242 = vrot.lane.b32.xlu1 %v1205_v57, %s4974_s30 }
 0x17a   : > { %v5642_v37 = vpop.permute.xlu1 %4714  ;;  %1727 = vmatpush.msra.mxu0 %v1292_v17  ;;  %4641 = vmatpush.msra.mxu2 %v1292_v17  ;;  %v5644_v60 = vpop.permute.xlu0 %1218 }
 0x17b   : > { %4389 = vmatmul.msk.f32.vlgmr.msra.gmra.mxu0 %vm1649_vm9, %v5634_v59  ;;  %v1254_v21 = vsel %vm606_vm0, %v5545_v39, %v5644_v60  ;;  %4859 = vrot.lane.b32.xlu2 %v4858_v51, %s4974_s30  ;;  %v4717_v11 = vunpack.i.h.bf16 %v5642_v37  ;;  %v4716_v43 = vunpack.i.l.bf16 %v5642_v37  ;;  %v8357_v39 = vld [vmem:[#allocation70_spill] sm:$0xff] }
 0x17c   : > { %4406 = vmatpush.msk.msrb.mxu2 %vm1271_vm4, %v1254_v21  ;;  %v4868_v26 = vpack.i.bf16 %v1096_v54, %v8357_v39  ;;  %v8367_v21 = vld [vmem:[#allocation65_spill] sm:$0xff] }
 0x17d   : > { %4396 = vmatmul.msk.f32.vlgmr.msra.gmra.mxu2 %vm1649_vm9, %v5654_v46  ;;  %v608_v62 = vsel %vm606_vm0, %v4692_v52, %v4716_v43  ;;  %v609_v22 = vsel %vm606_vm0, %v4716_v43, %v4717_v11  ;;  %v887_v54 = vrot.slane %v8367_v21, 1  ;;  %v8369_v43 = vld [vmem:[#allocation24_spill] sm:$0xff]  ;;  %v610_v48 = vsel %vm606_vm0, %v4717_v11, %v4737_v40 }
 0x17e   : > { %1807 = vmatpush.msrb.mxu2 %v1394_v53  ;;  %v1313_v52 = vsel %vm1311_vm2, %v608_v62, %v688_v63  ;;  %v1314_v57 = vsel %vm1311_vm2, %v609_v22, %v689_v32  ;;  %v565_v53 = vrot.slane %v8369_v43, 2  ;;  %v690_v63 = vrot.slane %v8371_v5, 7 }
 0x17f   : > { %v5670_v4 = vpop.permute.xlu2 %1224 }
 0x180   : > { %v1315_v15 = vsel %vm1311_vm2, %v610_v48, %v690_v63  ;;  %v8379_v63 = vld [vmem:[#allocation97_spill] sm:$0xff] }
 0x181   : > { %4874 = vrot.lane.b32.xlu0 %v4873_v31, %s4973_s29  ;;  %4879 = vrot.lane.b32.xlu1 %v4878_v13, %s4973_s29  ;;  %v888_v31 = vrot.slane %v8368_v0, 1  ;;  %v8370_v13 = vld [vmem:[#allocation67_spill] sm:$0xff] }
 0x182   : > { %v5689_v9 = vpop.permute.xlu1 %4729  ;;  %v4725_v12 = vpop.permute.xlu0 %4724  ;;  %v889_v39 = vrot.slane %v8370_v13, 1 }
 0x183   : > { %v4732_v2 = vunpack.i.h.bf16 %v5689_v9  ;;  %v4731_v28 = vunpack.i.l.bf16 %v5689_v9  ;;  %v4727_v8 = vunpack.i.h.bf16 %v4725_v12  ;;  %v4726_v27 = vunpack.i.l.bf16 %v4725_v12  ;;  %4390 = vmatmul.msk.f32.gmra.mxu0 %vm1649_vm9, %v5676_v45  ;;  %4869 = vrot.lane.b32.xlu2 %v4868_v26, %s4973_s29  ;;  %v5794_v9 = vld [vmem:[%s8231_s2 + $0x18] sm:$0xff] }
 0x184   : > { %v933_v26 = vsel %vm606_vm0, %v4707_v42, %v4736_v23  ;;  %v4908_v11 = vpack.i.bf16 %v565_v53, %v889_v39 }
 0x185   : > { %v800_v58 = vsel %vm474_vm1, %v4697_v3, %v4726_v27  ;;  %v801_v1 = vsel %vm474_vm1, %v4726_v27, %v4727_v8  ;;  %v476_v44 = vsel %vm474_vm1, %v4687_v16, %v4731_v28  ;;  %v477_v51 = vsel %vm474_vm1, %v4731_v28, %v4732_v2  ;;  %v8364_v3 = vld [vmem:[#allocation3_spill] sm:$0xff] }
 0x186   : > { %v1333_v17 = vsel %vm1331_vm5, %v1313_v52, %v800_v58  ;;  %v1334_v33 = vsel %vm1331_vm5, %v1314_v57, %v801_v1  ;;  %v1273_v36 = vsel %vm1271_vm4, %v8364_v3, %v476_v44  ;;  %v1274_v55 = vsel %vm1271_vm4, %v8365_v20, %v477_v51  ;;  %v8373_v57 = vld [vmem:[#allocation96_spill] sm:$0xff]  ;;  %v8374_v58 = vld [vmem:[#allocation22_spill] sm:$0xff]  ;;  %v8375_v44 = vld [vmem:[#allocation23_spill] sm:$0xff] }
 0x187   : > { %v5713_v7 = vpop.permute.xlu2 %4764  ;;  %v1353_v14 = vsel %vm1351_vm7, %v1333_v17, %v5588_v41  ;;  %v1354_v16 = vsel %vm1351_vm7, %v1334_v33, %v5629_v50  ;;  %v1293_v41 = vsel %vm1291_vm8, %v1273_v36, %v608_v62  ;;  %v5735_v50 = vld [vmem:[%s8231_s2 + $0x10] sm:$0xff]  ;;  %v1294_v47 = vsel %vm1291_vm8, %v1274_v55, %v609_v22  ;;  %v8378_v20 = vld [vmem:[#allocation81_spill] sm:$0xff] }
 0x188   : > { %1767 = vmatpush.msra.mxu1 %v1353_v14  ;;  %4644 = vmatpush.msra.mxu3 %v1353_v14  ;;  %v4883_v62 = vpack.i.bf16 %v562_v61, %v886_v56  ;;  %v1375_v37 = vsel %vm1371_vm3, %v933_v26, %v1013_v35  ;;  %v4898_v22 = vpack.i.bf16 %v888_v31, %v887_v54  ;;  %v1098_v10 = vrot.slane %v8373_v57, 3  ;;  %v8377_v14 = vld [vmem:[#allocation80_spill] sm:$0xff] }
 0x189   : > { %1808 = vmatpush.msrb.mxu2 %v1354_v16  ;;  %1244 = vrot.lane.b32.xlu0 %v1208_v49, %s4974_s30  ;;  %v478_v19 = vsel %vm474_vm1, %v4732_v2, %v4746_v25  ;;  %v563_v1 = vrot.slane %v8374_v58, 2  ;;  %v564_v51 = vrot.slane %v8375_v44, 2  ;;  %v4766_v17 = vunpack.i.l.bf16 %v5713_v7  ;;  %v8376_v2 = vld [vmem:[#allocation5_spill] sm:$0xff] }
 0x18a   : > { %4889 = vrot.lane.b32.xlu1 %v4888_v18, %s4973_s29  ;;  %v5745_v32 = vpop.permute.xlu1 %4739  ;;  %v1221_v34 = vpop.permute.xlu0 %1220  ;;  %1768 = vmatpush.msra.mxu1 %v1293_v41  ;;  %v4975_v18 = vmov 0   ;;  %v1275_v33 = vsel %vm1271_vm4, %v8376_v2, %v478_v19  ;;  %v4747_v49 = vunpack.i.h.bf16 %v5619_v30  ;;  %v1014_v16 = vrot.slane %v8377_v14, 6 }
 0x18b   : > { %v4742_v42 = vunpack.i.h.bf16 %v5745_v32  ;;  %v4741_v12 = vunpack.i.l.bf16 %v5745_v32  ;;  %4645 = vmatpush.msra.mxu3 %v1293_v41  ;;  %1809 = vmatpush.msrb.mxu2 %v1294_v47  ;;  %v1255_v29 = vsel %vm606_vm0, %v5644_v60, %v1221_v34  ;;  %v1015_v55 = vrot.slane %v8378_v20, 6  ;;  %v8387_v20 = vld [vmem:[#allocation17_spill] sm:$0xff] }
 0x18c   : > { %4391 = vmatmul.msk.f32.gmra.mxu0 %vm1649_vm9, %v5735_v50  ;;  %4398 = vmatmul.msk.f32.vlgmr.msra.gmra.mxu1 %vm1649_vm9, %v5634_v59  ;;  %v1295_v0 = vsel %vm1291_vm8, %v1275_v33, %v610_v48  ;;  %v4903_v43 = vpack.i.bf16 %v564_v51, %v563_v1  ;;  %v1146_v39 = vsel %vm474_vm1, %v4747_v49, %v4766_v17  ;;  %v8384_v1 = vld [vmem:[#allocation89_spill] sm:$0xff]  ;;  %v1211_v33 = vld.sshfl [vmem:[#allocation1 + $0x18] sm:$0xff pattern:$0x75316420] }
 0x18d   : > { %4407 = vmatmul.msk.f32.vlgmr.msrb.gmra.mxu2 %vm1649_vm9, %v5634_v59  ;;  %4405 = vmatmul.msk.f32.vlgmr.msra.gmra.mxu3 %vm1649_vm9, %v5654_v46  ;;  %v1144_v60 = vsel %vm474_vm1, %v4722_v6, %v4741_v12  ;;  %v802_v61 = vsel %vm474_vm1, %v4727_v8, %v4742_v42  ;;  %v8372_v8 = vld [vmem:[#allocation15_spill] sm:$0xff]  ;;  %v1145_v41 = vsel %vm474_vm1, %v4741_v12, %v4747_v49  ;;  %v5843_v12 = vld [vmem:[%s8231_s2 + $0x20] sm:$0xff]  ;;  %v1016_v44 = vrot.slane %v8384_v1, 6 }
 0x18e   : > { %4415 = vmatpush.msk.msrb.mxu3 %vm1271_vm4, %v1255_v29  ;;  %v1395_v28 = vsel %vm1391_vm6, %v1375_v37, %v1144_v60  ;;  %v1335_v27 = vsel %vm1331_vm5, %v1315_v15, %v802_v61  ;;  %4884 = vrot.lane.b32.xlu2 %v4883_v62, %s4974_s30  ;;  %v430_v52 = vrot.slane %v8372_v8, 5  ;;  %v1209_v62 = vld.sshfl [vmem:[#allocation1 + $0x8] sm:$0xff pattern:$0x75316420]  ;;  %v8381_v15 = vld [vmem:[#allocation48_spill] sm:$0xff]  ;;  %v8385_v51 = vld [vmem:[#allocation49_spill] sm:$0xff] }
 0x18f   : > { %v5773_v56 = vpop.permute.xlu2 %4774  ;;  %v1355_v6 = vsel %vm1351_vm7, %v1335_v27, %v933_v26  ;;  %4933 = vset.pattern.permute.xlu1 %v4975_v18  ;;  %4935 = vset.pattern.permute.xlu0 %v4975_v18  ;;  %v8380_v29 = vld [vmem:[#allocation98_spill] sm:$0xff]  ;;  %v8382_v27 = vld [vmem:[#allocation51_spill] sm:$0xff]  ;;  %v692_v2 = vrot.slane %v8385_v51, 7 }
 0x190   : > { %1848 = vmatpush.msrb.mxu3 %v1395_v28  ;;  %4934 = vset.pattern.permute.xlu2 %v4975_v18  ;;  %v4893_v54 = vpack.i.bf16 %v1098_v10, %v430_v52  ;;  %v1100_v37 = vrot.slane %v8380_v29, 3  ;;  %v691_v28 = vrot.slane %v8381_v15, 7  ;;  %v8383_v18 = vld [vmem:[#allocation54_spill] sm:$0xff]  ;;  %v1210_v29 = vld.sshfl [vmem:[#allocation1 + $0x10] sm:$0xff pattern:$0x75316420] }
 0x191   : > { %4899 = vrot.lane.b32.xlu0 %v4898_v22, %s4974_s30  ;;  %v4767_v22 = vunpack.i.h.bf16 %v5713_v7  ;;  %v8391_v51 = vld [vmem:[#allocation55_spill] sm:$0xff] }
 0x192   : > { %1849 = vmatpush.msrb.mxu3 %v1355_v6  ;;  %4909 = vrot.lane.b32.xlu1 %v4908_v11, %s4974_s30  ;;  %v1223_v3 = vpop.permute.xlu1 %1222  ;;  %v5800_v36 = vpop.permute.xlu0 %4749  ;;  %v4777_v11 = vunpack.i.h.bf16 %v5773_v56  ;;  %v4918_v58 = vpack.i.bf16 %v1100_v37, %v8383_v18 }
 0x193   : > { %v4752_v24 = vunpack.i.h.bf16 %v5800_v36  ;;  %v4751_v35 = vunpack.i.l.bf16 %v5800_v36  ;;  %v1256_v21 = vsel %vm606_vm0, %v1221_v34, %v1223_v3  ;;  %v1257_v31 = vsel %vm606_vm0, %v1223_v3, %v5670_v4 }
 0x194   : > { %4392 = vmatmul.msk.f32.gmra.mxu0 %vm1649_vm9, %v5794_v9  ;;  %4399 = vmatmul.msk.f32.gmra.mxu1 %vm1649_vm9, %v5676_v45  ;;  %v1099_v34 = vrot.slane %v8379_v63, 3  ;;  %v803_v49 = vsel %vm474_vm1, %v4742_v42, %v4767_v22  ;;  %v479_v38 = vsel %vm474_vm1, %v4746_v25, %v4777_v11 }
 0x195   : > { %4408 = vmatmul.msk.f32.gmra.mxu2 %vm1649_vm9, %v5676_v45  ;;  %1850 = vmatpush.msrb.mxu3 %v1295_v0  ;;  %v934_v53 = vsel %vm606_vm0, %v4736_v23, %v4751_v35  ;;  %v5820_v13 = vsel %vm606_vm0, %v4751_v35, %v4752_v24  ;;  %v8388_v35 = vld [vmem:[#allocation18_spill] sm:$0xff] }
 0x196   : > { %4416 = vmatmul.msk.f32.vlgmr.msrb.gmra.mxu3 %vm1649_vm9, %v5634_v59  ;;  %4424 = vmatpush.msk.msrb.mxu0 %vm1271_vm4, %v1256_v21  ;;  %v1376_v26 = vsel %vm1371_vm3, %v934_v53, %v1014_v16  ;;  %v1377_v5 = vsel %vm1371_vm3, %v5820_v13, %v1015_v55  ;;  %v4913_v19 = vpack.i.bf16 %v8382_v27, %v1099_v34  ;;  %v432_v55 = vrot.slane %v8387_v20, 5  ;;  %v5902_v0 = vld [vmem:[%s8231_s2 + $0x28] sm:$0xff] }
 0x197   : > { %v5832_v23 = vpop.permute.xlu2 %1228  ;;  %4433 = vmatpush.msk.msrb.mxu1 %vm1271_vm4, %v1257_v31  ;;  %v1396_v47 = vsel %vm1391_vm6, %v1376_v26, %v1145_v41  ;;  %v1397_v48 = vsel %vm1391_vm6, %v1377_v5, %v1146_v39  ;;  %4894 = vrot.lane.b32.xlu2 %v4893_v54, %s4973_s29  ;;  %v433_v21 = vrot.slane %v8388_v35, 5  ;;  %v4776_v54 = vunpack.i.l.bf16 %v5773_v56 }
 0x198   : > { %1889 = vmatpush.msrb.mxu0 %v1396_v47 }
 0x199   : > { %1930 = vmatpush.msrb.mxu1 %v1397_v48  ;;  %4904 = vrot.lane.b32.xlu0 %v4903_v43, %s4974_s30 }
 0x19a   : > { %1246 = vrot.lane.b32.xlu1 %v1209_v62, %s4974_s30  ;;  %v5849_v60 = vpop.permute.xlu1 %4759  ;;  %v4755_v61 = vpop.permute.xlu0 %4754  ;;  %v4928_v62 = vpack.i.bf16 %v433_v21, %v432_v55 }
 0x19b   : > { %v4762_v6 = vunpack.i.h.bf16 %v5849_v60  ;;  %v4761_v8 = vunpack.i.l.bf16 %v5849_v60  ;;  %v4757_v52 = vunpack.i.h.bf16 %v4755_v61  ;;  %v4756_v57 = vunpack.i.l.bf16 %v4755_v61  ;;  %v1607_v60 = vld [vmem:[%s8232_s3 + $0x30] sm:$0xff] }
 0x19c   : > { %4393 = vmatmul.msk.f32.gmra.mxu0 %vm1649_vm9, %v5843_v12  ;;  %4400 = vmatmul.msk.f32.gmra.mxu1 %vm1649_vm9, %v5735_v50 }
 0x19d   : > { %4409 = vmatmul.msk.f32.gmra.mxu2 %vm1649_vm9, %v5735_v50  ;;  %v611_v10 = vsel %vm606_vm0, %v4737_v40, %v4756_v57  ;;  %v8386_v40 = vld [vmem:[#allocation58_spill] sm:$0xff]  ;;  %v5884_v16 = vsel %vm606_vm0, %v4757_v52, %v4762_v6  ;;  %v936_v42 = vsel %vm606_vm0, %v4752_v24, %v4761_v8  ;;  %v5892_v30 = vsel %vm606_vm0, %v4756_v57, %v4757_v52  ;;  %v8389_v24 = vld [vmem:[#allocation19_spill] sm:$0xff]  ;;  %v8390_v52 = vld [vmem:[#allocation16_spill] sm:$0xff] }
 0x19e   : > { %4417 = vmatmul.msk.f32.gmra.mxu3 %vm1649_vm9, %v5676_v45  ;;  %v1316_v3 = vsel %vm1311_vm2, %v611_v10, %v691_v28  ;;  %v693_v36 = vrot.slane %v8386_v40, 7  ;;  %v1276_v31 = vsel %vm1271_vm4, %v8389_v24, %v479_v38  ;;  %v1378_v41 = vsel %vm1371_vm3, %v936_v42, %v1016_v44  ;;  %v8392_v38 = vld [vmem:[#allocation20_spill] sm:$0xff]  ;;  %v1605_v24 = vld [vmem:[%s8232_s3 + $0x20] sm:$0xff] }
 0x19f   : > { %v5879_v14 = vpop.permute.xlu2 %4799  ;;  %v1336_v32 = vsel %vm1331_vm5, %v1316_v3, %v803_v49  ;;  %4914 = vrot.lane.b32.xlu2 %v4913_v19, %s4973_s29  ;;  %v1296_v39 = vsel %vm1291_vm8, %v1276_v31, %v611_v10  ;;  %v1317_v26 = vsel %vm1311_vm2, %v5892_v30, %v692_v2  ;;  %v1608_v19 = vld [vmem:[%s8232_s3 + $0x38] sm:$0xff]  ;;  %v431_v57 = vrot.slane %v8390_v52, 5  ;;  %v5957_v10 = vld [vmem:[%s8231_s2 + $0x30] sm:$0xff]  ;;  %v8395_v31 = vld [vmem:[#allocation90_spill] sm:$0xff] }
 0x1a0   : > { %v1356_v25 = vsel %vm1351_vm7, %v1336_v32, %v934_v53  ;;  %v1318_v5 = vsel %vm1311_vm2, %v5884_v16, %v693_v36  ;;  %v8393_v36 = vld [vmem:[#allocation29_spill] sm:$0xff]  ;;  %v1604_v52 = vld [vmem:[%s8232_s3 + $0x18] sm:$0xff] }
 0x1a1   : > { %1250 = vrot.lane.b32.xlu0 %v1211_v33, %s4974_s30  ;;  %1890 = vmatpush.msrb.mxu0 %v1356_v25  ;;  %v4923_v2 = vpack.i.bf16 %v431_v57, %v8391_v51  ;;  %v8394_v25 = vld [vmem:[#allocation59_spill] sm:$0xff]  ;;  %v8397_v57 = vld [vmem:[#allocation33_spill] sm:$0xff] }
 0x1a2   : > { %4919 = vrot.lane.b32.xlu1 %v4918_v58, %s4973_s29  ;;  %v5907_v43 = vpop.permute.xlu1 %4769  ;;  %v1227_v53 = vpop.permute.xlu0 %1226  ;;  %v694_v20 = vrot.slane %v8394_v25, 7 }
 0x1a3   : > { %v4772_v63 = vunpack.i.h.bf16 %v5907_v43  ;;  %v4771_v34 = vunpack.i.l.bf16 %v5907_v43  ;;  %v1258_v47 = vsel %vm606_vm0, %v5670_v4, %v1227_v53  ;;  %v1259_v48 = vsel %vm606_vm0, %v1227_v53, %v5832_v23  ;;  %1891 = vmatpush.msrb.mxu0 %v1296_v39 }
 0x1a4   : > { %4394 = vmatmul.msk.f32.gmra.mxu0 %vm1649_vm9, %v5902_v0  ;;  %4401 = vmatmul.msk.f32.gmra.mxu1 %vm1649_vm9, %v5794_v9  ;;  %v1017_v53 = vrot.slane %v8395_v31, 6 }
 0x1a5   : > { %4410 = vmatmul.msk.f32.gmra.mxu2 %vm1649_vm9, %v5794_v9  ;;  %4451 = vmatpush.msk.msra.mxu3 %vm1271_vm4, %v1259_v48  ;;  %v1147_v4 = vsel %vm474_vm1, %v4766_v17, %v4772_v63  ;;  %v804_v37 = vsel %vm474_vm1, %v4767_v22, %v4771_v34  ;;  %v805_v61 = vsel %vm474_vm1, %v4771_v34, %v4776_v54 }
 0x1a6   : > { %4418 = vmatmul.msk.f32.gmra.mxu3 %vm1649_vm9, %v5735_v50  ;;  %4442 = vmatpush.msk.msra.mxu2 %vm1271_vm4, %v1258_v47  ;;  %v1398_v15 = vsel %vm1391_vm6, %v1378_v41, %v1147_v4  ;;  %v1337_v28 = vsel %vm1331_vm5, %v1317_v26, %v804_v37  ;;  %v1338_v27 = vsel %vm1331_vm5, %v1318_v5, %v805_v61 }
 0x1a7   : > { %v5943_v7 = vpop.permute.xlu2 %4804  ;;  %v1357_v17 = vsel %vm1351_vm7, %v1337_v28, %v5820_v13  ;;  %v1358_v22 = vsel %vm1351_vm7, %v1338_v27, %v936_v42  ;;  %1248 = vrot.lane.b32.xlu2 %v1210_v29, %s4974_s30  ;;  %v1606_v42 = vld [vmem:[%s8232_s3 + $0x28] sm:$0xff]  ;;  %v1601_v29 = vld [vmem:[%s8232_s3] sm:$0xff] }
 0x1a8   : > { %1971 = vmatpush.msra.mxu2 %v1398_v15  ;;  %1931 = vmatpush.msrb.mxu1 %v1357_v17  ;;  %v4806_v61 = vunpack.i.l.bf16 %v5943_v7  ;;  %v4801_v15 = vunpack.i.l.bf16 %v5879_v14 }
 0x1a9   : > { %4929 = vrot.lane.b32.xlu0 %v4928_v62, %s4973_s29 }
 0x1aa   : > { %1972 = vmatpush.msra.mxu2 %v1358_v22  ;;  %1646 = vperm.xlu1 %4933, %v1608_v19   ;;  %v5959_v13 = vpop.permute.xlu1 %4784  ;;  %v4780_v18 = vpop.permute.xlu0 %4779  ;;  %v4802_v22 = vunpack.i.h.bf16 %v5879_v14 }
 0x1ab   : > { %v4787_v58 = vunpack.i.h.bf16 %v5959_v13  ;;  %v4782_v1 = vunpack.i.h.bf16 %v4780_v18  ;;  %v4781_v44 = vunpack.i.l.bf16 %v4780_v18  ;;  %v4786_v33 = vunpack.i.l.bf16 %v5959_v13 }
 0x1ac   : > { %4395 = vmatmul.msk.f32.gmra.mxu0 %vm1649_vm9, %v5957_v10  ;;  %4402 = vmatmul.msk.f32.gmra.mxu1 %vm1649_vm9, %v5843_v12  ;;  %v695_v18 = vrot.slane %v8397_v57, 7 }
 0x1ad   : > { %4411 = vmatmul.msk.f32.gmra.mxu2 %vm1649_vm9, %v5843_v12  ;;  %v480_v49 = vsel %vm474_vm1, %v4777_v11, %v4781_v44  ;;  %v481_v3 = vsel %vm474_vm1, %v4781_v44, %v4782_v1  ;;  %v614_v11 = vsel %vm606_vm0, %v4762_v6, %v4787_v58  ;;  %v937_v6 = vsel %vm606_vm0, %v4761_v8, %v4786_v33  ;;  %v8398_v44 = vld [vmem:[#allocation76_spill] sm:$0xff] }
 0x1ae   : > { %4419 = vmatmul.msk.f32.gmra.mxu3 %vm1649_vm9, %v5794_v9  ;;  %v1277_v40 = vsel %vm1271_vm4, %v8392_v38, %v480_v49  ;;  %v1278_v32 = vsel %vm1271_vm4, %v8393_v36, %v481_v3  ;;  %v1319_v39 = vsel %vm1311_vm2, %v614_v11, %v694_v20  ;;  %v1379_v34 = vsel %vm1371_vm3, %v937_v6, %v1017_v53  ;;  %v8399_v3 = vld [vmem:[#allocation77_spill] sm:$0xff] }
 0x1af   : > { %v5984_v55 = vpop.permute.xlu2 %1234  ;;  %v1297_v35 = vsel %vm1291_vm8, %v1277_v40, %v5892_v30  ;;  %v1298_v21 = vsel %vm1291_vm8, %v1278_v32, %v5884_v16  ;;  %4924 = vrot.lane.b32.xlu2 %v4923_v2, %s4973_s29  ;;  %v1018_v51 = vrot.slane %v8398_v44, 6  ;;  %v938_v49 = vsel %vm606_vm0, %v4786_v33, %v4801_v15 }
 0x1b0   : > { %1932 = vmatpush.msrb.mxu1 %v1297_v35  ;;  %1973 = vmatpush.msra.mxu2 %v1298_v21  ;;  %v1019_v38 = vrot.slane %v8399_v3, 6  ;;  %v4807_v33 = vunpack.i.h.bf16 %v5943_v7 }
 0x1b1   : > { %1636 = vperm.xlu0 %4935, %v1606_v42   ;;  %v1380_v42 = vsel %vm1371_vm3, %v938_v49, %v1018_v51  ;;  %v8403_v51 = vld [vmem:[#allocation8_spill] sm:$0xff] }
 0x1b2   : > { %1631 = vperm.xlu1 %4933, %v1605_v24   ;;  %v6005_v30 = vpop.permute.xlu1 %4794  ;;  %v4790_v16 = vpop.permute.xlu0 %4789 }
 0x1b3   : > { %v4796_v41 = vunpack.i.l.bf16 %v6005_v30  ;;  %v4792_v26 = vunpack.i.h.bf16 %v4790_v16  ;;  %v4791_v5 = vunpack.i.l.bf16 %v4790_v16  ;;  %v4797_v14 = vunpack.i.h.bf16 %v6005_v30  ;;  %v1602_v16 = vld [vmem:[%s8232_s3 + $0x8] sm:$0xff] }
 0x1b4   : > { %4403 = vmatmul.msk.f32.gmra.mxu1 %vm1649_vm9, %v5902_v0  ;;  %4425 = vmatmul.msk.f32.vlgmr.msrb.gmra.mxu0 %vm1649_vm9, %v5634_v59 }
 0x1b5   : > { %4412 = vmatmul.msk.f32.gmra.mxu2 %vm1649_vm9, %v5902_v0  ;;  %v1148_v8 = vsel %vm474_vm1, %v4772_v63, %v4791_v5  ;;  %v806_v47 = vsel %vm474_vm1, %v4776_v54, %v4792_v26  ;;  %v482_v48 = vsel %vm474_vm1, %v4782_v1, %v4796_v41  ;;  %v1603_v54 = vld [vmem:[%s8232_s3 + $0x10] sm:$0xff]  ;;  %v8396_v63 = vld [vmem:[#allocation30_spill] sm:$0xff]  ;;  %v6063_v1 = vsel %vm606_vm0, %v4787_v58, %v4806_v61 }
 0x1b6   : > { %4420 = vmatmul.msk.f32.gmra.mxu3 %vm1649_vm9, %v5843_v12  ;;  %v1399_v62 = vsel %vm1391_vm6, %v1379_v34, %v1148_v8  ;;  %v1339_v43 = vsel %vm1331_vm5, %v1319_v39, %v806_v47  ;;  %v1279_v4 = vsel %vm1271_vm4, %v8396_v63, %v482_v48  ;;  %v6077_v58 = vsel %vm606_vm0, %v4801_v15, %v4802_v22  ;;  %v8401_v47 = vld [vmem:[#allocation37_spill] sm:$0xff] }
 0x1b7   : > { %2012 = vmatpush.msra.mxu3 %v1399_v62  ;;  %v1359_v56 = vsel %vm1351_vm7, %v1339_v43, %v937_v6  ;;  %1641 = vperm.xlu2 %4934, %v1607_v60   ;;  %v6041_v37 = vpop.permute.xlu2 %4829  ;;  %v1299_v17 = vsel %vm1291_vm8, %v1279_v4, %v614_v11  ;;  %v1320_v36 = vsel %vm1311_vm2, %v6063_v1, %v695_v18  ;;  %v8400_v60 = vld [vmem:[#allocation78_spill] sm:$0xff]  ;;  %v697_v48 = vrot.slane %v8401_v47, 7 }
 0x1b8   : > { %v1149_v32 = vsel %vm474_vm1, %v4791_v5, %v4797_v14  ;;  %v1381_v21 = vsel %vm1371_vm3, %v6077_v58, %v1019_v38  ;;  %v1020_v8 = vrot.slane %v8400_v60, 6  ;;  %v8402_v62 = vld [vmem:[#allocation34_spill] sm:$0xff]  ;;  %v616_v43 = vsel %vm606_vm0, %v4806_v61, %v4807_v33 }
 0x1b9   : > { %1611 = vperm.xlu0 %4935, %v1601_v29   ;;  %2013 = vmatpush.msra.mxu3 %v1359_v56  ;;  %v1400_v7 = vsel %vm1391_vm6, %v1380_v42, %v1149_v32  ;;  %v696_v29 = vrot.slane %v8402_v62, 7  ;;  %v8404_v42 = vld [vmem:[#allocation6_spill] sm:$0xff] }
 0x1ba   : > { %1621 = vperm.xlu1 %4933, %v1603_v54   ;;  %v6045_v28 = vpop.permute.xlu1 %4814  ;;  %v6047_v27 = vpop.permute.xlu0 %4809 }
 0x1bb   : > { %2014 = vmatpush.msra.mxu3 %v1299_v17  ;;  %v4817_v19 = vunpack.i.h.bf16 %v6045_v28  ;;  %v4816_v2 = vunpack.i.l.bf16 %v6045_v28  ;;  %v4812_v25 = vunpack.i.h.bf16 %v6047_v27  ;;  %v4811_v24 = vunpack.i.l.bf16 %v6047_v27 }
 0x1bc   : > { %4404 = vmatmul.msk.f32.gmra.mxu1 %vm1649_vm9, %v5957_v10  ;;  %4426 = vmatmul.msk.f32.gmra.mxu0 %vm1649_vm9, %v5676_v45 }
 0x1bd   : > { %4413 = vmatmul.msk.f32.gmra.mxu2 %vm1649_vm9, %v5957_v10  ;;  %v807_v40 = vsel %vm474_vm1, %v4792_v26, %v4817_v19  ;;  %v1150_v35 = vsel %vm474_vm1, %v4797_v14, %v4816_v2  ;;  %v4831_v26 = vunpack.i.l.bf16 %v6041_v37  ;;  %v617_v56 = vsel %vm606_vm0, %v4807_v33, %v4812_v25 }
 0x1be   : > { %4421 = vmatmul.msk.f32.gmra.mxu3 %vm1649_vm9, %v5902_v0  ;;  %v1340_v6 = vsel %vm1331_vm5, %v1320_v36, %v807_v40  ;;  %v1401_v5 = vsel %vm1391_vm6, %v1381_v21, %v1150_v35  ;;  %v940_v54 = vsel %vm606_vm0, %v4802_v22, %v4811_v24  ;;  %v1322_v17 = vsel %vm1311_vm2, %v617_v56, %v697_v48 }
 0x1bf   : > { %1626 = vperm.xlu2 %4934, %v1604_v52   ;;  %v6086_v13 = vpop.permute.xlu2 %4839  ;;  %v1360_v34 = vsel %vm1351_vm7, %v1340_v6, %v938_v49  ;;  %v1382_v15 = vsel %vm1371_vm3, %v940_v54, %v1020_v8  ;;  %v1321_v52 = vsel %vm1311_vm2, %v616_v43, %v696_v29 }
 0x1c2   : > { %v1233_v20 = vpop.permute.xlu1 %1232  ;;  %v1231_v11 = vpop.permute.xlu0 %1230 }
 0x1c3   : > { %v1260_v31 = vsel %vm606_vm0, %v5832_v23, %v1231_v11  ;;  %v1261_v53 = vsel %vm606_vm0, %v1231_v11, %v1233_v20  ;;  %v1262_v39 = vsel %vm606_vm0, %v1233_v20, %v5984_v55  ;;  %v4832_v23 = vunpack.i.h.bf16 %v6041_v37 }
 0x1c4   : > { %4427 = vmatmul.msk.f32.gmra.mxu0 %vm1649_vm9, %v5735_v50  ;;  %4434 = vmatmul.msk.f32.vlgmr.msrb.gmra.mxu1 %vm1649_vm9, %v5634_v59  ;;  %v4842_v20 = vunpack.i.h.bf16 %v6086_v13  ;;  %v4841_v11 = vunpack.i.l.bf16 %v6086_v13 }
 0x1c5   : > { %4414 = vmatmul.msk.f32.gmra.mxu2 %vm1649_vm9, %v5654_v46  ;;  %4460 = vmatpush.msk.msra.mxu0 %vm1271_vm4, %v1260_v31  ;;  %v485_v63 = vsel %vm474_vm1, %v4831_v26, %v4832_v23  ;;  %v8405_v31 = vld [vmem:[#allocation7_spill] sm:$0xff] }
 0x1c6   : > { %4422 = vmatmul.msk.f32.gmra.mxu3 %vm1649_vm9, %v5957_v10  ;;  %4469 = vmatpush.msk.msra.mxu1 %vm1271_vm4, %v1261_v53  ;;  %v1282_v49 = vsel %vm1271_vm4, %v8403_v51, %v485_v63 }
 0x1c7   : > { %2053 = vmatpush.msra.mxu0 %v1400_v7  ;;  %1616 = vperm.xlu2 %4934, %v1602_v16   ;;  %v6135_v44 = vpop.permute.xlu2 %1238  ;;  %v1302_v35 = vsel %vm1291_vm8, %v1282_v49, %v617_v56  ;;  %v8406_v7 = vld [vmem:[#allocation79_spill] sm:$0xff] }
 0x1c8   : > { %2094 = vmatpush.msra.mxu1 %v1401_v5  ;;  %4478 = vmatpush.msk.msrb.mxu2 %vm1271_vm4, %v1262_v39  ;;  %v1021_v16 = vrot.slane %v8406_v7, 6  ;;  %v8407_v39 = vld [vmem:[#allocation38_spill] sm:$0xff] }
 0x1c9   : > { %2054 = vmatpush.msra.mxu0 %v1360_v34 }
 0x1ca   : > { %v4825_v4 = vpop.permute.xlu1 %4824  ;;  %v4820_v61 = vpop.permute.xlu0 %4819 }
 0x1cb   : > { %v4827_v57 = vunpack.i.h.bf16 %v4825_v4  ;;  %v4826_v18 = vunpack.i.l.bf16 %v4825_v4  ;;  %v4822_v14 = vunpack.i.h.bf16 %v4820_v61  ;;  %v4821_v22 = vunpack.i.l.bf16 %v4820_v61  ;;  %v8408_v4 = vld [vmem:[#allocation87_spill] sm:$0xff] }
 0x1cc   : > { %4428 = vmatmul.msk.f32.gmra.mxu0 %vm1649_vm9, %v5794_v9  ;;  %4435 = vmatmul.msk.f32.gmra.mxu1 %vm1649_vm9, %v5676_v45  ;;  %v1022_v61 = vrot.slane %v8408_v4, 6 }
 0x1cd   : > { %4443 = vmatmul.msk.f32.vlgmr.msra.gmra.mxu2 %vm1649_vm9, %v5634_v59  ;;  %v1151_v3 = vsel %vm474_vm1, %v4816_v2, %v4822_v14  ;;  %v483_v38 = vsel %vm474_vm1, %v4796_v41, %v4827_v57  ;;  %v809_v40 = vsel %vm474_vm1, %v4821_v22, %v4826_v18  ;;  %v808_v36 = vsel %vm474_vm1, %v4817_v19, %v4821_v22  ;;  %v8409_v22 = vld [vmem:[#allocation9_spill] sm:$0xff] }
 0x1ce   : > { %4423 = vmatmul.msk.f32.gmra.mxu3 %vm1649_vm9, %v5654_v46  ;;  %v1402_v32 = vsel %vm1391_vm6, %v1382_v15, %v1151_v3  ;;  %v1280_v33 = vsel %vm1271_vm4, %v8404_v42, %v483_v38  ;;  %v1342_v2 = vsel %vm1331_vm5, %v1322_v17, %v809_v40  ;;  %v1341_v30 = vsel %vm1331_vm5, %v1321_v52, %v808_v36 }
 0x1cf   : > { %2135 = vmatpush.msrb.mxu2 %v1402_v32  ;;  %v1300_v41 = vsel %vm1291_vm8, %v1280_v33, %v6063_v1  ;;  %v1362_v28 = vsel %vm1351_vm7, %v1342_v2, %v940_v54  ;;  %v1361_v19 = vsel %vm1351_vm7, %v1341_v30, %v6077_v58  ;;  %v484_v21 = vsel %vm474_vm1, %v4827_v57, %v4831_v26  ;;  %v8410_v33 = vld [vmem:[#allocation56_spill] sm:$0xff] }
 0x1d0   : > { %2055 = vmatpush.msra.mxu0 %v1300_v41  ;;  %2095 = vmatpush.msra.mxu1 %v1361_v19  ;;  %v1281_v53 = vsel %vm1271_vm4, %v8405_v31, %v484_v21  ;;  %v698_v58 = vrot.slane %v8407_v39, 7  ;;  %v1152_v47 = vsel %vm474_vm1, %v4822_v14, %v4841_v11  ;;  %v810_v48 = vsel %vm474_vm1, %v4826_v18, %v4842_v20 }
 0x1d1   : > { %2136 = vmatpush.msrb.mxu2 %v1362_v28  ;;  %v1301_v5 = vsel %vm1291_vm8, %v1281_v53, %v616_v43  ;;  %v699_v2 = vrot.slane %v8410_v33, 7  ;;  %v8411_v28 = vld [vmem:[#allocation88_spill] sm:$0xff] }
 0x1d2   : > { %v4835_v1 = vpop.permute.xlu0 %4834  ;;  %v1237_v6 = vpop.permute.xlu1 %1236  ;;  %2096 = vmatpush.msra.mxu1 %v1301_v5  ;;  %v1023_v19 = vrot.slane %v8411_v28, 6 }
 0x1d3   : > { %v4837_v34 = vunpack.i.h.bf16 %v4835_v1  ;;  %v4836_v60 = vunpack.i.l.bf16 %v4835_v1  ;;  %v1263_v8 = vsel %vm606_vm0, %v5984_v55, %v1237_v6  ;;  %v1264_v26 = vsel %vm606_vm0, %v1237_v6, %v6135_v44  ;;  %2137 = vmatpush.msrb.mxu2 %v1302_v35 }
 0x1d4   : > { %4429 = vmatmul.msk.f32.gmra.mxu0 %vm1649_vm9, %v5843_v12  ;;  %4436 = vmatmul.msk.f32.gmra.mxu1 %vm1649_vm9, %v5735_v50 }
 0x1d5   : > { %v618_v55 = vsel %vm606_vm0, %v4812_v25, %v4837_v34  ;;  %4444 = vmatmul.msk.f32.gmra.mxu2 %vm1649_vm9, %v5676_v45  ;;  %4487 = vmatpush.msk.msrb.mxu3 %vm1271_vm4, %v1263_v8  ;;  %v941_v62 = vsel %vm606_vm0, %v4811_v24, %v4836_v60  ;;  %v6195_v29 = vpop.permute.xlu2 %4859 }
 0x1d6   : > { %4452 = vmatmul.msk.f32.vlgmr.msra.gmra.mxu3 %vm1649_vm9, %v5634_v59  ;;  %v1383_v43 = vsel %vm1371_vm3, %v941_v62, %v1021_v16  ;;  %v1323_v56 = vsel %vm1311_vm2, %v618_v55, %v698_v58  ;;  %4496 = vmatpush.msk.msrb.mxu0 %vm1271_vm4, %v1264_v26 }
 0x1d7   : > { %v1403_v25 = vsel %vm1391_vm6, %v1383_v43, %v1152_v47  ;;  %v1343_v54 = vsel %vm1331_vm5, %v1323_v56, %v810_v48  ;;  %v4862_v48 = vunpack.i.h.bf16 %v6195_v29  ;;  %v8412_v56 = vld [vmem:[#allocation91_spill] sm:$0xff] }
 0x1d8   : > { %2176 = vmatpush.msrb.mxu3 %v1403_v25  ;;  %v1363_v27 = vsel %vm1351_vm7, %v1343_v54, %v941_v62 }
 0x1da   : > { %v6205_v63 = vpop.permute.xlu0 %4844  ;;  %2177 = vmatpush.msrb.mxu3 %v1363_v27  ;;  %v6207_v24 = vpop.permute.xlu1 %4849  ;;  %v8413_v27 = vld [vmem:[#allocation25_spill] sm:$0xff] }
 0x1db   : > { %v4847_v15 = vunpack.i.h.bf16 %v6205_v63  ;;  %v4846_v17 = vunpack.i.l.bf16 %v6205_v63  ;;  %v4851_v52 = vunpack.i.l.bf16 %v6207_v24  ;;  %v4852_v42 = vunpack.i.h.bf16 %v6207_v24 }
 0x1dc   : > { %4430 = vmatmul.msk.f32.gmra.mxu0 %vm1649_vm9, %v5902_v0  ;;  %4437 = vmatmul.msk.f32.gmra.mxu1 %vm1649_vm9, %v5794_v9 }
 0x1dd   : > { %4445 = vmatmul.msk.f32.gmra.mxu2 %vm1649_vm9, %v5735_v50  ;;  %v486_v57 = vsel %vm474_vm1, %v4832_v23, %v4846_v17  ;;  %v942_v18 = vsel %vm606_vm0, %v4836_v60, %v4851_v52  ;;  %v1153_v14 = vsel %vm474_vm1, %v4841_v11, %v4847_v15  ;;  %v6230_v49 = vpop.permute.xlu2 %4869  ;;  %v6252_v41 = vsel %vm606_vm0, %v4851_v52, %v4852_v42 }
 0x1de   : > { %4453 = vmatmul.msk.f32.gmra.mxu3 %vm1649_vm9, %v5676_v45  ;;  %v1283_v51 = vsel %vm1271_vm4, %v8409_v22, %v486_v57  ;;  %v1384_v3 = vsel %vm1371_vm3, %v942_v18, %v1022_v61  ;;  %v1385_v6 = vsel %vm1371_vm3, %v6252_v41, %v1023_v19  ;;  %v4872_v26 = vunpack.i.h.bf16 %v6230_v49  ;;  %v8414_v57 = vld [vmem:[#allocation57_spill] sm:$0xff]  ;;  %v8415_v22 = vld [vmem:[#allocation60_spill] sm:$0xff] }
 0x1df   : > { %v1303_v38 = vsel %vm1291_vm8, %v1283_v51, %v618_v55  ;;  %v1404_v37 = vsel %vm1391_vm6, %v1384_v3, %v1153_v14  ;;  %v4871_v55 = vunpack.i.l.bf16 %v6230_v49  ;;  %v701_v51 = vrot.slane %v8415_v22, 7 }
 0x1e0   : > { %2178 = vmatpush.msrb.mxu3 %v1303_v38  ;;  %2217 = vmatpush.msrb.mxu0 %v1404_v37 }
 0x1e2   : > { %v1241_v23 = vpop.permute.xlu0 %1240  ;;  %v4855_v40 = vpop.permute.xlu1 %4854 }
 0x1e3   : > { %v1265_v36 = vsel %vm606_vm0, %v6135_v44, %v1241_v23  ;;  %v4856_v32 = vunpack.i.l.bf16 %v4855_v40  ;;  %v4857_v60 = vunpack.i.h.bf16 %v4855_v40 }
 0x1e4   : > { %4431 = vmatmul.msk.f32.gmra.mxu0 %vm1649_vm9, %v5957_v10  ;;  %4438 = vmatmul.msk.f32.gmra.mxu1 %vm1649_vm9, %v5843_v12 }
 0x1e5   : > { %4446 = vmatmul.msk.f32.gmra.mxu2 %vm1649_vm9, %v5794_v9  ;;  %4505 = vmatpush.msk.msrb.mxu1 %vm1271_vm4, %v1265_v36  ;;  %v619_v44 = vsel %vm606_vm0, %v4837_v34, %v4856_v32  ;;  %v620_v54 = vsel %vm606_vm0, %v4856_v32, %v4857_v60  ;;  %v621_v4 = vsel %vm606_vm0, %v4857_v60, %v4862_v48 }
 0x1e6   : > { %4454 = vmatmul.msk.f32.gmra.mxu3 %vm1649_vm9, %v5735_v50  ;;  %v1324_v21 = vsel %vm1311_vm2, %v619_v44, %v699_v2  ;;  %v1326_v40 = vsel %vm1311_vm2, %v621_v4, %v701_v51 }
 0x1e8   : > { %v6249_v30 = vpop.permute.xlu2 %4884 }
 0x1e9   : > { %v4887_v19 = vunpack.i.h.bf16 %v6249_v30 }
 0x1eb   : > { %v4865_v11 = vpop.permute.xlu0 %4864  ;;  %v1243_v35 = vpop.permute.xlu1 %1242 }
 0x1ec   : > { %v4867_v31 = vunpack.i.h.bf16 %v4865_v11  ;;  %v4866_v53 = vunpack.i.l.bf16 %v4865_v11  ;;  %v1266_v1 = vsel %vm606_vm0, %v1241_v23, %v1243_v35  ;;  %4432 = vmatmul.msk.f32.gmra.mxu0 %vm1649_vm9, %v5654_v46  ;;  %4439 = vmatmul.msk.f32.gmra.mxu1 %vm1649_vm9, %v5902_v0  ;;  %v4886_v11 = vunpack.i.l.bf16 %v6249_v30 }
 0x1ed   : > { %4447 = vmatmul.msk.f32.gmra.mxu2 %vm1649_vm9, %v5843_v12 }
 0x1ee   : > { %4455 = vmatmul.msk.f32.gmra.mxu3 %vm1649_vm9, %v5794_v9  ;;  %v811_v7 = vsel %vm474_vm1, %v4842_v20, %v4867_v31  ;;  %v1154_v16 = vsel %vm474_vm1, %v4847_v15, %v4866_v53  ;;  %4514 = vmatpush.msk.msra.mxu2 %vm1271_vm4, %v1266_v1  ;;  %v4861_v20 = vunpack.i.l.bf16 %v6195_v29  ;;  %v1155_v25 = vsel %vm474_vm1, %v4866_v53, %v4872_v26  ;;  %v8416_v53 = vld [vmem:[#allocation26_spill] sm:$0xff] }
 0x1ef   : > { %v1344_v39 = vsel %vm1331_vm5, %v1324_v21, %v811_v7  ;;  %v1405_v58 = vsel %vm1391_vm6, %v1385_v6, %v1154_v16  ;;  %v812_v14 = vsel %vm474_vm1, %v4867_v31, %v4871_v55  ;;  %v8417_v6 = vld [vmem:[#allocation35_spill] sm:$0xff] }
 0x1f0   : > { %v1364_v5 = vsel %vm1351_vm7, %v1344_v39, %v942_v18  ;;  %2258 = vmatpush.msrb.mxu1 %v1405_v58  ;;  %v944_v43 = vsel %vm606_vm0, %v4852_v42, %v4861_v20  ;;  %v700_v18 = vrot.slane %v8414_v57, 7 }
 0x1f1   : > { %v6275_v34 = vpop.permute.xlu2 %4894  ;;  %2218 = vmatpush.msrb.mxu0 %v1364_v5  ;;  %v6365_v5 = vld [vmem:[%s8231_s2] sm:$0xff] }
 0x1f2   : > { %v1325_v23 = vsel %vm1311_vm2, %v620_v54, %v700_v18  ;;  %v8420_v18 = vld [vmem:[#allocation36_spill] sm:$0xff] }
 0x1f3   : > { %v6277_v8 = vpop.permute.xlu0 %4874  ;;  %v6279_v13 = vpop.permute.xlu1 %4879  ;;  %v1345_v42 = vsel %vm1331_vm5, %v1325_v23, %v812_v14 }
 0x1f4   : > { %v4877_v47 = vunpack.i.h.bf16 %v6277_v8  ;;  %4440 = vmatmul.msk.f32.gmra.mxu1 %vm1649_vm9, %v5957_v10  ;;  %4461 = vmatmul.msk.f32.vlgmr.msra.gmra.mxu0 %vm1649_vm9, %v5634_v59  ;;  %v1024_v59 = vrot.slane %v8412_v56, 6  ;;  %v4876_v63 = vunpack.i.l.bf16 %v6277_v8  ;;  %v4881_v2 = vunpack.i.l.bf16 %v6279_v13 }
 0x1f5   : > { %4448 = vmatmul.msk.f32.gmra.mxu2 %vm1649_vm9, %v5902_v0  ;;  %v622_v8 = vsel %vm606_vm0, %v4862_v48, %v4887_v19 }
 0x1f6   : > { %4456 = vmatmul.msk.f32.gmra.mxu3 %vm1649_vm9, %v5843_v12  ;;  %v487_v62 = vsel %vm474_vm1, %v4846_v17, %v4877_v47  ;;  %v1386_v17 = vsel %vm1371_vm3, %v944_v43, %v1024_v59  ;;  %v813_v3 = vsel %vm474_vm1, %v4871_v55, %v4876_v63  ;;  %v945_v55 = vsel %vm606_vm0, %v4861_v20, %v4886_v11  ;;  %v8419_v59 = vld [vmem:[#allocation61_spill] sm:$0xff] }
 0x1f7   : > { %v1284_v24 = vsel %vm1271_vm4, %v8413_v27, %v487_v62  ;;  %v1406_v52 = vsel %vm1391_vm6, %v1386_v17, %v1155_v25  ;;  %v1346_v33 = vsel %vm1331_vm5, %v1326_v40, %v813_v3  ;;  %v8418_v62 = vld [vmem:[#allocation92_spill] sm:$0xff]  ;;  %v702_v25 = vrot.slane %v8419_v59, 7 }
 0x1f8   : > { %v6309_v61 = vpop.f32.mrf.mxu0  ;;  %v1304_v15 = vsel %vm1291_vm8, %v1284_v24, %v619_v44  ;;  %2299 = vmatpush.msra.mxu2 %v1406_v52  ;;  %v1365_v44 = vsel %vm1351_vm7, %v1345_v42, %v6252_v41  ;;  %v1366_v28 = vsel %vm1351_vm7, %v1346_v33, %v944_v43  ;;  %v1025_v43 = vrot.slane %v8418_v62, 6  ;;  %v6420_v52 = vld [vmem:[%s8231_s2 + $0x8] sm:$0xff] }
 0x1f9   : > { %2219 = vmatpush.msrb.mxu0 %v1304_v15  ;;  %v6320_v37 = vpop.permute.xlu2 %4914  ;;  %2259 = vmatpush.msrb.mxu1 %v1365_v44  ;;  %v4896_v20 = vunpack.i.l.bf16 %v6275_v34  ;;  %v1327_v24 = vsel %vm1311_vm2, %v622_v8, %v702_v25  ;;  %v4897_v44 = vunpack.i.h.bf16 %v6275_v34 }
 0x1fa   : > { %2300 = vmatpush.msra.mxu2 %v1366_v28  ;;  %v4917_v28 = vunpack.i.h.bf16 %v6320_v37 }
 0x1fb   : > { %v6318_v38 = vpop.permute.xlu0 %1244 }
 0x1fc   : > { %v1267_v36 = vsel %vm606_vm0, %v1243_v35, %v6318_v38  ;;  %4441 = vmatmul.msk.f32.gmra.mxu1 %vm1649_vm9, %v5654_v46  ;;  %4462 = vmatmul.msk.f32.gmra.mxu0 %vm1649_vm9, %v5676_v45  ;;  %v6330_v32 = vpop.permute.xlu1 %4889  ;;  %v4882_v46 = vunpack.i.h.bf16 %v6279_v13  ;;  %v488_v35 = vsel %vm474_vm1, %v4877_v47, %v4881_v2  ;;  %v6377_v13 = vld [vmem:[%s8231_s2 + $0x38] sm:$0xff] }
 0x1fd   : > { %4449 = vmatmul.msk.f32.gmra.mxu2 %vm1649_vm9, %v5957_v10  ;;  %4523 = vmatpush.msk.msra.mxu3 %vm1271_vm4, %v1267_v36  ;;  %v4892_v21 = vunpack.i.h.bf16 %v6330_v32  ;;  %v4891_v31 = vunpack.i.l.bf16 %v6330_v32  ;;  %v1285_v1 = vsel %vm1271_vm4, %v8416_v53, %v488_v35 }
 0x1fe   : > { %4457 = vmatmul.msk.f32.gmra.mxu3 %vm1649_vm9, %v5902_v0  ;;  %v489_v41 = vsel %vm474_vm1, %v4881_v2, %v4882_v46  ;;  %v1305_v39 = vsel %vm1291_vm8, %v1285_v1, %v620_v54  ;;  %v1387_v54 = vsel %vm1371_vm3, %v945_v55, %v1025_v43 }
 0x1ff   : > { %v1286_v7 = vsel %vm1271_vm4, %v8417_v6, %v489_v41  ;;  %2260 = vmatpush.msrb.mxu1 %v1305_v39  ;;  %v1156_v56 = vsel %vm474_vm1, %v4872_v26, %v4891_v31  ;;  %v814_v29 = vsel %vm474_vm1, %v4876_v63, %v4892_v21  ;;  %v490_v63 = vsel %vm474_vm1, %v4882_v46, %v4896_v20  ;;  %v8421_v6 = vld [vmem:[#allocation82_spill] sm:$0xff] }
 0x200   : > { %v6344_v45 = vpop.f32.mrf.mxu0  ;;  %v1306_v58 = vsel %vm1291_vm8, %v1286_v7, %v621_v4  ;;  %v6389_v48 = vpop.f32.mrf.mxu2  ;;  %v1407_v27 = vsel %vm1391_vm6, %v1387_v54, %v1156_v56  ;;  %v1347_v49 = vsel %vm1331_vm5, %v1327_v24, %v814_v29  ;;  %v1287_v14 = vsel %vm1271_vm4, %v8420_v18, %v490_v63  ;;  %v8423_v54 = vld [vmem:[#allocation10_spill] sm:$0xff]  ;;  %v6516_v24 = vld [vmem:[%s8231_s2 + $0x10] sm:$0xff] }
 0x201   : > { %v1249_v47 = vpop.permute.xlu2 %1248  ;;  %2301 = vmatpush.msra.mxu2 %v1306_v58  ;;  %2340 = vmatpush.msra.mxu3 %v1407_v27  ;;  %v1367_v26 = vsel %vm1351_vm7, %v1347_v49, %v945_v55  ;;  %v1307_v3 = vsel %vm1291_vm8, %v1287_v14, %v622_v8  ;;  %v1026_v7 = vrot.slane %v8421_v6, 6  ;;  %v815_v30 = vsel %vm474_vm1, %v4892_v21, %v4917_v28 }
 0x203   : > { %v6356_v16 = vpop.permute.xlu0 %4899  ;;  %2341 = vmatpush.msra.mxu3 %v1367_v26  ;;  %v4976_v26 = vmov 0.0  }
 0x204   : > { %4463 = vmatmul.msk.f32.gmra.mxu0 %vm1649_vm9, %v5735_v50  ;;  %4470 = vmatmul.msk.f32.vlgmr.msra.gmra.mxu1 %vm1649_vm9, %v6365_v5  ;;  %v6369_v60 = vpop.permute.xlu1 %4909  ;;  %v6525_v63 = vperm.slane %v4976_v26, 0 }
 0x205   : > { %4450 = vmatmul.msk.f32.gmra.mxu2 %vm1649_vm9, %v6377_v13  ;;  %2342 = vmatpush.msra.mxu3 %v1307_v3 }
 0x206   : > { %4458 = vmatmul.msk.f32.gmra.mxu3 %vm1649_vm9, %v5957_v10 }
 0x209   : > { %v6404_v4 = vpop.f32.mrf.mxu0  ;;  %v6406_v15 = vpop.f32.mrf.mxu1 }
 0x20a   : > { %v6435_v23 = vpop.permute.xlu2 %4924 }
 0x20b   : > { %v6410_v17 = vpop.permute.xlu0 %4904 }
 0x20c   : > { %4464 = vmatmul.msk.f32.gmra.mxu0 %vm1649_vm9, %v5794_v9  ;;  %4471 = vmatmul.msk.f32.gmra.mxu1 %vm1649_vm9, %v6420_v52  ;;  %v1247_v57 = vpop.permute.xlu1 %1246  ;;  %v4906_v42 = vunpack.i.l.bf16 %v6410_v17  ;;  %v4907_v6 = vunpack.i.h.bf16 %v6410_v17 }
 0x20d   : > { %4479 = vmatmul.msk.f32.vlgmr.msrb.gmra.mxu2 %vm1649_vm9, %v6365_v5  ;;  %v1268_v22 = vsel %vm606_vm0, %v6318_v38, %v1247_v57  ;;  %v1269_v51 = vsel %vm606_vm0, %v1247_v57, %v1249_v47  ;;  %v4901_v38 = vunpack.i.l.bf16 %v6356_v16 }
 0x20e   : > { %4459 = vmatmul.msk.f32.gmra.mxu3 %vm1649_vm9, %v6377_v13  ;;  %4532 = vmatpush.msk.msra.mxu0 %vm1271_vm4, %v1268_v22  ;;  %v623_v53 = vsel %vm606_vm0, %v4887_v19, %v4906_v42  ;;  %v8422_v19 = vld [vmem:[#allocation41_spill] sm:$0xff] }
 0x20f   : > { %4541 = vmatpush.msk.msra.mxu1 %vm1271_vm4, %v1269_v51  ;;  %v946_v1 = vsel %vm606_vm0, %v4886_v11, %v4901_v38  ;;  %v703_v39 = vrot.slane %v8422_v19, 7  ;;  %v4927_v11 = vunpack.i.h.bf16 %v6435_v23 }
 0x210   : > { %v6438_v40 = vpop.f32.mrf.mxu2  ;;  %v6440_v36 = vpop.f32.mrf.mxu3  ;;  %v1388_v58 = vsel %vm1371_vm3, %v946_v1, %v1026_v7 }
 0x211   : > { %v6444_v33 = vpop.f32.mrf.mxu0  ;;  %v6446_v2 = vpop.f32.mrf.mxu1  ;;  %v491_v25 = vsel %vm474_vm1, %v4896_v20, %v4927_v11 }
 0x212   : > { %v6496_v56 = vpop.permute.xlu2 %1641  ;;  %v1288_v27 = vsel %vm1271_vm4, %v8423_v54, %v491_v25  ;;  %v6570_v25 = vsel %vm606_vm0, %v4906_v42, %v4907_v6 }
 0x213   : > { %v1251_v46 = vpop.permute.xlu0 %1250  ;;  %v1308_v49 = vsel %vm1291_vm8, %v1288_v27, %v623_v53  ;;  %v4926_v27 = vunpack.i.l.bf16 %v6435_v23 }
 0x214   : > { %v1270_v35 = vsel %vm606_vm0, %v1249_v47, %v1251_v46  ;;  %4465 = vmatmul.msk.f32.gmra.mxu0 %vm1649_vm9, %v5843_v12  ;;  %4472 = vmatmul.msk.f32.gmra.mxu1 %vm1649_vm9, %v5735_v50  ;;  %v6455_v41 = vpop.permute.xlu1 %4919  ;;  %v1157_v50 = vsel %vm474_vm1, %v4891_v31, %v4897_v44  ;;  %v1328_v31 = vsel %vm1311_vm2, %v623_v53, %v703_v39 }
 0x215   : > { %4480 = vmatmul.msk.f32.gmra.mxu2 %vm1649_vm9, %v6420_v52  ;;  %v1408_v47 = vsel %vm1391_vm6, %v1388_v58, %v1157_v50  ;;  %v1348_v32 = vsel %vm1331_vm5, %v1328_v31, %v815_v30  ;;  %v4902_v50 = vunpack.i.h.bf16 %v6356_v16  ;;  %v4916_v58 = vunpack.i.l.bf16 %v6320_v37 }
 0x216   : > { %4488 = vmatmul.msk.f32.vlgmr.msrb.gmra.mxu3 %vm1649_vm9, %v6365_v5  ;;  %4550 = vmatpush.msk.msrb.mxu2 %vm1271_vm4, %v1270_v35  ;;  %v1368_v21 = vsel %vm1351_vm7, %v1348_v32, %v946_v1  ;;  %v6547_v35 = vld [vmem:[%s8231_s2 + $0x18] sm:$0xff]  ;;  %v4912_v1 = vunpack.i.h.bf16 %v6369_v60 }
 0x217   : > { %2381 = vmatpush.msra.mxu0 %v1408_v47  ;;  %v4911_v47 = vunpack.i.l.bf16 %v6369_v60  ;;  %v947_v26 = vsel %vm606_vm0, %v4901_v38, %v4902_v50 }
 0x218   : > { %v6486_v8 = vpop.f32.mrf.mxu2  ;;  %v6573_v54 = vsel %vm606_vm0, %v4907_v6, %v4912_v1  ;;  %v8425_v6 = vld [vmem:[#allocation86_spill] sm:$0xff] }
 0x219   : > { %v6490_v55 = vpop.f32.mrf.mxu3  ;;  %v1741_v62 = vpop.f32.mrf.mxu0  ;;  %2382 = vmatpush.msra.mxu0 %v1368_v21 }
 0x21a   : > { %v6493_v43 = vpop.f32.mrf.mxu1  ;;  %v6540_v3 = vpop.permute.xlu2 %1626 }
 0x21b   : > { %v6498_v59 = vpop.permute.xlu0 %4929  ;;  %2383 = vmatpush.msra.mxu0 %v1308_v49  ;;  %v1739_v42 = vadd.f32 %v6444_v33, %v6540_v3  ;;  %v1158_v33 = vsel %vm474_vm1, %v4897_v44, %v4916_v58 }
 0x21c   : > { %4466 = vmatmul.msk.f32.gmra.mxu0 %vm1649_vm9, %v5902_v0  ;;  %4473 = vmatmul.msk.f32.gmra.mxu1 %vm1649_vm9, %v5794_v9  ;;  %v6509_v29 = vpop.permute.xlu1 %1646  ;;  %v4932_v60 = vunpack.i.h.bf16 %v6498_v59 }
 0x21d   : > { %4481 = vmatmul.msk.f32.gmra.mxu2 %vm1649_vm9, %v6516_v24  ;;  %v1751_v20 = vadd.f32 %v6389_v48, %v6509_v29  ;;  %v2548_v34 = vmax.f32 %v1739_v42, 0.0 }
 0x21e   : > { %4489 = vmatmul.msk.f32.gmra.mxu3 %vm1649_vm9, %v6420_v52 }
 0x21f   : > { %v2624_v9 = vmax.f32 %v1751_v20, 0.0  ;;  %v4921_v20 = vunpack.i.l.bf16 %v6455_v41 }
 0x220   : > { %v6527_v57 = vpop.f32.mrf.mxu2 }
 0x221   : > { %v6529_v18 = vpop.f32.mrf.mxu3  ;;  %v1744_v14 = vpop.f32.mrf.mxu0  ;;  %v2795_v22 = vmul.f32 %v6525_v63, %v2624_v9  ;;  %v4931_v9 = vunpack.i.l.bf16 %v6498_v59 }
 0x222   : > { %v6532_v51 = vpop.f32.mrf.mxu1  ;;  %v6602_v59 = vpop.permute.xlu2 %1616 }
 0x223   : > { %2839 = vmatpush.msrb.mxu3 %v2795_v22  ;;  %v6542_v46 = vpop.permute.xlu0 %1636 }
 0x224   : > { %4467 = vmatmul.msk.f32.gmra.mxu0 %vm1649_vm9, %v5957_v10  ;;  %4474 = vmatmul.msk.f32.gmra.mxu1 %vm1649_vm9, %v5843_v12  ;;  %v6538_v48 = vpop.permute.xlu1 %1631  ;;  %v1745_v53 = vadd.f32 %v1744_v14, %v6542_v46  ;;  %v8424_v14 = vld [vmem:[#allocation83_spill] sm:$0xff] }
 0x225   : > { %4482 = vmatmul.msk.f32.gmra.mxu2 %vm1649_vm9, %v6547_v35  ;;  %v1742_v30 = vadd.f32 %v1741_v62, %v6538_v48  ;;  %v4922_v62 = vunpack.i.h.bf16 %v6455_v41  ;;  %v1027_v22 = vrot.slane %v8424_v14, 6 }
 0x226   : > { %4490 = vmatmul.msk.f32.gmra.mxu3 %vm1649_vm9, %v6516_v24  ;;  %v2586_v21 = vmax.f32 %v1745_v53, 0.0 }
 0x227   : > { %v2567_v41 = vmax.f32 %v1742_v30, 0.0  ;;  %v1389_v38 = vsel %vm1371_vm3, %v947_v26, %v1027_v22  ;;  %v1159_v30 = vsel %vm474_vm1, %v4916_v58, %v4922_v62  ;;  %v1733_v62 = vadd.f32 %v6344_v45, %v6602_v59  ;;  %v8427_v22 = vld [vmem:[#allocation43_spill] sm:$0xff] }
 0x228   : > { %v6556_v7 = vpop.f32.mrf.mxu2  ;;  %v2757_v1 = vmul.f32 %v6525_v63, %v2586_v21  ;;  %v1409_v44 = vsel %vm1391_vm6, %v1389_v38, %v1158_v33 }
 0x229   : > { %v6559_v19 = vpop.f32.mrf.mxu3  ;;  %v1747_v39 = vpop.f32.mrf.mxu0  ;;  %v2738_v58 = vmul.f32 %v6525_v63, %v2567_v41  ;;  %2422 = vmatpush.msra.mxu1 %v1409_v44 }
 0x22a   : > { %v1748_v31 = vadd.f32 %v1747_v39, %v6496_v56  ;;  %v6565_v32 = vpop.f32.mrf.mxu1  ;;  %v1028_v39 = vrot.slane %v8425_v6, 6  ;;  %v817_v6 = vsel %vm474_vm1, %v4921_v20, %v4926_v27 }
 0x22c   : > { %v2605_v49 = vmax.f32 %v1748_v31, 0.0  ;;  %4468 = vmatmul.msk.f32.gmra.mxu0 %vm1649_vm9, %v6377_v13  ;;  %4475 = vmatmul.msk.f32.gmra.mxu1 %vm1649_vm9, %v5902_v0  ;;  %v6583_v17 = vpop.permute.xlu1 %1621  ;;  %v6609_v31 = vpop.permute.xlu0 %1611 }
 0x22d   : > { %4483 = vmatmul.msk.f32.gmra.mxu2 %vm1649_vm9, %v5843_v12  ;;  %v948_v12 = vsel %vm606_vm0, %v4902_v50, %v4911_v47  ;;  %v1736_v16 = vadd.f32 %v6404_v4, %v6583_v17  ;;  %v8426_v50 = vld [vmem:[#allocation42_spill] sm:$0xff]  ;;  %v816_v4 = vsel %vm474_vm1, %v4917_v28, %v4921_v20  ;;  %v1730_v41 = vadd.f32 %v6309_v61, %v6609_v31 }
 0x22e   : > { %4491 = vmatmul.msk.f32.gmra.mxu3 %vm1649_vm9, %v6547_v35  ;;  %v2776_v53 = vmul.f32 %v6525_v63, %v2605_v49  ;;  %v704_v47 = vrot.slane %v8426_v50, 7  ;;  %v1390_v42 = vsel %vm1371_vm3, %v948_v12, %v1028_v39  ;;  %v2510_v61 = vmax.f32 %v1733_v62, 0.0  ;;  %v8429_v50 = vld [vmem:[#allocation12_spill] sm:$0xff] }
 0x22f   : > { %v1410_v37 = vsel %vm1391_vm6, %v1390_v42, %v1159_v30  ;;  %v2529_v38 = vmax.f32 %v1736_v16, 0.0  ;;  %v492_v20 = vsel %vm474_vm1, %v4927_v11, %v4931_v9  ;;  %v493_v30 = vsel %vm474_vm1, %v4931_v9, %v4932_v60 }
 0x230   : > { %v6611_v21 = vpop.f32.mrf.mxu2  ;;  %2840 = vmatpush.msrb.mxu3 %v2776_v53  ;;  %v705_v53 = vrot.slane %v8427_v22, 7  ;;  %v1329_v28 = vsel %vm1311_vm2, %v6570_v25, %v704_v47  ;;  %2463 = vmatpush.msrb.mxu2 %v1410_v37  ;;  %v1290_v23 = vsel %vm1271_vm4, %v8429_v50, %v493_v30  ;;  %v2491_v60 = vmax.f32 %v1730_v41, 0.0  ;;  %v6705_v41 = vld [vmem:[%s8230_s1] sm:$0xff] }
 0x231   : > { %v6618_v49 = vpop.f32.mrf.mxu3  ;;  %v6620_v14 = vpop.f32.mrf.mxu0  ;;  %v1349_v45 = vsel %vm1331_vm5, %v1329_v28, %v816_v4  ;;  %v2700_v11 = vmul.f32 %v6525_v63, %v2529_v38  ;;  %v1310_v47 = vsel %vm1291_vm8, %v1290_v23, %v6573_v54  ;;  %v2681_v62 = vmul.f32 %v6525_v63, %v2510_v61 }
 0x232   : > { %v6627_v33 = vpop.f32.mrf.mxu1  ;;  %2841 = vmatpush.msrb.mxu3 %v2757_v1  ;;  %v2719_v1 = vmul.f32 %v6525_v63, %v2548_v34  ;;  %v1369_v39 = vsel %vm1351_vm7, %v1349_v45, %v947_v26  ;;  %v1330_v16 = vsel %vm1311_vm2, %v6573_v54, %v705_v53  ;;  %v6654_v26 = vld [vmem:[%s8231_s2 + $0x20] sm:$0xff]  ;;  %v8428_v34 = vld [vmem:[#allocation11_spill] sm:$0xff]  ;;  %v2662_v22 = vmul.f32 %v6525_v63, %v2491_v60 }
 0x233   : > { %v1350_v27 = vsel %vm1331_vm5, %v1330_v16, %v817_v6  ;;  %2423 = vmatpush.msra.mxu1 %v1369_v39  ;;  %v1289_v44 = vsel %vm1271_vm4, %v8428_v34, %v492_v20  ;;  %v1546_v6 = vperm.slane %v6705_v41, 2  ;;  %v1792_v23 = vadd.f32 %v6440_v36, %v6509_v29 }
 0x234   : > { %4476 = vmatmul.msk.f32.gmra.mxu1 %vm1649_vm9, %v5957_v10  ;;  %4497 = vmatmul.msk.f32.vlgmr.msrb.gmra.mxu0 %vm1649_vm9, %v6365_v5  ;;  %v1309_v9 = vsel %vm1291_vm8, %v1289_v44, %v6570_v25  ;;  %v6683_v25 = vld [vmem:[%s8231_s2 + $0x28] sm:$0xff]  ;;  %v1821_v44 = vadd.f32 %v6556_v7, %v6540_v3  ;;  %v1786_v36 = vadd.f32 %v6627_v33, %v6542_v46 }
 0x235   : > { %4484 = vmatmul.msk.f32.gmra.mxu2 %vm1649_vm9, %v5902_v0  ;;  %2842 = vmatpush.msrb.mxu3 %v2738_v58  ;;  %v1370_v0 = vsel %vm1351_vm7, %v1350_v27, %v948_v12  ;;  %v6718_v34 = vperm.slane %v1546_v6, 0 }
 0x236   : > { %4492 = vmatmul.msk.f32.gmra.mxu3 %vm1649_vm9, %v6654_v26  ;;  %2464 = vmatpush.msrb.mxu2 %v1370_v0 }
 0x237   : > { %2843 = vmatpush.msrb.mxu3 %v2719_v1  ;;  %2424 = vmatpush.msra.mxu1 %v1309_v9 }
 0x238   : > { %v1826_v4 = vpop.f32.mrf.mxu2  ;;  %2465 = vmatpush.msrb.mxu2 %v1310_v47  ;;  %v1818_v47 = vadd.f32 %v6527_v57, %v6583_v17  ;;  %v1783_v57 = vadd.f32 %v6565_v32, %v6538_v48 }
 0x239   : > { %v6668_v12 = vpop.f32.mrf.mxu3  ;;  %2844 = vmatpush.msrb.mxu3 %v2700_v11  ;;  %v6670_v58 = vpop.f32.mrf.mxu0  ;;  %v1827_v45 = vadd.f32 %v1826_v4, %v6542_v46  ;;  %v1545_v11 = vperm.slane %v6705_v41, 1 }
 0x23a   : > { %v1788_v42 = vpop.f32.mrf.mxu1 }
 0x23b   : > { %2845 = vmatpush.msrb.mxu3 %v2681_v62  ;;  %v2588_v30 = vmax.f32 %v1827_v45, 0.0  ;;  %v1789_v9 = vadd.f32 %v1788_v42, %v6496_v56  ;;  %v2550_v62 = vmax.f32 %v1821_v44, 0.0  ;;  %v2625_v42 = vmax.f32 %v1792_v23, 0.0 }
 0x23c   : > { %4477 = vmatmul.msk.f32.gmra.mxu1 %vm1649_vm9, %v6377_v13  ;;  %4498 = vmatmul.msk.f32.gmra.mxu0 %vm1649_vm9, %v6420_v52  ;;  %v6751_v6 = vperm.slane %v1545_v11, 0  ;;  %v2568_v44 = vmax.f32 %v1783_v57, 0.0  ;;  %v1777_v11 = vadd.f32 %v6493_v43, %v6583_v17  ;;  %v1771_v57 = vadd.f32 %v6406_v15, %v6609_v31 }
 0x23d   : > { %4485 = vmatmul.msk.f32.gmra.mxu2 %vm1649_vm9, %v5957_v10  ;;  %2846 = vmatpush.msrb.mxu3 %v2662_v22  ;;  %v2759_v7 = vmul.f32 %v6718_v34, %v2588_v30 }
 0x23e   : > { %4493 = vmatmul.msk.f32.gmra.mxu3 %vm1649_vm9, %v6683_v25  ;;  %v2796_v32 = vmul.f32 %v6751_v6, %v2625_v42  ;;  %v2739_v43 = vmul.f32 %v6751_v6, %v2568_v44 }
 0x240   : > { %v1829_v54 = vpop.f32.mrf.mxu2 }
 0x241   : > { %v6687_v53 = vpop.f32.mrf.mxu3  ;;  %v6689_v37 = vpop.f32.mrf.mxu0  ;;  %v1830_v38 = vadd.f32 %v1829_v54, %v6496_v56 }
 0x242   : > { %v6691_v28 = vpop.f32.mrf.mxu1 }
 0x243   : > { %v2607_v39 = vmax.f32 %v1830_v38, 0.0  ;;  %v1815_v38 = vadd.f32 %v6486_v8, %v6602_v59  ;;  %v1812_v8 = vadd.f32 %v6438_v40, %v6609_v31 }
 0x244   : > { %4499 = vmatmul.msk.f32.gmra.mxu0 %vm1649_vm9, %v6516_v24  ;;  %4506 = vmatmul.msk.f32.vlgmr.msrb.gmra.mxu1 %vm1649_vm9, %v6365_v5 }
 0x245   : > { %4486 = vmatmul.msk.f32.gmra.mxu2 %vm1649_vm9, %v6377_v13  ;;  %v2512_v30 = vmax.f32 %v1815_v38, 0.0  ;;  %v2493_v23 = vmax.f32 %v1812_v8, 0.0  ;;  %v2530_v38 = vmax.f32 %v1777_v11, 0.0 }
 0x246   : > { %4494 = vmatmul.msk.f32.gmra.mxu3 %vm1649_vm9, %v5957_v10  ;;  %v1824_v10 = vadd.f32 %v6611_v21, %v6538_v48  ;;  %v2778_v21 = vmul.f32 %v6718_v34, %v2607_v39  ;;  %v2531_v39 = vmax.f32 %v1818_v47, 0.0 }
 0x247   : > { %v2664_v42 = vmul.f32 %v6718_v34, %v2493_v23  ;;  %v2701_v15 = vmul.f32 %v6751_v6, %v2530_v38 }
 0x248   : > { %v1832_v1 = vpop.f32.mrf.mxu2  ;;  %v2569_v60 = vmax.f32 %v1824_v10, 0.0  ;;  %v2721_v10 = vmul.f32 %v6718_v34, %v2550_v62 }
 0x249   : > { %v1833_v16 = vadd.f32 %v1832_v1, %v6509_v29  ;;  %v6710_v61 = vpop.f32.mrf.mxu3  ;;  %v6712_v27 = vpop.f32.mrf.mxu0  ;;  %v2606_v1 = vmax.f32 %v1789_v9, 0.0 }
 0x24a   : > { %v6714_v20 = vpop.f32.mrf.mxu1  ;;  %v2740_v33 = vmul.f32 %v6718_v34, %v2569_v60 }
 0x24b   : > { %v2626_v0 = vmax.f32 %v1833_v16, 0.0  ;;  %v2587_v16 = vmax.f32 %v1786_v36, 0.0  ;;  %v2777_v40 = vmul.f32 %v6751_v6, %v2606_v1  ;;  %v1774_v36 = vadd.f32 %v6446_v2, %v6602_v59 }
 0x24c   : > { %4500 = vmatmul.msk.f32.gmra.mxu0 %vm1649_vm9, %v6547_v35  ;;  %4507 = vmatmul.msk.f32.gmra.mxu1 %vm1649_vm9, %v6420_v52 }
 0x24d   : > { %v2797_v50 = vmul.f32 %v6718_v34, %v2626_v0  ;;  %4515 = vmatmul.msk.f32.vlgmr.msra.gmra.mxu2 %vm1649_vm9, %v6365_v5  ;;  %v1780_v0 = vadd.f32 %v6532_v51, %v6540_v3  ;;  %v2758_v9 = vmul.f32 %v6751_v6, %v2587_v16  ;;  %v2511_v1 = vmax.f32 %v1774_v36, 0.0 }
 0x24e   : > { %4495 = vmatmul.msk.f32.gmra.mxu3 %vm1649_vm9, %v6377_v13 }
 0x24f   : > { %2894 = vmatpush.msrb.mxu0 %v2797_v50  ;;  %4646 = vmatpush.msrb.mxu1 %v2797_v50  ;;  %v2702_v50 = vmul.f32 %v6718_v34, %v2531_v39  ;;  %v2549_v47 = vmax.f32 %v1780_v0, 0.0 }
 0x250   : > { %v6739_v4 = vpop.f32.mrf.mxu2 }
 0x251   : > { %v6743_v22 = vpop.f32.mrf.mxu3  ;;  %2895 = vmatpush.msrb.mxu0 %v2778_v21  ;;  %4647 = vmatpush.msrb.mxu1 %v2778_v21  ;;  %v6745_v54 = vpop.f32.mrf.mxu0  ;;  %v2720_v2 = vmul.f32 %v6751_v6, %v2549_v47 }
 0x252   : > { %v6749_v45 = vpop.f32.mrf.mxu1 }
 0x253   : > { %2896 = vmatpush.msrb.mxu0 %v2759_v7  ;;  %4648 = vmatpush.msrb.mxu1 %v2759_v7  ;;  %v2683_v7 = vmul.f32 %v6718_v34, %v2512_v30  ;;  %v6809_v30 = vld [vmem:[%s8231_s2 + $0x30] sm:$0xff] }
 0x254   : > { %4501 = vmatmul.msk.f32.gmra.mxu0 %vm1649_vm9, %v6654_v26  ;;  %4508 = vmatmul.msk.f32.gmra.mxu1 %vm1649_vm9, %v6516_v24 }
 0x255   : > { %4516 = vmatmul.msk.f32.gmra.mxu2 %vm1649_vm9, %v6420_v52  ;;  %2897 = vmatpush.msrb.mxu0 %v2740_v33 }
 0x256   : > { %4649 = vmatpush.msrb.mxu1 %v2740_v33  ;;  %4524 = vmatmul.msk.f32.vlgmr.msra.gmra.mxu3 %vm1649_vm9, %v6365_v5  ;;  %v2492_v33 = vmax.f32 %v1771_v57, 0.0  ;;  %v1903_v57 = vadd.f32 %v6712_v27, %v6540_v3  ;;  %v1897_v27 = vadd.f32 %v6670_v58, %v6602_v59 }
 0x257   : > { %2866 = vmatpush.msra.mxu3 %v2796_v32  ;;  %2898 = vmatpush.msrb.mxu0 %v2721_v10  ;;  %v2682_v32 = vmul.f32 %v6751_v6, %v2511_v1 }
 0x258   : > { %4650 = vmatpush.msrb.mxu1 %v2721_v10  ;;  %v6772_v21 = vpop.f32.mrf.mxu2  ;;  %v2663_v10 = vmul.f32 %v6751_v6, %v2492_v33 }
 0x259   : > { %2867 = vmatpush.msra.mxu3 %v2777_v40  ;;  %v6776_v51 = vpop.f32.mrf.mxu3  ;;  %2899 = vmatpush.msrb.mxu0 %v2702_v50  ;;  %v1908_v60 = vpop.f32.mrf.mxu0  ;;  %v1548_v40 = vperm.slane %v6705_v41, 4 }
 0x25a   : > { %4651 = vmatpush.msrb.mxu1 %v2702_v50  ;;  %v6780_v62 = vpop.f32.mrf.mxu1  ;;  %v1909_v6 = vadd.f32 %v1908_v60, %v6542_v46  ;;  %v1906_v60 = vadd.f32 %v6745_v54, %v6538_v48  ;;  %v1900_v54 = vadd.f32 %v6689_v37, %v6583_v17 }
 0x25b   : > { %2868 = vmatpush.msra.mxu3 %v2758_v9  ;;  %2900 = vmatpush.msrb.mxu0 %v2683_v7 }
 0x25c   : > { %4652 = vmatpush.msrb.mxu1 %v2683_v7  ;;  %4502 = vmatmul.msk.f32.gmra.mxu0 %vm1649_vm9, %v6683_v25  ;;  %v2590_v47 = vmax.f32 %v1909_v6, 0.0  ;;  %v2533_v37 = vmax.f32 %v1900_v54, 0.0 }
 0x25d   : > { %2869 = vmatpush.msra.mxu3 %v2739_v43  ;;  %4509 = vmatmul.msk.f32.gmra.mxu1 %vm1649_vm9, %v6547_v35  ;;  %v2647_v43 = vperm.slane %v1548_v40, 0  ;;  %v2514_v40 = vmax.f32 %v1897_v27, 0.0 }
 0x25e   : > { %4517 = vmatmul.msk.f32.gmra.mxu2 %vm1649_vm9, %v6516_v24  ;;  %2901 = vmatpush.msrb.mxu0 %v2664_v42 }
 0x25f   : > { %4653 = vmatpush.msrb.mxu1 %v2664_v42  ;;  %4525 = vmatmul.msk.f32.gmra.mxu3 %vm1649_vm9, %v6420_v52  ;;  %v2761_v1 = vmul.f32 %v2647_v43, %v2590_v47  ;;  %v2704_v47 = vmul.f32 %v2647_v43, %v2533_v37 }
 0x260   : > { %2870 = vmatpush.msra.mxu3 %v2720_v2  ;;  %v6797_v34 = vpop.f32.mrf.mxu2 }
 0x261   : > { %v6800_v39 = vpop.f32.mrf.mxu3  ;;  %v1911_v8 = vpop.f32.mrf.mxu0 }
 0x262   : > { %2871 = vmatpush.msra.mxu3 %v2701_v15  ;;  %v6802_v16 = vpop.f32.mrf.mxu1  ;;  %v1912_v0 = vadd.f32 %v1911_v8, %v6496_v56  ;;  %v2571_v15 = vmax.f32 %v1906_v60, 0.0  ;;  %v2685_v60 = vmul.f32 %v2647_v43, %v2514_v40 }
 0x264   : > { %2872 = vmatpush.msra.mxu3 %v2682_v32  ;;  %4503 = vmatmul.msk.f32.gmra.mxu0 %vm1649_vm9, %v6809_v30  ;;  %v2609_v11 = vmax.f32 %v1912_v0, 0.0  ;;  %v1894_v0 = vadd.f32 %v6620_v14, %v6609_v31  ;;  %v2742_v6 = vmul.f32 %v2647_v43, %v2571_v15 }
 0x265   : > { %4510 = vmatmul.msk.f32.gmra.mxu1 %vm1649_vm9, %v6654_v26 }
 0x266   : > { %2873 = vmatpush.msra.mxu3 %v2663_v10  ;;  %4518 = vmatmul.msk.f32.gmra.mxu2 %vm1649_vm9, %v6547_v35  ;;  %v2780_v38 = vmul.f32 %v2647_v43, %v2609_v11  ;;  %v2552_v10 = vmax.f32 %v1903_v57, 0.0  ;;  %v2495_v11 = vmax.f32 %v1894_v0, 0.0  ;;  %v1871_v57 = vadd.f32 %v6710_v61, %v6496_v56 }
 0x267   : > { %4526 = vmatmul.msk.f32.gmra.mxu3 %vm1649_vm9, %v6516_v24  ;;  %v1865_v61 = vadd.f32 %v6668_v12, %v6538_v48 }
 0x268   : > { %v6821_v44 = vpop.f32.mrf.mxu2  ;;  %v2723_v58 = vmul.f32 %v2647_v43, %v2552_v10  ;;  %v2608_v10 = vmax.f32 %v1871_v57, 0.0  ;;  %v1856_v57 = vadd.f32 %v6529_v18, %v6602_v59 }
 0x269   : > { %v6824_v50 = vpop.f32.mrf.mxu3  ;;  %v1914_v23 = vpop.f32.mrf.mxu0 }
 0x26a   : > { %v1915_v9 = vadd.f32 %v1914_v23, %v6509_v29  ;;  %v6827_v7 = vpop.f32.mrf.mxu1 }
 0x26c   : > { %v2628_v36 = vmax.f32 %v1915_v9, 0.0  ;;  %4504 = vmatmul.msk.f32.gmra.mxu0 %vm1649_vm9, %v6377_v13 }
 0x26d   : > { %4511 = vmatmul.msk.f32.gmra.mxu1 %vm1649_vm9, %v6683_v25 }
 0x26e   : > { %v2799_v42 = vmul.f32 %v2647_v43, %v2628_v36  ;;  %4519 = vmatmul.msk.f32.gmra.mxu2 %vm1649_vm9, %v6654_v26 }
 0x26f   : > { %4527 = vmatmul.msk.f32.gmra.mxu3 %vm1649_vm9, %v6547_v35 }
 0x270   : > { %v6841_v2 = vpop.f32.mrf.mxu2  ;;  %2952 = vmatpush.msra.mxu2 %v2799_v42  ;;  %v1874_v42 = vadd.f32 %v6743_v22, %v6509_v29  ;;  %v1868_v22 = vadd.f32 %v6687_v53, %v6542_v46 }
 0x271   : > { %v6845_v33 = vpop.f32.mrf.mxu3  ;;  %v6847_v8 = vpop.f32.mrf.mxu0  ;;  %v1988_v18 = vadd.f32 %v6841_v2, %v6538_v48 }
 0x272   : > { %v6849_v32 = vpop.f32.mrf.mxu1  ;;  %2953 = vmatpush.msra.mxu2 %v2780_v38  ;;  %v2666_v38 = vmul.f32 %v2647_v43, %v2495_v11  ;;  %v2627_v54 = vmax.f32 %v1874_v42, 0.0  ;;  %v2589_v40 = vmax.f32 %v1868_v22, 0.0  ;;  %v1859_v11 = vadd.f32 %v6559_v19, %v6583_v17 }
 0x274   : > { %4533 = vmatmul.msk.f32.vlgmr.msra.gmra.mxu0 %vm1649_vm9, %v6365_v5  ;;  %2954 = vmatpush.msra.mxu2 %v2761_v1  ;;  %v1547_v1 = vperm.slane %v6705_v41, 3 }
 0x275   : > { %4512 = vmatmul.msk.f32.gmra.mxu1 %vm1649_vm9, %v6809_v30 }
 0x276   : > { %4520 = vmatmul.msk.f32.gmra.mxu2 %vm1649_vm9, %v6683_v25  ;;  %v6888_v0 = vperm.slane %v1547_v1, 0 }
 0x277   : > { %4528 = vmatmul.msk.f32.gmra.mxu3 %vm1649_vm9, %v6654_v26  ;;  %2955 = vmatpush.msra.mxu2 %v2742_v6  ;;  %v1862_v6 = vadd.f32 %v6618_v49, %v6540_v3 }
 0x278   : > { %v1990_v23 = vpop.f32.mrf.mxu2  ;;  %v2798_v53 = vmul.f32 %v6888_v0, %v2627_v54  ;;  %v2779_v12 = vmul.f32 %v6888_v0, %v2608_v10  ;;  %v2532_v10 = vmax.f32 %v1859_v11, 0.0 }
 0x279   : > { %v6863_v9 = vpop.f32.mrf.mxu3  ;;  %2956 = vmatpush.msra.mxu2 %v2723_v58  ;;  %v6865_v14 = vpop.f32.mrf.mxu0  ;;  %v2570_v58 = vmax.f32 %v1865_v61, 0.0  ;;  %v1991_v1 = vadd.f32 %v1990_v23, %v6542_v46 }
 0x27a   : > { %v1955_v36 = vpop.f32.mrf.mxu1 }
 0x27b   : > { %2957 = vmatpush.msra.mxu2 %v2704_v47  ;;  %v1550_v47 = vperm.slane %v6705_v41, 6  ;;  %v2741_v61 = vmul.f32 %v6888_v0, %v2570_v58  ;;  %v1985_v58 = vadd.f32 %v6821_v44, %v6540_v3  ;;  %v2592_v11 = vmax.f32 %v1991_v1, 0.0 }
 0x27c   : > { %4534 = vmatmul.msk.f32.gmra.mxu0 %vm1649_vm9, %v6420_v52  ;;  %v1956_v2 = vadd.f32 %v1955_v36, %v6509_v29  ;;  %v1953_v36 = vadd.f32 %v6849_v32, %v6496_v56  ;;  %v1950_v32 = vadd.f32 %v6827_v7, %v6542_v46  ;;  %v6971_v7 = vld [vmem:[%s8233_s4] sm:$0xff] }
 0x27d   : > { %4513 = vmatmul.msk.f32.gmra.mxu1 %vm1649_vm9, %v6377_v13  ;;  %2958 = vmatpush.msra.mxu2 %v2685_v60  ;;  %v2551_v60 = vmax.f32 %v1862_v6, 0.0  ;;  %v1853_v6 = vadd.f32 %v6490_v55, %v6609_v31 }
 0x27e   : > { %4521 = vmatmul.msk.f32.gmra.mxu2 %vm1649_vm9, %v6809_v30 }
 0x27f   : > { %4529 = vmatmul.msk.f32.gmra.mxu3 %vm1649_vm9, %v6683_v25  ;;  %2959 = vmatpush.msra.mxu2 %v2666_v38  ;;  %v2760_v38 = vmul.f32 %v6888_v0, %v2589_v40 }
 0x280   : > { %v1993_v15 = vpop.f32.mrf.mxu2 }
 0x281   : > { %v6882_v27 = vpop.f32.mrf.mxu3  ;;  %v6884_v43 = vpop.f32.mrf.mxu0  ;;  %v1994_v49 = vadd.f32 %v1993_v15, %v6496_v56 }
 0x282   : > { %v6890_v37 = vpop.f32.mrf.mxu1 }
 0x283   : > { %v2611_v40 = vmax.f32 %v1994_v49, 0.0  ;;  %v2703_v49 = vmul.f32 %v6888_v0, %v2532_v10 }
 0x284   : > { %4535 = vmatmul.msk.f32.gmra.mxu0 %vm1649_vm9, %v6516_v24 }
 0x285   : > { %4542 = vmatmul.msk.f32.vlgmr.msra.gmra.mxu1 %vm1649_vm9, %v6365_v5 }
 0x286   : > { %4522 = vmatmul.msk.f32.gmra.mxu2 %vm1649_vm9, %v6377_v13  ;;  %2923 = vmatpush.msra.mxu1 %v2798_v53  ;;  %v6924_v53 = vperm.slane %v1550_v47, 0  ;;  %v2494_v47 = vmax.f32 %v1853_v6, 0.0  ;;  %v2629_v6 = vmax.f32 %v1956_v2, 0.0 }
 0x287   : > { %4530 = vmatmul.msk.f32.gmra.mxu3 %vm1649_vm9, %v6809_v30 }
 0x288   : > { %2924 = vmatpush.msra.mxu1 %v2779_v12  ;;  %v1996_v42 = vpop.f32.mrf.mxu2  ;;  %v2722_v12 = vmul.f32 %v6888_v0, %v2551_v60  ;;  %v1982_v60 = vadd.f32 %v6797_v34, %v6583_v17  ;;  %v2782_v44 = vmul.f32 %v6924_v53, %v2611_v40  ;;  %v1979_v34 = vadd.f32 %v6772_v21, %v6602_v59 }
 0x289   : > { %v1997_v22 = vadd.f32 %v1996_v42, %v6509_v29  ;;  %v6913_v19 = vpop.f32.mrf.mxu3  ;;  %v6915_v54 = vpop.f32.mrf.mxu0  ;;  %v2513_v42 = vmax.f32 %v1856_v57, 0.0  ;;  %v1549_v57 = vperm.slane %v6705_v41, 5  ;;  %v2763_v10 = vmul.f32 %v6924_v53, %v2592_v11 }
 0x28a   : > { %2925 = vmatpush.msra.mxu1 %v2760_v38  ;;  %v6917_v15 = vpop.f32.mrf.mxu1  ;;  %v2573_v38 = vmax.f32 %v1988_v18, 0.0  ;;  %v2665_v40 = vmul.f32 %v6888_v0, %v2494_v47  ;;  %v1976_v21 = vadd.f32 %v6739_v4, %v6609_v31  ;;  %v2516_v4 = vmax.f32 %v1979_v34, 0.0 }
 0x28b   : > { %v2630_v23 = vmax.f32 %v1997_v22, 0.0  ;;  %v2684_v1 = vmul.f32 %v6888_v0, %v2513_v42  ;;  %v2554_v22 = vmax.f32 %v1985_v58, 0.0  ;;  %v1947_v42 = vadd.f32 %v6802_v16, %v6538_v48 }
 0x28c   : > { %2926 = vmatpush.msra.mxu1 %v2741_v61  ;;  %4536 = vmatmul.msk.f32.gmra.mxu0 %vm1649_vm9, %v6547_v35  ;;  %v2610_v58 = vmax.f32 %v1953_v36, 0.0  ;;  %v2648_v11 = vperm.slane %v1549_v57, 0  ;;  %v1944_v16 = vadd.f32 %v6780_v62, %v6540_v3 }
 0x28d   : > { %v2801_v55 = vmul.f32 %v6924_v53, %v2630_v23  ;;  %4543 = vmatmul.msk.f32.gmra.mxu1 %vm1649_vm9, %v6420_v52  ;;  %v2535_v23 = vmax.f32 %v1982_v60, 0.0  ;;  %v2725_v0 = vmul.f32 %v6924_v53, %v2554_v22  ;;  %v1941_v60 = vadd.f32 %v6749_v45, %v6583_v17 }
 0x28e   : > { %4551 = vmatmul.msk.f32.vlgmr.msrb.gmra.mxu2 %vm1649_vm9, %v6365_v5  ;;  %2927 = vmatpush.msra.mxu1 %v2722_v12  ;;  %v2744_v12 = vmul.f32 %v6924_v53, %v2573_v38  ;;  %v2800_v2 = vmul.f32 %v2648_v11, %v2629_v6  ;;  %v2572_v38 = vmax.f32 %v1947_v42, 0.0  ;;  %v2781_v62 = vmul.f32 %v2648_v11, %v2610_v58 }
 0x28f   : > { %4531 = vmatmul.msk.f32.gmra.mxu3 %vm1649_vm9, %v6377_v13  ;;  %3010 = vmatpush.msra.mxu0 %v2801_v55  ;;  %v2591_v55 = vmax.f32 %v1950_v32, 0.0  ;;  %v2706_v47 = vmul.f32 %v6924_v53, %v2535_v23  ;;  %v2553_v34 = vmax.f32 %v1944_v16, 0.0  ;;  %v1935_v32 = vadd.f32 %v6691_v28, %v6609_v31 }
 0x290   : > { %2928 = vmatpush.msra.mxu1 %v2703_v49  ;;  %v6946_v5 = vpop.f32.mrf.mxu2  ;;  %v2497_v49 = vmax.f32 %v1976_v21, 0.0  ;;  %v2534_v6 = vmax.f32 %v1941_v60, 0.0 }
 0x291   : > { %v6951_v61 = vpop.f32.mrf.mxu3  ;;  %3011 = vmatpush.msra.mxu0 %v2782_v44  ;;  %v6953_v13 = vpop.f32.mrf.mxu0  ;;  %v2724_v28 = vmul.f32 %v2648_v11, %v2553_v34 }
 0x292   : > { %2929 = vmatpush.msra.mxu1 %v2684_v1  ;;  %v6958_v18 = vpop.f32.mrf.mxu1  ;;  %v1938_v1 = vadd.f32 %v6714_v20, %v6602_v59  ;;  %v2668_v45 = vmul.f32 %v6924_v53, %v2497_v49  ;;  %v7002_v20 = vld [vmem:[%s8233_s4 + $0x8] sm:$0xff] }
 0x293   : > { %3012 = vmatpush.msra.mxu0 %v2763_v10  ;;  %v2762_v10 = vmul.f32 %v2648_v11, %v2591_v55  ;;  %v7028_v55 = vld [vmem:[%s8230_s1 + $0x8] sm:$0xff] }
 0x294   : > { %2930 = vmatpush.msra.mxu1 %v2665_v40  ;;  %4537 = vmatmul.msk.f32.gmra.mxu0 %vm1649_vm9, %v6654_v26  ;;  %v2743_v40 = vmul.f32 %v2648_v11, %v2572_v38  ;;  %v2515_v21 = vmax.f32 %v1938_v1, 0.0  ;;  %v1552_v49 = vperm.slane %v7028_v55, 0 }
 0x295   : > { %4544 = vmatmul.msk.f32.gmra.mxu1 %vm1649_vm9, %v6516_v24  ;;  %3013 = vmatpush.msra.mxu0 %v2744_v12  ;;  %v2705_v12 = vmul.f32 %v2648_v11, %v2534_v6 }
 0x296   : > { %4552 = vmatmul.msk.f32.gmra.mxu2 %vm1649_vm9, %v6420_v52  ;;  %v2687_v52 = vmul.f32 %v6924_v53, %v2516_v4  ;;  %v2496_v53 = vmax.f32 %v1935_v32, 0.0 }
 0x297   : > { %4559 = vmatmul.msk.f32.vlgmr.msrb.gmra.mxu3 %vm2818_vm10, %v6971_v7  ;;  %3014 = vmatpush.msra.mxu0 %v2725_v0  ;;  %v2686_v0 = vmul.f32 %v2648_v11, %v2515_v21 }
 0x298   : > { %2981 = vmatpush.msrb.mxu3 %v2800_v2  ;;  %v6985_v44 = vpop.f32.mrf.mxu2  ;;  %v2667_v16 = vmul.f32 %v2648_v11, %v2496_v53 }
 0x299   : > { %v6987_v36 = vpop.f32.mrf.mxu3  ;;  %3015 = vmatpush.msra.mxu0 %v2706_v47  ;;  %v2072_v57 = vpop.f32.mrf.mxu0 }
 0x29a   : > { %2982 = vmatpush.msrb.mxu3 %v2781_v62  ;;  %v6992_v22 = vpop.f32.mrf.mxu1  ;;  %v2073_v38 = vadd.f32 %v2072_v57, %v6542_v46  ;;  %v2070_v57 = vadd.f32 %v6953_v13, %v6538_v48  ;;  %v2064_v13 = vadd.f32 %v6884_v43, %v6583_v17 }
 0x29b   : > { %3016 = vmatpush.msra.mxu0 %v2687_v52 }
 0x29c   : > { %2983 = vmatpush.msrb.mxu3 %v2762_v10  ;;  %4538 = vmatmul.msk.f32.gmra.mxu0 %vm1649_vm9, %v6683_v25  ;;  %v7045_v10 = vld [vmem:[%s8231_s2 + $0x38] sm:$0xff]  ;;  %v2594_v32 = vmax.f32 %v2073_v38, 0.0  ;;  %v2575_v53 = vmax.f32 %v2070_v57, 0.0  ;;  %v2537_v43 = vmax.f32 %v2064_v13, 0.0  ;;  %v2038_v13 = vadd.f32 %v6951_v61, %v6509_v29 }
 0x29d   : > { %4545 = vmatmul.msk.f32.gmra.mxu1 %vm1649_vm9, %v6547_v35  ;;  %3017 = vmatpush.msra.mxu0 %v2668_v45  ;;  %v7052_v45 = vld [vmem:[%s8233_s4 + $0x18] sm:$0x7] }
 0x29e   : > { %2984 = vmatpush.msrb.mxu3 %v2743_v40  ;;  %4553 = vmatmul.msk.f32.gmra.mxu2 %vm1649_vm9, %v6516_v24  ;;  %v7021_v24 = vld [vmem:[%s8233_s4 + $0x10] sm:$0xff]  ;;  %v2067_v40 = vadd.f32 %v6915_v54, %v6540_v3  ;;  %v2061_v54 = vadd.f32 %v6865_v14, %v6602_v59 }
 0x29f   : > { %4560 = vmatmul.msk.f32.gmra.mxu3 %vm2818_vm10, %v7002_v20 }
 0x2a0   : > { %2985 = vmatpush.msrb.mxu3 %v2724_v28  ;;  %v7010_v23 = vpop.f32.mrf.mxu2 }
 0x2a1   : > { %v7012_v42 = vpop.f32.mrf.mxu3  ;;  %v2075_v58 = vpop.f32.mrf.mxu0 }
 0x2a2   : > { %2986 = vmatpush.msrb.mxu3 %v2705_v12  ;;  %v7014_v4 = vpop.f32.mrf.mxu1  ;;  %v2076_v11 = vadd.f32 %v2075_v58, %v6496_v56 }
 0x2a3   : > { %v2111_v61 = vadd.f32 %v7014_v4, %v6538_v48  ;;  %v2029_v4 = vadd.f32 %v6863_v9, %v6538_v48 }
 0x2a4   : > { %2987 = vmatpush.msrb.mxu3 %v2686_v0  ;;  %4539 = vmatmul.msk.f32.gmra.mxu0 %vm1649_vm9, %v6809_v30  ;;  %v2613_v1 = vmax.f32 %v2076_v11, 0.0  ;;  %v2058_v11 = vadd.f32 %v6847_v8, %v6609_v31 }
 0x2a5   : > { %4546 = vmatmul.msk.f32.gmra.mxu1 %vm1649_vm9, %v6654_v26 }
 0x2a6   : > { %2988 = vmatpush.msrb.mxu3 %v2667_v16  ;;  %4554 = vmatmul.msk.f32.gmra.mxu2 %vm1649_vm9, %v6547_v35  ;;  %v2651_v35 = vperm.slane %v1552_v49, 0  ;;  %v2556_v16 = vmax.f32 %v2067_v40, 0.0 }
 0x2a7   : > { %4561 = vmatmul.msk.f32.gmra.mxu3 %vm2818_vm10, %v7021_v24 }
 0x2a8   : > { %v7035_v2 = vpop.f32.mrf.mxu2  ;;  %v2784_v28 = vmul.f32 %v2651_v35, %v2613_v1  ;;  %v2746_v49 = vmul.f32 %v2651_v35, %v2575_v53  ;;  %v2727_v14 = vmul.f32 %v2651_v35, %v2556_v16  ;;  %v1551_v16 = vperm.slane %v6705_v41, 7 }
 0x2a9   : > { %v7038_v47 = vpop.f32.mrf.mxu3  ;;  %v2078_v60 = vpop.f32.mrf.mxu0  ;;  %v2108_v41 = vadd.f32 %v6992_v22, %v6540_v3  ;;  %v2026_v22 = vadd.f32 %v6845_v33, %v6540_v3  ;;  %v2099_v33 = vadd.f32 %v6890_v37, %v6609_v31 }
 0x2aa   : > { %v2079_v62 = vadd.f32 %v2078_v60, %v6509_v29  ;;  %v2113_v52 = vpop.f32.mrf.mxu1  ;;  %v2518_v60 = vmax.f32 %v2061_v54, 0.0 }
 0x2ab   : > { %v2555_v37 = vmax.f32 %v2026_v22, 0.0 }
 0x2ac   : > { %v2632_v34 = vmax.f32 %v2079_v62, 0.0  ;;  %4540 = vmatmul.msk.f32.gmra.mxu0 %vm1649_vm9, %v7045_v10  ;;  %v2499_v62 = vmax.f32 %v2058_v11, 0.0 }
 0x2ad   : > { %4547 = vmatmul.msk.f32.gmra.mxu1 %vm1649_vm9, %v6683_v25 }
 0x2ae   : > { %v2803_v6 = vmul.f32 %v2651_v35, %v2632_v34  ;;  %4555 = vmatmul.msk.f32.gmra.mxu2 %vm1649_vm9, %v6654_v26  ;;  %v2765_v26 = vmul.f32 %v2651_v35, %v2594_v32  ;;  %v1553_v34 = vperm.slane %v7028_v55, 1  ;;  %v2708_v32 = vmul.f32 %v2651_v35, %v2537_v43 }
 0x2af   : > { %4562 = vmatmul.msk.f32.gmra.mxu3 %vm2818_vm10, %v7052_v45  ;;  %v2670_v54 = vmul.f32 %v2651_v35, %v2499_v62 }
 0x2b0   : > { %v7064_v21 = vpop.f32.mrf.mxu2  ;;  %3068 = vmatpush.msrb.mxu2 %v2803_v6  ;;  %v2114_v6 = vadd.f32 %v2113_v52, %v6542_v46  ;;  %v2035_v52 = vadd.f32 %v6913_v19, %v6496_v56 }
 0x2b1   : > { %v7068_v12 = vpop.f32.mrf.mxu3  ;;  %v7070_v58 = vpop.f32.mrf.mxu0 }
 0x2b2   : > { %v2116_v0 = vpop.f32.mrf.mxu1  ;;  %3069 = vmatpush.msrb.mxu2 %v2784_v28  ;;  %v2689_v28 = vmul.f32 %v2651_v35, %v2518_v60  ;;  %v2595_v11 = vmax.f32 %v2114_v6, 0.0  ;;  %v2032_v35 = vadd.f32 %v6882_v27, %v6542_v46  ;;  %v2612_v62 = vmax.f32 %v2035_v52, 0.0 }
 0x2b3   : > { %v2117_v1 = vadd.f32 %v2116_v0, %v6496_v56  ;;  %v2105_v27 = vadd.f32 %v6958_v18, %v6583_v17  ;;  %v2102_v6 = vadd.f32 %v6917_v15, %v6602_v59  ;;  %v2023_v18 = vadd.f32 %v6824_v50, %v6583_v17 }
 0x2b4   : > { %4567 = vmatmul.msk.f32.vlgmr.msrb.gmra.mxu0 %vm2818_vm10, %v6971_v7  ;;  %3070 = vmatpush.msrb.mxu2 %v2765_v26  ;;  %v7098_v26 = vperm.slane %v1553_v34, 0  ;;  %v2576_v34 = vmax.f32 %v2111_v61, 0.0  ;;  %v2020_v50 = vadd.f32 %v6800_v39, %v6602_v59  ;;  %v1554_v52 = vperm.slane %v7028_v55, 2 }
 0x2b5   : > { %4548 = vmatmul.msk.f32.gmra.mxu1 %vm1649_vm9, %v6809_v30  ;;  %v2614_v53 = vmax.f32 %v2117_v1, 0.0  ;;  %v7123_v1 = vperm.slane %v1551_v16, 0  ;;  %v2519_v16 = vmax.f32 %v2102_v6, 0.0 }
 0x2b6   : > { %4556 = vmatmul.msk.f32.gmra.mxu2 %vm1649_vm9, %v6683_v25  ;;  %v2766_v9 = vmul.f32 %v7098_v26, %v2595_v11  ;;  %v7168_v22 = vperm.slane %v1554_v52, 0 }
 0x2b7   : > { %4563 = vmatmul.msk.f32.vlgmr.msra.gmra.mxu3 %vm2818_vm10, %v6971_v7  ;;  %3071 = vmatpush.msrb.mxu2 %v2746_v49  ;;  %v2631_v49 = vmax.f32 %v2038_v13, 0.0  ;;  %v2574_v13 = vmax.f32 %v2029_v4, 0.0  ;;  %v2783_v15 = vmul.f32 %v7123_v1, %v2612_v62  ;;  %v2500_v4 = vmax.f32 %v2099_v33, 0.0 }
 0x2b8   : > { %v7084_v38 = vpop.f32.mrf.mxu2  ;;  %v2690_v6 = vmul.f32 %v7098_v26, %v2519_v16 }
 0x2b9   : > { %v7087_v8 = vpop.f32.mrf.mxu3  ;;  %3072 = vmatpush.msrb.mxu2 %v2727_v14  ;;  %v7090_v57 = vpop.f32.mrf.mxu0  ;;  %v2785_v14 = vmul.f32 %v7098_v26, %v2614_v53  ;;  %v2538_v53 = vmax.f32 %v2105_v27, 0.0  ;;  %v2155_v39 = vadd.f32 %v7084_v38, %v6542_v46  ;;  %v2745_v62 = vmul.f32 %v7123_v1, %v2574_v13 }
 0x2ba   : > { %v2119_v25 = vpop.f32.mrf.mxu1  ;;  %v2671_v33 = vmul.f32 %v7098_v26, %v2500_v4 }
 0x2bb   : > { %v2120_v40 = vadd.f32 %v2119_v25, %v6509_v29  ;;  %3073 = vmatpush.msrb.mxu2 %v2708_v32  ;;  %v2593_v25 = vmax.f32 %v2032_v35, 0.0  ;;  %v2709_v27 = vmul.f32 %v7098_v26, %v2538_v53  ;;  %v2146_v53 = vadd.f32 %v7010_v23, %v6583_v17 }
 0x2bc   : > { %4568 = vmatmul.msk.f32.gmra.mxu0 %vm2818_vm10, %v7002_v20  ;;  %v2143_v23 = vadd.f32 %v6985_v44, %v6602_v59 }
 0x2bd   : > { %v2633_v0 = vmax.f32 %v2120_v40, 0.0  ;;  %4549 = vmatmul.msk.f32.gmra.mxu1 %vm1649_vm9, %v7045_v10  ;;  %3074 = vmatpush.msrb.mxu2 %v2689_v28  ;;  %v2802_v40 = vmul.f32 %v7123_v1, %v2631_v49  ;;  %v2557_v28 = vmax.f32 %v2108_v41, 0.0  ;;  %v2764_v61 = vmul.f32 %v7123_v1, %v2593_v25 }
 0x2be   : > { %4557 = vmatmul.msk.f32.gmra.mxu2 %vm1649_vm9, %v6809_v30  ;;  %v2726_v25 = vmul.f32 %v7123_v1, %v2555_v37 }
 0x2bf   : > { %v2804_v43 = vmul.f32 %v7098_v26, %v2633_v0  ;;  %4564 = vmatmul.msk.f32.gmra.mxu3 %vm2818_vm10, %v7002_v20  ;;  %3075 = vmatpush.msrb.mxu2 %v2670_v54  ;;  %v2747_v0 = vmul.f32 %v7098_v26, %v2576_v34  ;;  %v2728_v11 = vmul.f32 %v7098_v26, %v2557_v28  ;;  %v2596_v28 = vmax.f32 %v2155_v39, 0.0 }
 0x2c0   : > { %v2157_v19 = vpop.f32.mrf.mxu2  ;;  %v2140_v39 = vadd.f32 %v6946_v5, %v6609_v31  ;;  %v2190_v5 = vadd.f32 %v7068_v12, %v6540_v3 }
 0x2c1   : > { %v7118_v60 = vpop.f32.mrf.mxu3  ;;  %3097 = vmatpush.msra.mxu3 %v2804_v43  ;;  %v7120_v30 = vpop.f32.mrf.mxu0  ;;  %v2158_v54 = vadd.f32 %v2157_v19, %v6496_v56  ;;  %v2017_v43 = vadd.f32 %v6776_v51, %v6609_v31  ;;  %v2536_v19 = vmax.f32 %v2023_v18, 0.0  ;;  %v2152_v51 = vadd.f32 %v7064_v21, %v6538_v48 }
 0x2c2   : > { %v7127_v32 = vpop.f32.mrf.mxu1 }
 0x2c3   : > { %3098 = vmatpush.msra.mxu3 %v2785_v14  ;;  %v2615_v34 = vmax.f32 %v2158_v54, 0.0  ;;  %v2498_v21 = vmax.f32 %v2017_v43, 0.0  ;;  %v2707_v13 = vmul.f32 %v7123_v1, %v2536_v19  ;;  %v1555_v54 = vperm.slane %v7028_v55, 3 }
 0x2c4   : > { %4583 = vmatmul.msk.f32.vlgmr.msra.gmra.mxu0 %vm2818_vm10, %v6971_v7  ;;  %v2193_v19 = vadd.f32 %v7087_v8, %v6538_v48  ;;  %v2501_v8 = vmax.f32 %v2140_v39, 0.0 }
 0x2c5   : > { %4569 = vmatmul.msk.f32.vlgmr.msrb.gmra.mxu1 %vm2818_vm10, %v7021_v24  ;;  %3099 = vmatpush.msra.mxu3 %v2766_v9  ;;  %v2517_v9 = vmax.f32 %v2020_v50, 0.0  ;;  %v2669_v44 = vmul.f32 %v7123_v1, %v2498_v21  ;;  %v2184_v21 = vadd.f32 %v7012_v42, %v6602_v59 }
 0x2c6   : > { %4558 = vmatmul.msk.f32.gmra.mxu2 %vm1649_vm9, %v7045_v10  ;;  %3039 = vmatpush.msrb.mxu1 %v2802_v40  ;;  %v2149_v40 = vadd.f32 %v7035_v2, %v6540_v3  ;;  %v2577_v2 = vmax.f32 %v2152_v51, 0.0 }
 0x2c7   : > { %4565 = vmatmul.msk.f32.gmra.mxu3 %vm2818_vm10, %v7021_v24  ;;  %v2688_v26 = vmul.f32 %v7123_v1, %v2517_v9  ;;  %v2187_v9 = vadd.f32 %v7038_v47, %v6583_v17 }
 0x2c8   : > { %3040 = vmatpush.msrb.mxu1 %v2783_v15  ;;  %3100 = vmatpush.msra.mxu3 %v2747_v0  ;;  %v2160_v10 = vpop.f32.mrf.mxu2  ;;  %v2786_v15 = vmul.f32 %v7168_v22, %v2615_v34  ;;  %v2558_v52 = vmax.f32 %v2149_v40, 0.0 }
 0x2c9   : > { %v2161_v35 = vadd.f32 %v2160_v10, %v6509_v29  ;;  %v2198_v49 = vpop.f32.mrf.mxu3  ;;  %v7160_v41 = vpop.f32.mrf.mxu0  ;;  %v2767_v10 = vmul.f32 %v7168_v22, %v2596_v28 }
 0x2ca   : > { %3041 = vmatpush.msrb.mxu1 %v2764_v61  ;;  %3101 = vmatpush.msra.mxu3 %v2728_v11  ;;  %v7162_v14 = vpop.f32.mrf.mxu1  ;;  %v2199_v0 = vadd.f32 %v2198_v49, %v6496_v56  ;;  %v2196_v61 = vadd.f32 %v7118_v60, %v6542_v46  ;;  %v2748_v49 = vmul.f32 %v7168_v22, %v2577_v2  ;;  %v2654_v60 = vperm.slane %v1555_v54, 0 }
 0x2cb   : > { %v2634_v38 = vmax.f32 %v2161_v35, 0.0  ;;  %v2539_v35 = vmax.f32 %v2146_v53, 0.0  ;;  %v2729_v1 = vmul.f32 %v7168_v22, %v2558_v52  ;;  %v2672_v53 = vmul.f32 %v7168_v22, %v2501_v8 }
 0x2cc   : > { %3042 = vmatpush.msrb.mxu1 %v2745_v62  ;;  %3102 = vmatpush.msra.mxu3 %v2709_v27  ;;  %v2616_v4 = vmax.f32 %v2199_v0, 0.0  ;;  %v2520_v27 = vmax.f32 %v2143_v23, 0.0  ;;  %v2597_v51 = vmax.f32 %v2196_v61, 0.0  ;;  %v2181_v2 = vadd.f32 %v6987_v36, %v6609_v31 }
 0x2cd   : > { %v2805_v18 = vmul.f32 %v7168_v22, %v2634_v38  ;;  %4570 = vmatmul.msk.f32.gmra.mxu1 %vm2818_vm10, %v7052_v45  ;;  %4584 = vmatmul.msk.f32.gmra.mxu0 %vm2818_vm10, %v7002_v20  ;;  %v2710_v38 = vmul.f32 %v7168_v22, %v2539_v35  ;;  %v2521_v54 = vmax.f32 %v2184_v21, 0.0 }
 0x2ce   : > { %3043 = vmatpush.msrb.mxu1 %v2726_v25  ;;  %3103 = vmatpush.msra.mxu3 %v2690_v6  ;;  %v2578_v25 = vmax.f32 %v2193_v19, 0.0  ;;  %v2787_v12 = vmul.f32 %v2654_v60, %v2616_v4  ;;  %v2768_v47 = vmul.f32 %v2654_v60, %v2597_v51  ;;  %v2231_v51 = vadd.f32 %v7160_v41, %v6540_v3 }
 0x2cf   : > { %4566 = vmatmul.msk.f32.gmra.mxu3 %vm2818_vm10, %v7052_v45  ;;  %3126 = vmatpush.msrb.mxu0 %v2805_v18  ;;  %v2691_v18 = vmul.f32 %v7168_v22, %v2520_v27  ;;  %v2502_v22 = vmax.f32 %v2181_v2, 0.0  ;;  %v2225_v41 = vadd.f32 %v7090_v57, %v6602_v59 }
 0x2d0   : > { %3044 = vmatpush.msrb.mxu1 %v2707_v13  ;;  %3104 = vmatpush.msra.mxu3 %v2671_v33  ;;  %v7187_v50 = vpop.f32.mrf.mxu2  ;;  %v2559_v13 = vmax.f32 %v2190_v5, 0.0  ;;  %v2749_v0 = vmul.f32 %v2654_v60, %v2578_v25 }
 0x2d1   : > { %v2201_v37 = vpop.f32.mrf.mxu3  ;;  %3127 = vmatpush.msrb.mxu0 %v2786_v15  ;;  %v7193_v16 = vpop.f32.mrf.mxu0  ;;  %4575 = vmatmul.msk.f32.vlgmr.msra.gmra.mxu2 %vm2818_vm10, %v6971_v7  ;;  %v2540_v15 = vmax.f32 %v2187_v9, 0.0  ;;  %v2673_v61 = vmul.f32 %v2654_v60, %v2502_v22  ;;  %v2522_v2 = vmax.f32 %v2225_v41, 0.0 }
 0x2d2   : > { %v2202_v11 = vadd.f32 %v2201_v37, %v6509_v29  ;;  %3045 = vmatpush.msrb.mxu1 %v2688_v26  ;;  %v7201_v43 = vpop.f32.mrf.mxu1  ;;  %v2730_v42 = vmul.f32 %v2654_v60, %v2559_v13 }
 0x2d3   : > { %3128 = vmatpush.msrb.mxu0 %v2767_v10  ;;  %v2711_v26 = vmul.f32 %v2654_v60, %v2540_v15  ;;  %v2692_v10 = vmul.f32 %v2654_v60, %v2521_v54 }
 0x2d4   : > { %v2635_v62 = vmax.f32 %v2202_v11, 0.0  ;;  %3046 = vmatpush.msrb.mxu1 %v2669_v44  ;;  %v1556_v44 = vperm.slane %v7028_v55, 4 }
 0x2d5   : > { %4571 = vmatmul.msk.f32.vlgmr.msra.gmra.mxu1 %vm2818_vm10, %v6971_v7  ;;  %3129 = vmatpush.msrb.mxu0 %v2748_v49 }
 0x2d6   : > { %v2806_v34 = vmul.f32 %v2654_v60, %v2635_v62  ;;  %4585 = vmatmul.msk.f32.gmra.mxu0 %vm2818_vm10, %v7021_v24  ;;  %v2234_v60 = vadd.f32 %v7193_v16, %v6538_v48  ;;  %v2655_v5 = vperm.slane %v1556_v44, 0  ;;  %v2228_v16 = vadd.f32 %v7120_v30, %v6583_v17 }
 0x2d7   : > { %4579 = vmatmul.msk.f32.vlgmr.msrb.gmra.mxu3 %vm2818_vm10, %v6971_v7  ;;  %3130 = vmatpush.msrb.mxu0 %v2729_v1  ;;  %v2222_v30 = vadd.f32 %v7070_v58, %v6609_v31 }
 0x2d8   : > { %v7221_v6 = vpop.f32.mrf.mxu2  ;;  %3155 = vmatpush.msra.mxu1 %v2806_v34 }
 0x2d9   : > { %v7223_v40 = vpop.f32.mrf.mxu3  ;;  %3131 = vmatpush.msrb.mxu0 %v2710_v38  ;;  %v2236_v28 = vpop.f32.mrf.mxu0  ;;  %4576 = vmatmul.msk.f32.gmra.mxu2 %vm2818_vm10, %v7002_v20  ;;  %v2579_v38 = vmax.f32 %v2234_v60, 0.0  ;;  %v2503_v57 = vmax.f32 %v2222_v30, 0.0 }
 0x2da   : > { %v7230_v33 = vpop.f32.mrf.mxu1  ;;  %3156 = vmatpush.msra.mxu1 %v2787_v12  ;;  %v2237_v49 = vadd.f32 %v2236_v28, %v6542_v46  ;;  %v2560_v28 = vmax.f32 %v2231_v51, 0.0 }
 0x2db   : > { %3132 = vmatpush.msrb.mxu0 %v2691_v18  ;;  %v2674_v44 = vmul.f32 %v2655_v5, %v2503_v57 }
 0x2dc   : > { %3157 = vmatpush.msra.mxu1 %v2768_v47  ;;  %v2598_v34 = vmax.f32 %v2237_v49, 0.0  ;;  %v2541_v47 = vmax.f32 %v2228_v16, 0.0  ;;  %v2731_v15 = vmul.f32 %v2655_v5, %v2560_v28 }
 0x2dd   : > { %3133 = vmatpush.msrb.mxu0 %v2672_v53  ;;  %4572 = vmatmul.msk.f32.gmra.mxu1 %vm2818_vm10, %v7002_v20  ;;  %v2750_v53 = vmul.f32 %v2655_v5, %v2579_v38 }
 0x2de   : > { %3158 = vmatpush.msra.mxu1 %v2749_v0  ;;  %4586 = vmatmul.msk.f32.gmra.mxu0 %vm2818_vm10, %v7052_v45  ;;  %v2769_v13 = vmul.f32 %v2655_v5, %v2598_v34  ;;  %v2712_v0 = vmul.f32 %v2655_v5, %v2541_v47 }
 0x2df   : > { %4580 = vmatmul.msk.f32.gmra.mxu3 %vm2818_vm10, %v7002_v20 }
 0x2e0   : > { %3159 = vmatpush.msra.mxu1 %v2730_v42  ;;  %v1557_v42 = vperm.slane %v7028_v55, 5 }
 0x2e1   : > { %v7241_v36 = vpop.f32.mrf.mxu2  ;;  %v2239_v23 = vpop.f32.mrf.mxu0  ;;  %4577 = vmatmul.msk.f32.gmra.mxu2 %vm2818_vm10, %v7021_v24 }
 0x2e2   : > { %v7245_v52 = vpop.f32.mrf.mxu3  ;;  %v7247_v37 = vpop.f32.mrf.mxu1  ;;  %3160 = vmatpush.msra.mxu1 %v2711_v26  ;;  %v2240_v11 = vadd.f32 %v2239_v23, %v6496_v56  ;;  %v2656_v60 = vperm.slane %v1557_v42, 0 }
 0x2e4   : > { %3161 = vmatpush.msra.mxu1 %v2692_v10  ;;  %v2617_v27 = vmax.f32 %v2240_v11, 0.0  ;;  %v2693_v10 = vmul.f32 %v2655_v5, %v2522_v2 }
 0x2e5   : > { %4573 = vmatmul.msk.f32.gmra.mxu1 %vm2818_vm10, %v7021_v24 }
 0x2e6   : > { %3162 = vmatpush.msra.mxu1 %v2673_v61  ;;  %4599 = vmatmul.msk.f32.vlgmr.msrb.gmra.mxu0 %vm2818_vm10, %v6971_v7  ;;  %v2788_v9 = vmul.f32 %v2655_v5, %v2617_v27 }
 0x2e7   : > { %4581 = vmatmul.msk.f32.gmra.mxu3 %vm2818_vm10, %v7021_v24 }
 0x2e9   : > { %v7257_v39 = vpop.f32.mrf.mxu2  ;;  %v2242_v35 = vpop.f32.mrf.mxu0  ;;  %4578 = vmatmul.msk.f32.gmra.mxu2 %vm2818_vm10, %v7052_v45 }
 0x2ea   : > { %v7262_v19 = vpop.f32.mrf.mxu3  ;;  %v2243_v4 = vadd.f32 %v2242_v35, %v6509_v29  ;;  %v2277_v62 = vpop.f32.mrf.mxu1  ;;  %v2275_v35 = vadd.f32 %v7247_v37, %v6538_v48  ;;  %v2269_v37 = vadd.f32 %v7201_v43, %v6583_v17  ;;  %v2263_v43 = vadd.f32 %v7127_v32, %v6609_v31 }
 0x2eb   : > { %v2278_v61 = vadd.f32 %v2277_v62, %v6542_v46  ;;  %v2272_v62 = vadd.f32 %v7230_v33, %v6540_v3  ;;  %v2266_v33 = vadd.f32 %v7162_v14, %v6602_v59 }
 0x2ec   : > { %v2636_v1 = vmax.f32 %v2243_v4, 0.0  ;;  %v2542_v28 = vmax.f32 %v2269_v37, 0.0  ;;  %v2504_v14 = vmax.f32 %v2263_v43, 0.0  ;;  %v1559_v37 = vperm.slane %v7028_v55, 7 }
 0x2ed   : > { %4574 = vmatmul.msk.f32.gmra.mxu1 %vm2818_vm10, %v7052_v45  ;;  %v2599_v27 = vmax.f32 %v2278_v61, 0.0 }
 0x2ee   : > { %v2807_v8 = vmul.f32 %v2655_v5, %v2636_v1  ;;  %4600 = vmatmul.msk.f32.gmra.mxu0 %vm2818_vm10, %v7002_v20  ;;  %v2580_v5 = vmax.f32 %v2275_v35, 0.0  ;;  %v2675_v35 = vmul.f32 %v2656_v60, %v2504_v14 }
 0x2ef   : > { %4582 = vmatmul.msk.f32.gmra.mxu3 %vm2818_vm10, %v7052_v45  ;;  %v2770_v41 = vmul.f32 %v2656_v60, %v2599_v27 }
 0x2f0   : > { %3184 = vmatpush.msra.mxu2 %v2807_v8 }
 0x2f1   : > { %v7277_v25 = vpop.f32.mrf.mxu2  ;;  %v7279_v12 = vpop.f32.mrf.mxu0  ;;  %4591 = vmatmul.msk.f32.vlgmr.msrb.gmra.mxu2 %vm2818_vm10, %v6971_v7 }
 0x2f2   : > { %v7285_v18 = vpop.f32.mrf.mxu3  ;;  %v2280_v21 = vpop.f32.mrf.mxu1  ;;  %3185 = vmatpush.msra.mxu2 %v2788_v9  ;;  %v2561_v9 = vmax.f32 %v2272_v62, 0.0  ;;  %v2310_v62 = vadd.f32 %v7241_v36, %v6583_v17  ;;  %v2307_v36 = vadd.f32 %v7221_v6, %v6602_v59 }
 0x2f3   : > { %v2281_v58 = vadd.f32 %v2280_v21, %v6496_v56  ;;  %v2751_v21 = vmul.f32 %v2656_v60, %v2580_v5 }
 0x2f4   : > { %3186 = vmatpush.msra.mxu2 %v2769_v13  ;;  %v2523_v13 = vmax.f32 %v2266_v33, 0.0  ;;  %v2732_v30 = vmul.f32 %v2656_v60, %v2561_v9  ;;  %v2543_v43 = vmax.f32 %v2310_v62, 0.0 }
 0x2f5   : > { %4587 = vmatmul.msk.f32.vlgmr.msrb.gmra.mxu1 %vm2818_vm10, %v6971_v7  ;;  %v2618_v49 = vmax.f32 %v2281_v58, 0.0 }
 0x2f6   : > { %3187 = vmatpush.msra.mxu2 %v2750_v53  ;;  %4601 = vmatmul.msk.f32.gmra.mxu0 %vm2818_vm10, %v7021_v24  ;;  %v1558_v53 = vperm.slane %v7028_v55, 6  ;;  %v2304_v55 = vadd.f32 %v7187_v50, %v6609_v31 }
 0x2f7   : > { %4595 = vmatmul.msk.f32.vlgmr.msra.gmra.mxu3 %vm2818_vm10, %v6971_v7  ;;  %v2789_v8 = vmul.f32 %v2656_v60, %v2618_v49 }
 0x2f8   : > { %3188 = vmatpush.msra.mxu2 %v2731_v15  ;;  %v2713_v15 = vmul.f32 %v2656_v60, %v2542_v28 }
 0x2f9   : > { %v2318_v54 = vpop.f32.mrf.mxu2  ;;  %v7297_v22 = vpop.f32.mrf.mxu0  ;;  %4592 = vmatmul.msk.f32.gmra.mxu2 %vm2818_vm10, %v7002_v20 }
 0x2fa   : > { %v7301_v26 = vpop.f32.mrf.mxu3  ;;  %v2283_v23 = vpop.f32.mrf.mxu1  ;;  %3189 = vmatpush.msra.mxu2 %v2712_v0  ;;  %v2319_v57 = vadd.f32 %v2318_v54, %v6542_v46  ;;  %v2313_v54 = vadd.f32 %v7257_v39, %v6540_v3 }
 0x2fb   : > { %v2284_v11 = vadd.f32 %v2283_v23, %v6509_v29  ;;  %v2694_v23 = vmul.f32 %v2656_v60, %v2523_v13 }
 0x2fc   : > { %3190 = vmatpush.msra.mxu2 %v2693_v10  ;;  %v2316_v10 = vadd.f32 %v7277_v25, %v6538_v48  ;;  %v2600_v49 = vmax.f32 %v2319_v57, 0.0  ;;  %v2562_v39 = vmax.f32 %v2313_v54, 0.0 }
 0x2fd   : > { %v2637_v4 = vmax.f32 %v2284_v11, 0.0  ;;  %4588 = vmatmul.msk.f32.gmra.mxu1 %vm2818_vm10, %v7002_v20 }
 0x2fe   : > { %3191 = vmatpush.msra.mxu2 %v2674_v44  ;;  %4602 = vmatmul.msk.f32.gmra.mxu0 %vm2818_vm10, %v7052_v45  ;;  %v2657_v44 = vperm.slane %v1558_v53, 0  ;;  %v2581_v27 = vmax.f32 %v2316_v10, 0.0  ;;  %v2354_v53 = vadd.f32 %v7285_v18, %v6540_v3 }
 0x2ff   : > { %v2808_v1 = vmul.f32 %v2656_v60, %v2637_v4  ;;  %4596 = vmatmul.msk.f32.gmra.mxu3 %vm2818_vm10, %v7002_v20 }
 0x300   : > { %v2771_v33 = vmul.f32 %v2657_v44, %v2600_v49  ;;  %v2752_v28 = vmul.f32 %v2657_v44, %v2581_v27 }
 0x301   : > { %v2321_v51 = vpop.f32.mrf.mxu2  ;;  %3213 = vmatpush.msrb.mxu3 %v2808_v1  ;;  %v7317_v34 = vpop.f32.mrf.mxu0  ;;  %4593 = vmatmul.msk.f32.gmra.mxu2 %vm2818_vm10, %v7021_v24 }
 0x302   : > { %v2359_v16 = vpop.f32.mrf.mxu3  ;;  %v7321_v38 = vpop.f32.mrf.mxu1  ;;  %v2322_v47 = vadd.f32 %v2321_v51, %v6496_v56 }
 0x303   : > { %3214 = vmatpush.msrb.mxu3 %v2789_v8  ;;  %v2360_v9 = vadd.f32 %v2359_v16, %v6542_v46  ;;  %v2733_v16 = vmul.f32 %v2657_v44, %v2562_v39 }
 0x304   : > { %v2619_v61 = vmax.f32 %v2322_v47, 0.0  ;;  %v2524_v47 = vmax.f32 %v2307_v36, 0.0 }
 0x305   : > { %3215 = vmatpush.msrb.mxu3 %v2770_v41  ;;  %4589 = vmatmul.msk.f32.gmra.mxu1 %vm2818_vm10, %v7021_v24  ;;  %v2601_v14 = vmax.f32 %v2360_v9, 0.0  ;;  %v1540_v9 = vld [vmem:[%s8230_s1 + $0x10] sm:$0x7] }
 0x306   : > { %v2790_v25 = vmul.f32 %v2657_v44, %v2619_v61  ;;  %v2695_v61 = vmul.f32 %v2657_v44, %v2524_v47 }
 0x307   : > { %3216 = vmatpush.msrb.mxu3 %v2751_v21  ;;  %v2357_v21 = vadd.f32 %v7301_v26, %v6538_v48  ;;  %v2351_v26 = vadd.f32 %v7262_v19, %v6583_v17 }
 0x308   : > { %4597 = vmatmul.msk.f32.gmra.mxu3 %vm2818_vm10, %v7021_v24 }
 0x309   : > { %v2324_v2 = vpop.f32.mrf.mxu2  ;;  %3217 = vmatpush.msrb.mxu3 %v2732_v30  ;;  %v7333_v32 = vpop.f32.mrf.mxu0  ;;  %4594 = vmatmul.msk.f32.gmra.mxu2 %vm2818_vm10, %v7052_v45  ;;  %v2658_v30 = vperm.slane %v1559_v37, 0  ;;  %v2582_v57 = vmax.f32 %v2357_v21, 0.0  ;;  %v2544_v62 = vmax.f32 %v2351_v26, 0.0 }
 0x30a   : > { %v2325_v0 = vadd.f32 %v2324_v2, %v6509_v29  ;;  %v2362_v58 = vpop.f32.mrf.mxu3  ;;  %v7339_v42 = vpop.f32.mrf.mxu1  ;;  %v2505_v2 = vmax.f32 %v2304_v55, 0.0 }
 0x30b   : > { %3218 = vmatpush.msrb.mxu3 %v2713_v15  ;;  %v2363_v60 = vadd.f32 %v2362_v58, %v6496_v56  ;;  %v2714_v15 = vmul.f32 %v2657_v44, %v2543_v43  ;;  %v2772_v54 = vmul.f32 %v2658_v30, %v2601_v14  ;;  %v2753_v27 = vmul.f32 %v2658_v30, %v2582_v57 }
 0x30c   : > { %v2638_v11 = vmax.f32 %v2325_v0, 0.0  ;;  %v2676_v49 = vmul.f32 %v2657_v44, %v2505_v2  ;;  %v2715_v37 = vmul.f32 %v2658_v30, %v2544_v62  ;;  %v1560_v43 = vperm.slane %v1540_v9, 0 }
 0x30d   : > { %3219 = vmatpush.msrb.mxu3 %v2694_v23  ;;  %4590 = vmatmul.msk.f32.gmra.mxu1 %vm2818_vm10, %v7052_v45  ;;  %v2620_v6 = vmax.f32 %v2363_v60, 0.0  ;;  %v2395_v2 = vadd.f32 %v7333_v32, %v6540_v3  ;;  %v2392_v57 = vadd.f32 %v7317_v34, %v6583_v17  ;;  %v2386_v34 = vadd.f32 %v7279_v12, %v6609_v31 }
 0x30e   : > { %v2809_v4 = vmul.f32 %v2657_v44, %v2638_v11  ;;  %v2348_v11 = vadd.f32 %v7245_v52, %v6602_v59 }
 0x30f   : > { %3220 = vmatpush.msrb.mxu3 %v2675_v35  ;;  %v2791_v23 = vmul.f32 %v2658_v30, %v2620_v6  ;;  %v2563_v35 = vmax.f32 %v2354_v53, 0.0  ;;  %v2659_v53 = vperm.slane %v1560_v43, 0  ;;  %v2507_v12 = vmax.f32 %v2386_v34, 0.0  ;;  %v7465_v43 = vld [vmem:[%s8233_s4 + $0x8] sm:$0xff] }
 0x310   : > { %3242 = vmatpush.msra.mxu0 %v2809_v4  ;;  %4598 = vmatmul.msk.f32.gmra.mxu3 %vm2818_vm10, %v7052_v45  ;;  %v2345_v4 = vadd.f32 %v7223_v40, %v6609_v31  ;;  %v2525_v52 = vmax.f32 %v2348_v11, 0.0  ;;  %v2564_v11 = vmax.f32 %v2395_v2, 0.0 }
 0x311   : > { %v7352_v1 = vpop.f32.mrf.mxu2  ;;  %v7355_v5 = vpop.f32.mrf.mxu0  ;;  %4607 = vmatmul.msk.f32.vlgmr.msra.gmra.mxu2 %vm2818_vm10, %v6971_v7  ;;  %v2678_v9 = vmul.f32 %v2659_v53, %v2507_v12 }
 0x312   : > { %v2365_v51 = vpop.f32.mrf.mxu3  ;;  %3243 = vmatpush.msra.mxu0 %v2790_v25  ;;  %v7361_v8 = vpop.f32.mrf.mxu1  ;;  %v2734_v25 = vmul.f32 %v2658_v30, %v2563_v35  ;;  %v2506_v44 = vmax.f32 %v2345_v4, 0.0 }
 0x313   : > { %v2366_v41 = vadd.f32 %v2365_v51, %v6509_v29 }
 0x314   : > { %3244 = vmatpush.msra.mxu0 %v2771_v33 }
 0x315   : > { %v2639_v13 = vmax.f32 %v2366_v41, 0.0  ;;  %4603 = vmatmul.msk.f32.vlgmr.msra.gmra.mxu1 %vm2818_vm10, %v6971_v7  ;;  %v2677_v41 = vmul.f32 %v2658_v30, %v2506_v44 }
 0x316   : > { %3245 = vmatpush.msra.mxu0 %v2752_v28 }
 0x317   : > { %v2810_v50 = vmul.f32 %v2658_v30, %v2639_v13 }
 0x318   : > { %3246 = vmatpush.msra.mxu0 %v2733_v16  ;;  %4611 = vmatmul.msk.f32.vlgmr.msrb.gmra.mxu3 %vm2818_vm10, %v6971_v7 }
 0x319   : > { %v7377_v0 = vpop.f32.mrf.mxu2  ;;  %3271 = vmatpush.msrb.mxu1 %v2810_v50  ;;  %v2400_v58 = vpop.f32.mrf.mxu0  ;;  %4608 = vmatmul.msk.f32.gmra.mxu2 %vm2818_vm10, %v7002_v20 }
 0x31a   : > { %v7381_v18 = vpop.f32.mrf.mxu3  ;;  %3247 = vmatpush.msra.mxu0 %v2714_v15  ;;  %v7383_v10 = vpop.f32.mrf.mxu1  ;;  %v2401_v13 = vadd.f32 %v2400_v58, %v6542_v46 }
 0x31b   : > { %v3409_v19 = vrot.slane %v7381_v18, 3  ;;  %3272 = vmatpush.msrb.mxu1 %v2791_v23  ;;  %v3525_v51 = vrot.slane %v7381_v18, 6 }
 0x31c   : > { %3248 = vmatpush.msra.mxu0 %v2695_v61  ;;  %v2602_v15 = vmax.f32 %v2401_v13, 0.0  ;;  %v2389_v61 = vadd.f32 %v7297_v22, %v6602_v59  ;;  %v7447_v22 = vld [vmem:[%s8233_s4] sm:$0xff] }
 0x31d   : > { %3273 = vmatpush.msrb.mxu1 %v2772_v54  ;;  %3426 = vrot.lane.b32.xlu1 %v3409_v19, %s4973_s29 }
 0x31e   : > { %3249 = vmatpush.msra.mxu0 %v2676_v49  ;;  %4604 = vmatmul.msk.f32.gmra.mxu1 %vm2818_vm10, %v7002_v20  ;;  %v2773_v35 = vmul.f32 %v2659_v53, %v2602_v15  ;;  %v2545_v49 = vmax.f32 %v2392_v57, 0.0  ;;  %v2526_v62 = vmax.f32 %v2389_v61, 0.0  ;;  %v2427_v57 = vadd.f32 %v7321_v38, %v6609_v31  ;;  %v7500_v38 = vld [vmem:[%s8233_s4 + $0x10] sm:$0xff] }
 0x31f   : > { %3274 = vmatpush.msrb.mxu1 %v2753_v27  ;;  %4615 = vmatmul.msk.f32.vlgmr.msra.gmra.mxu0 %vm2818_vm10, %v6971_v7  ;;  %v2696_v7 = vmul.f32 %v2658_v30, %v2525_v52  ;;  %v2735_v27 = vmul.f32 %v2659_v53, %v2564_v11 }
 0x320   : > { %4612 = vmatmul.msk.f32.gmra.mxu3 %vm2818_vm10, %v7002_v20  ;;  %v2716_v52 = vmul.f32 %v2659_v53, %v2545_v49 }
 0x321   : > { %v7397_v40 = vpop.f32.mrf.mxu2  ;;  %3275 = vmatpush.msrb.mxu1 %v2734_v25  ;;  %v2403_v60 = vpop.f32.mrf.mxu0  ;;  %4609 = vmatmul.msk.f32.gmra.mxu2 %vm2818_vm10, %v7021_v24 }
 0x322   : > { %v2851_v36 = vpop.f32.mrf.mxu3  ;;  %v7401_v39 = vpop.f32.mrf.mxu1  ;;  %v2404_v28 = vadd.f32 %v2403_v60, %v6496_v56 }
 0x323   : > { %v3526_v33 = vrot.slane %v2851_v36, 6  ;;  %3276 = vmatpush.msrb.mxu1 %v2715_v37  ;;  %v2697_v36 = vmul.f32 %v2659_v53, %v2526_v62 }
 0x324   : > { %v2621_v14 = vmax.f32 %v2404_v28, 0.0  ;;  %v2436_v28 = vadd.f32 %v7383_v10, %v6540_v3 }
 0x325   : > { %3277 = vmatpush.msrb.mxu1 %v2696_v7  ;;  %v3527_v55 = vsel %vm1371_vm3, %v3525_v51, %v3526_v33 }
 0x326   : > { %3576 = vrot.lane.b32.xlu0 %v3527_v55, %s4974_s30  ;;  %4605 = vmatmul.msk.f32.gmra.mxu1 %vm2818_vm10, %v7021_v24  ;;  %v2792_v23 = vmul.f32 %v2659_v53, %v2621_v14  ;;  %v2565_v14 = vmax.f32 %v2436_v28, 0.0 }
 0x327   : > { %3278 = vmatpush.msrb.mxu1 %v2677_v41  ;;  %4616 = vmatmul.msk.f32.gmra.mxu0 %vm2818_vm10, %v7002_v20  ;;  %v2398_v20 = vadd.f32 %v7355_v5, %v6538_v48 }
 0x328   : > { %4613 = vmatmul.msk.f32.gmra.mxu3 %vm2818_vm10, %v7021_v24  ;;  %v2736_v11 = vmul.f32 %v6525_v63, %v2565_v14 }
 0x329   : > { %v7416_v21 = vpop.f32.mrf.mxu2  ;;  %v2406_v6 = vpop.f32.mrf.mxu0  ;;  %4610 = vmatmul.msk.f32.gmra.mxu2 %vm2818_vm10, %v7052_v45  ;;  %v2583_v58 = vmax.f32 %v2398_v20, 0.0 }
 0x32a   : > { %v2854_v30 = vpop.f32.mrf.mxu3  ;;  %v2407_v47 = vadd.f32 %v2406_v6, %v6509_v29  ;;  %v2441_v16 = vpop.f32.mrf.mxu1 }
 0x32b   : > { %v2754_v4 = vmul.f32 %v2659_v53, %v2583_v58  ;;  %v2442_v51 = vadd.f32 %v2441_v16, %v6542_v46 }
 0x32c   : > { %v2640_v50 = vmax.f32 %v2407_v47, 0.0 }
 0x32d   : > { %v2603_v6 = vmax.f32 %v2442_v51, 0.0 }
 0x32e   : > { %v2811_v26 = vmul.f32 %v2659_v53, %v2640_v50  ;;  %4606 = vmatmul.msk.f32.gmra.mxu1 %vm2818_vm10, %v7052_v45  ;;  %v2430_v53 = vadd.f32 %v7339_v42, %v6602_v59 }
 0x32f   : > { %4617 = vmatmul.msk.f32.gmra.mxu0 %vm2818_vm10, %v7021_v24  ;;  %v2774_v50 = vmul.f32 %v6525_v63, %v2603_v6 }
 0x330   : > { %3300 = vmatpush.msrb.mxu2 %v2811_v26  ;;  %4614 = vmatmul.msk.f32.gmra.mxu3 %vm2818_vm10, %v7052_v45  ;;  %v2527_v61 = vmax.f32 %v2430_v53, 0.0 }
 0x331   : > { %v7434_v5 = vpop.f32.mrf.mxu2  ;;  %v7436_v32 = vpop.f32.mrf.mxu0 }
 0x332   : > { %v2856_v19 = vpop.f32.mrf.mxu3  ;;  %v2444_v24 = vpop.f32.mrf.mxu1  ;;  %v3411_v54 = vrot.slane %v7436_v32, 3  ;;  %3301 = vmatpush.msrb.mxu2 %v2792_v23 }
 0x333   : > { %v2445_v25 = vadd.f32 %v2444_v24, %v6496_v56  ;;  %v2508_v19 = vmax.f32 %v2427_v57, 0.0 }
 0x334   : > { %3302 = vmatpush.msrb.mxu2 %v2773_v35  ;;  %3430 = vrot.lane.b32.xlu0 %v3411_v54, %s4973_s29 }
 0x335   : > { %v2622_v41 = vmax.f32 %v2445_v25, 0.0  ;;  %v2698_v25 = vmul.f32 %v6525_v63, %v2527_v61 }
 0x336   : > { %3303 = vmatpush.msrb.mxu2 %v2754_v4  ;;  %4619 = vmatmul.msk.f32.vlgmr.msrb.gmra.mxu1 %vm2818_vm10, %v7447_v22 }
 0x337   : > { %4618 = vmatmul.msk.f32.gmra.mxu0 %vm2818_vm10, %v7052_v45  ;;  %v2439_v45 = vadd.f32 %v7401_v39, %v6538_v48  ;;  %v2433_v39 = vadd.f32 %v7361_v8, %v6583_v17  ;;  %v2793_v47 = vmul.f32 %v6525_v63, %v2622_v41 }
 0x338   : > { %3304 = vmatpush.msrb.mxu2 %v2735_v27 }
 0x339   : > { %v2482_v44 = vpop.f32.mrf.mxu2  ;;  %v2584_v30 = vmax.f32 %v2439_v45, 0.0  ;;  %v2546_v42 = vmax.f32 %v2433_v39, 0.0  ;;  %v7507_v34 = vpop.f32.mrf.mxu0  ;;  %v7536_v45 = vld [vmem:[%s8233_s4 + $0x18] sm:$0x7] }
 0x33a   : > { %v7454_v60 = vpop.f32.mrf.mxu3  ;;  %v2447_v37 = vpop.f32.mrf.mxu1  ;;  %3305 = vmatpush.msrb.mxu2 %v2716_v52  ;;  %v3708_v27 = vrot.slane %v7507_v34, 4 }
 0x33b   : > { %v3410_v33 = vrot.slane %v7454_v60, 3  ;;  %v2448_v7 = vadd.f32 %v2447_v37, %v6509_v29  ;;  %v3528_v2 = vrot.slane %v7454_v60, 6  ;;  %v2755_v58 = vmul.f32 %v6525_v63, %v2584_v30 }
 0x33c   : > { %3306 = vmatpush.msrb.mxu2 %v2697_v36  ;;  %v2717_v24 = vmul.f32 %v6525_v63, %v2546_v42  ;;  %v2480_v37 = vadd.f32 %v7434_v5, %v6538_v48  ;;  %v2474_v48 = vadd.f32 %v7397_v40, %v6583_v17  ;;  %v2471_v17 = vadd.f32 %v7377_v0, %v6602_v59 }
 0x33d   : > { %v2641_v55 = vmax.f32 %v2448_v7, 0.0  ;;  %3428 = vrot.lane.b32.xlu2 %v3410_v33, %s4973_s29 }
 0x33e   : > { %3307 = vmatpush.msrb.mxu2 %v2678_v9  ;;  %4620 = vmatmul.msk.f32.gmra.mxu1 %vm2818_vm10, %v7465_v43  ;;  %v2585_v5 = vmax.f32 %v2480_v37, 0.0  ;;  %v2547_v39 = vmax.f32 %v2474_v48, 0.0 }
 0x33f   : > { %v2812_v13 = vmul.f32 %v6525_v63, %v2641_v55  ;;  %4623 = vmatmul.msk.f32.vlgmr.msrb.gmra.mxu2 %vm2818_vm10, %v7447_v22 }
 0x340   : > { %v2756_v30 = vmul.f32 %v6525_v63, %v2585_v5  ;;  %v2718_v53 = vmul.f32 %v6525_v63, %v2547_v39 }
 0x341   : > { %v2485_v16 = vpop.f32.mrf.mxu2  ;;  %3329 = vmatpush.msra.mxu3 %v2812_v13  ;;  %v2468_v13 = vadd.f32 %v7352_v1, %v6609_v31  ;;  %v3826_v1 = vrot.slane %v7507_v34, 7 }
 0x342   : > { %v7479_v20 = vpop.f32.mrf.mxu3  ;;  %v7481_v10 = vpop.f32.mrf.mxu1  ;;  %v2486_v35 = vadd.f32 %v2485_v16, %v6496_v56  ;;  %v2483_v56 = vadd.f32 %v2482_v44, %v6542_v46  ;;  %v2477_v44 = vadd.f32 %v7416_v21, %v6540_v3  ;;  %v3531_v3 = vrot.slane %v7436_v32, 6 }
 0x343   : > { %v3529_v15 = vrot.slane %v7479_v20, 6  ;;  %3330 = vmatpush.msra.mxu3 %v2793_v47  ;;  %v4005_v8 = vrot.slane %v7481_v10, 5  ;;  %v3707_v26 = vrot.slane %v7479_v20, 4  ;;  %v3823_v12 = vrot.slane %v7479_v20, 7 }
 0x344   : > { %v2623_v36 = vmax.f32 %v2486_v35, 0.0  ;;  %v2604_v33 = vmax.f32 %v2483_v56, 0.0  ;;  %v3532_v21 = vrot.slane %v7507_v34, 6  ;;  %v2566_v40 = vmax.f32 %v2477_v44, 0.0 }
 0x345   : > { %3331 = vmatpush.msra.mxu3 %v2774_v50  ;;  %v3530_v23 = vsel %vm1371_vm3, %v3528_v2, %v3529_v15  ;;  %3724 = vrot.lane.b32.xlu2 %v3707_v26, %s4973_s29  ;;  %v2528_v16 = vmax.f32 %v2471_v17, 0.0  ;;  %v2509_v0 = vmax.f32 %v2468_v13, 0.0  ;;  %v3827_v31 = vrot.slane %v7481_v10, 7  ;;  %v7563_v2 = vpop.f32.mrf.mxu0 }
 0x346   : > { %4022 = vrot.lane.b32.xlu0 %v4005_v8, %s4973_s29  ;;  %3578 = vrot.lane.b32.xlu1 %v3530_v23, %s4974_s30  ;;  %v2794_v9 = vmul.f32 %v6525_v63, %v2623_v36  ;;  %v2775_v41 = vmul.f32 %v6525_v63, %v2604_v33  ;;  %v3533_v47 = vsel %vm1371_vm3, %v3531_v3, %v3532_v21  ;;  %v3415_v8 = vrot.slane %v7563_v2, 3 }
 0x347   : > { %3332 = vmatpush.msra.mxu3 %v2755_v58  ;;  %4621 = vmatmul.msk.f32.gmra.mxu1 %vm2818_vm10, %v7500_v38  ;;  %v2737_v59 = vmul.f32 %v6525_v63, %v2566_v40  ;;  %v2699_v14 = vmul.f32 %v6525_v63, %v2528_v16  ;;  %v2680_v26 = vmul.f32 %v6525_v63, %v2509_v0 }
 0x348   : > { %4624 = vmatmul.msk.f32.gmra.mxu2 %vm2818_vm10, %v7465_v43  ;;  %v3828_v57 = vsel %vm1311_vm2, %v3826_v1, %v3827_v31 }
 0x349   : > { %v2488_v54 = vpop.f32.mrf.mxu2  ;;  %3333 = vmatpush.msra.mxu3 %v2736_v11 }
 0x34a   : > { %v2489_v49 = vadd.f32 %v2488_v54, %v6509_v29  ;;  %v2881_v4 = vpop.f32.mrf.mxu3  ;;  %v2912_v62 = vpop.f32.mrf.mxu1  ;;  %v2679_v29 = vmul.f32 %v6525_v63, %v2508_v19 }
 0x34b   : > { %v3824_v52 = vrot.slane %v2881_v4, 7  ;;  %3334 = vmatpush.msra.mxu3 %v2717_v24  ;;  %v3543_v24 = vrot.slane %v7563_v2, 6 }
 0x34c   : > { %v2642_v51 = vmax.f32 %v2489_v49, 0.0 }
 0x34d   : > { %3335 = vmatpush.msra.mxu3 %v2698_v25  ;;  %v3825_v46 = vsel %vm1311_vm2, %v3823_v12, %v3824_v52  ;;  %4121 = vrot.lane.b32.xlu2 %v2912_v62, %s4974_s30  ;;  %v7586_v19 = vpop.f32.mrf.mxu0 }
 0x34e   : > { %v2813_v7 = vmul.f32 %v6525_v63, %v2642_v51  ;;  %3726 = vrot.lane.b32.xlu0 %v3708_v27, %s4973_s29  ;;  %3874 = vrot.lane.b32.xlu1 %v3825_v46, %s4974_s30  ;;  %v3544_v54 = vrot.slane %v7586_v19, 6  ;;  %v3712_v49 = vrot.slane %v7586_v19, 4 }
 0x34f   : > { %3336 = vmatpush.msra.mxu3 %v2679_v29  ;;  %4622 = vmatmul.msk.f32.gmra.mxu1 %vm2818_vm10, %v7536_v45 }
 0x350   : > { %3357 = vmatpush.msrb.mxu0 %v2813_v7  ;;  %4627 = vmatmul.msk.f32.vlgmr.msra.gmra.mxu3 %vm2818_vm10, %v7447_v22  ;;  %v3545_v4 = vsel %vm1371_vm3, %v3543_v24, %v3544_v54 }
 0x351   : > { %4625 = vmatmul.msk.f32.gmra.mxu2 %vm2818_vm10, %v7500_v38 }
 0x352   : > { %v2884_v55 = vpop.f32.mrf.mxu3  ;;  %3358 = vmatpush.msrb.mxu0 %v2794_v9  ;;  %v7543_v28 = vpop.f32.mrf.mxu1  ;;  %v3838_v9 = vrot.slane %v7586_v19, 7 }
 0x353   : > { %v3412_v6 = vrot.slane %v7543_v28, 3  ;;  %v3534_v63 = vrot.slane %v7543_v28, 6 }
 0x354   : > { %3359 = vmatpush.msrb.mxu0 %v2775_v41  ;;  %v7572_v58 = vpop.f32.mrf.mxu2 }
 0x355   : > { %3580 = vrot.lane.b32.xlu2 %v3533_v47, %s4974_s30  ;;  %v3413_v61 = vrot.slane %v7572_v58, 3  ;;  %v3537_v12 = vrot.slane %v7572_v58, 6  ;;  %v7630_v48 = vpop.f32.mrf.mxu0 }
 0x356   : > { %3360 = vmatpush.msrb.mxu0 %v2756_v30  ;;  %3432 = vrot.lane.b32.xlu1 %v3412_v6, %s4973_s29  ;;  %v3839_v3 = vrot.slane %v7630_v48, 7  ;;  %v4009_v17 = vrot.slane %v7630_v48, 5 }
 0x358   : > { %3361 = vmatpush.msrb.mxu0 %v2737_v59  ;;  %4628 = vmatmul.msk.f32.gmra.mxu3 %vm2818_vm10, %v7465_v43  ;;  %v3840_v40 = vsel %vm1311_vm2, %v3838_v9, %v3839_v3 }
 0x359   : > { %4626 = vmatmul.msk.f32.gmra.mxu2 %vm2818_vm10, %v7536_v45 }
 0x35a   : > { %v7561_v50 = vpop.f32.mrf.mxu3  ;;  %3362 = vmatpush.msrb.mxu0 %v2718_v53  ;;  %v7570_v42 = vpop.f32.mrf.mxu1 }
 0x35b   : > { %v3414_v15 = vrot.slane %v7561_v50, 3  ;;  %v3535_v23 = vrot.slane %v7570_v42, 6  ;;  %v3709_v11 = vrot.slane %v7570_v42, 4  ;;  %v3540_v25 = vrot.slane %v7561_v50, 6 }
 0x35c   : > { %3363 = vmatpush.msrb.mxu0 %v2699_v14  ;;  %v3829_v51 = vrot.slane %v7570_v42, 7 }
 0x35d   : > { %3436 = vrot.lane.b32.xlu0 %v3414_v15, %s4973_s29  ;;  %3876 = vrot.lane.b32.xlu2 %v3828_v57, %s4974_s30  ;;  %v3536_v35 = vsel %vm1371_vm3, %v3534_v63, %v3535_v23  ;;  %v3028_v47 = vpop.f32.mrf.mxu0 }
 0x35e   : > { %3364 = vmatpush.msrb.mxu0 %v2680_v26  ;;  %3438 = vrot.lane.b32.xlu1 %v3415_v8, %s4973_s29 }
 0x35f   : > { %4631 = vmatmul.msk.f32.vlgmr.msrb.gmra.mxu0 %vm2818_vm10, %v7447_v22  ;;  %v7590_v22 = vpop.f32.mrf.mxu2 }
 0x360   : > { %4629 = vmatmul.msk.f32.gmra.mxu3 %vm2818_vm10, %v7500_v38  ;;  %v3710_v56 = vrot.slane %v7590_v22, 4  ;;  %v3538_v52 = vrot.slane %v7590_v22, 6  ;;  %v3832_v13 = vrot.slane %v7590_v22, 7 }
 0x362   : > { %v7603_v62 = vpop.f32.mrf.mxu3  ;;  %v7615_v36 = vpop.f32.mrf.mxu1 }
 0x363   : > { %v3711_v27 = vrot.slane %v7603_v62, 4  ;;  %v3830_v46 = vrot.slane %v7615_v36, 7  ;;  %v4006_v33 = vrot.slane %v7615_v36, 5  ;;  %v3835_v21 = vrot.slane %v7603_v62, 7 }
 0x365   : > { %3582 = vrot.lane.b32.xlu0 %v3536_v35, %s4974_s30  ;;  %3434 = vrot.lane.b32.xlu2 %v3413_v61, %s4973_s29  ;;  %v3831_v7 = vsel %vm1311_vm2, %v3829_v51, %v3830_v46  ;;  %v7658_v31 = vpop.f32.mrf.mxu0 }
 0x366   : > { %3728 = vrot.lane.b32.xlu1 %v3709_v11, %s4973_s29  ;;  %v3419_v8 = vrot.slane %v7658_v31, 3 }
 0x367   : > { %4632 = vmatmul.msk.f32.gmra.mxu0 %vm2818_vm10, %v7465_v43  ;;  %v3541_v43 = vrot.slane %v7603_v62, 6  ;;  %v7624_v29 = vpop.f32.mrf.mxu2 }
 0x368   : > { %4630 = vmatmul.msk.f32.gmra.mxu3 %vm2818_vm10, %v7536_v45  ;;  %v4007_v44 = vrot.slane %v7624_v29, 5  ;;  %v3833_v39 = vrot.slane %v7624_v29, 7 }
 0x369   : > { %v3542_v37 = vsel %vm1371_vm3, %v3540_v25, %v3541_v43 }
 0x36a   : > { %v7633_v5 = vpop.f32.mrf.mxu3  ;;  %v2941_v55 = vpop.f32.mrf.mxu1  ;;  %v3834_v16 = vsel %vm1311_vm2, %v3832_v13, %v3833_v39 }
 0x36b   : > { %v4008_v6 = vrot.slane %v7633_v5, 5 }
 0x36d   : > { %3588 = vrot.lane.b32.xlu0 %v3545_v4, %s4974_s30  ;;  %3730 = vrot.lane.b32.xlu2 %v3710_v56, %s4973_s29 }
 0x36e   : > { %3734 = vrot.lane.b32.xlu1 %v3712_v49, %s4973_s29 }
 0x36f   : > { %4633 = vmatmul.msk.f32.gmra.mxu0 %vm2818_vm10, %v7500_v38  ;;  %v3539_v38 = vsel %vm1371_vm3, %v3537_v12, %v3538_v52  ;;  %v2970_v53 = vpop.f32.mrf.mxu2 }
 0x372   : > { %v2999_v30 = vpop.f32.mrf.mxu3  ;;  %v7653_v59 = vpop.f32.mrf.mxu1 }
 0x373   : > { %v3416_v0 = vrot.slane %v7653_v59, 3  ;;  %v3546_v24 = vrot.slane %v7653_v59, 6 }
 0x375   : > { %3732 = vrot.lane.b32.xlu0 %v3711_v27, %s4973_s29  ;;  %3586 = vrot.lane.b32.xlu2 %v3542_v37, %s4974_s30  ;;  %v7687_v27 = vpop.f32.mrf.mxu0  ;;  %v3555_v37 = vrot.slane %v7658_v31, 6 }
 0x376   : > { %3584 = vrot.lane.b32.xlu1 %v3539_v38, %s4974_s30  ;;  %v3556_v38 = vrot.slane %v7687_v27, 6  ;;  %v3716_v51 = vrot.slane %v7687_v27, 4 }
 0x377   : > { %4634 = vmatmul.msk.f32.gmra.mxu0 %vm2818_vm10, %v7536_v45  ;;  %v3836_v45 = vrot.slane %v7633_v5, 7  ;;  %v7668_v63 = vpop.f32.mrf.mxu2 }
 0x378   : > { %v3417_v35 = vrot.slane %v7668_v63, 3  ;;  %v3549_v3 = vrot.slane %v7668_v63, 6 }
 0x379   : > { %v3837_v41 = vsel %vm1311_vm2, %v3835_v21, %v3836_v45 }
 0x37a   : > { %v7663_v26 = vpop.f32.mrf.mxu3  ;;  %v7671_v61 = vpop.f32.mrf.mxu1 }
 0x37b   : > { %v3418_v57 = vrot.slane %v7663_v26, 3  ;;  %v3547_v54 = vrot.slane %v7671_v61, 6  ;;  %v3713_v56 = vrot.slane %v7671_v61, 4 }
 0x37d   : > { %3878 = vrot.lane.b32.xlu0 %v3831_v7, %s4974_s30  ;;  %4026 = vrot.lane.b32.xlu2 %v4007_v44, %s4973_s29  ;;  %v3548_v49 = vsel %vm1371_vm3, %v3546_v24, %v3547_v54  ;;  %v3557_v44 = vsel %vm1371_vm3, %v3555_v37, %v3556_v38 }
 0x37e   : > { %4024 = vrot.lane.b32.xlu1 %v4006_v33, %s4973_s29  ;;  %v3552_v33 = vrot.slane %v7663_v26, 6 }
 0x37f   : > { %v7691_v52 = vpop.f32.mrf.mxu2 }
 0x380   : > { %v3714_v25 = vrot.slane %v7691_v52, 4  ;;  %v3550_v21 = vrot.slane %v7691_v52, 6 }
 0x382   : > { %v7698_v46 = vpop.f32.mrf.mxu3 }
 0x383   : > { %v3553_v7 = vrot.slane %v7698_v46, 6  ;;  %v3715_v45 = vrot.slane %v7698_v46, 4 }
 0x385   : > { %3884 = vrot.lane.b32.xlu0 %v3840_v40, %s4974_s30  ;;  %3882 = vrot.lane.b32.xlu2 %v3837_v41, %s4974_s30  ;;  %v3551_v40 = vsel %vm1371_vm3, %v3549_v3, %v3550_v21  ;;  %v7714_v41 = vpop.f32.mrf.mxu1  ;;  %v3956_v3 = vrot.slane %v7481_v10, 2 }
 0x386   : > { %4030 = vrot.lane.b32.xlu1 %v4009_v17, %s4973_s29  ;;  %v3554_v17 = vsel %vm1371_vm3, %v3552_v33, %v3553_v7 }
 0x38b   : > { %v7735_v24 = vpop.f32.mrf.mxu3 }
 0x38d   : > { %4028 = vrot.lane.b32.xlu0 %v4008_v6, %s4973_s29  ;;  %4127 = vrot.lane.b32.xlu2 %v2999_v30, %s4974_s30  ;;  %v3841_v30 = vrot.slane %v7671_v61, 7 }
 0x38e   : > { %3880 = vrot.lane.b32.xlu1 %v3834_v16, %s4974_s30 }
 0x38f   : > { %v3427_v1 = vpop.permute.xlu1 %3426 }
 0x395   : > { %4123 = vrot.lane.b32.xlu0 %v2941_v55, %s4974_s30  ;;  %3440 = vrot.lane.b32.xlu2 %v3416_v0, %s4973_s29  ;;  %v7717_v55 = vpop.f32.mrf.mxu2 }
 0x396   : > { %4125 = vrot.lane.b32.xlu1 %v2970_v53, %s4974_s30  ;;  %v4011_v0 = vrot.slane %v7717_v55, 5  ;;  %v3842_v53 = vrot.slane %v7714_v41, 7  ;;  %v3845_v10 = vrot.slane %v7717_v55, 7 }
 0x397   : > { %v3429_v14 = vpop.permute.xlu2 %3428 }
 0x398   : > { %v3460_v15 = vsel %vm474_vm1, %v3427_v1, %v3429_v14  ;;  %v3577_v23 = vpop.permute.xlu0 %3576  ;;  %v4010_v1 = vrot.slane %v7714_v41, 5 }
 0x399   : > { %v3492_v39 = vadd.f32 %v3460_v15, %v7381_v18  ;;  %v3659_v18 = vrot.slane %v7507_v34, 1 }
 0x39d   : > { %4129 = vrot.lane.b32.xlu0 %v3028_v47, %s4974_s30  ;;  %3446 = vrot.lane.b32.xlu2 %v3419_v8, %s4973_s29 }
 0x39e   : > { %3444 = vrot.lane.b32.xlu1 %v3418_v57, %s4973_s29  ;;  %v3658_v57 = vrot.slane %v7479_v20, 1  ;;  %v3847_v20 = vrot.slane %v7698_v46, 7 }
 0x39f   : > { %v7673_v11 = vpop.permute.xlu2 %3724 }
 0x3a5   : > { %3442 = vrot.lane.b32.xlu0 %v3417_v35, %s4973_s29  ;;  %3736 = vrot.lane.b32.xlu2 %v3713_v56, %s4973_s29  ;;  %v7741_v56 = vpop.f32.mrf.mxu0 }
 0x3a6   : > { %v7682_v4 = vpop.permute.xlu0 %3430  ;;  %3590 = vrot.lane.b32.xlu1 %v3548_v49, %s4974_s30 }
 0x3a7   : > { %v3461_v43 = vsel %vm474_vm1, %v3429_v14, %v7682_v4  ;;  %v7689_v12 = vpop.permute.xlu2 %4121 }
 0x3a8   : > { %v3493_v47 = vadd.f32 %v3461_v43, %v7454_v60  ;;  %v3848_v43 = vrot.slane %v7735_v24, 7 }
 0x3ad   : > { %3738 = vrot.lane.b32.xlu0 %v3714_v25, %s4973_s29  ;;  %3742 = vrot.lane.b32.xlu2 %v3716_v51, %s4973_s29  ;;  %v3850_v25 = vrot.slane %v7687_v27, 7  ;;  %v3851_v51 = vrot.slane %v7741_v56, 7 }
 0x3ae   : > { %3596 = vrot.lane.b32.xlu1 %v3557_v44, %s4974_s30  ;;  %v4013_v44 = vrot.slane %v7741_v56, 5 }
 0x3af   : > { %v7705_v9 = vpop.permute.xlu2 %3580 }
 0x3b5   : > { %3594 = vrot.lane.b32.xlu0 %v3554_v17, %s4974_s30  ;;  %3592 = vrot.lane.b32.xlu2 %v3551_v40, %s4974_s30  ;;  %v3057_v17 = vpop.f32.mrf.mxu1 }
 0x3b6   : > { %3740 = vrot.lane.b32.xlu1 %v3715_v45, %s4973_s29  ;;  %v3849_v45 = vsel %vm1311_vm2, %v3847_v20, %v3848_v43 }
 0x3b7   : > { %v7719_v6 = vpop.permute.xlu2 %3876 }
 0x3b8   : > { %v7721_v13 = vpop.permute.xlu0 %4022  ;;  %v3579_v16 = vpop.permute.xlu1 %3578 }
 0x3b9   : > { %v3610_v14 = vsel %vm606_vm0, %v3577_v23, %v3579_v16  ;;  %v3611_v8 = vsel %vm606_vm0, %v3579_v16, %v7705_v9  ;;  %v3843_v23 = vsel %vm1311_vm2, %v3841_v30, %v3842_v53  ;;  %v3844_v30 = vrot.slane %v7691_v52, 7  ;;  %v3086_v16 = vpop.f32.mrf.mxu2 }
 0x3ba   : > { %v3642_v15 = vadd.f32 %v3610_v14, %v3492_v39  ;;  %v3643_v35 = vadd.f32 %v3611_v8, %v3493_v47  ;;  %v4012_v14 = vrot.slane %v7735_v24, 5 }
 0x3bb   : > { %v3846_v8 = vsel %vm1311_vm2, %v3844_v30, %v3845_v10  ;;  %v3144_v30 = vpop.f32.mrf.mxu0 }
 0x3bc   : > { %v3690_v60 = vadd.f32 %v3658_v57, %v3642_v15  ;;  %v7737_v54 = vadd.f32 %v3659_v18, %v3643_v35 }
 0x3bd   : > { %4034 = vrot.lane.b32.xlu0 %v4011_v0, %s4973_s29  ;;  %4032 = vrot.lane.b32.xlu2 %v4010_v1, %s4973_s29  ;;  %v3115_v1 = vpop.f32.mrf.mxu3  ;;  %v7774_v57 = vpop.f32.mrf.mxu1 }
 0x3be   : > { %3886 = vrot.lane.b32.xlu1 %v3843_v23, %s4974_s30 }
 0x3bf   : > { %v3435_v34 = vpop.permute.xlu2 %3434 }
 0x3c0   : > { %v3727_v49 = vpop.permute.xlu0 %3726  ;;  %v3875_v38 = vpop.permute.xlu1 %3874 }
 0x3c1   : > { %v3758_v37 = vsel %vm474_vm1, %v7673_v11, %v3727_v49  ;;  %v3908_v7 = vsel %vm606_vm0, %v3875_v38, %v7719_v6  ;;  %v3852_v11 = vsel %vm1311_vm2, %v3850_v25, %v3851_v51  ;;  %v7783_v20 = vpop.f32.mrf.mxu2 }
 0x3c2   : > { %v3790_v33 = vadd.f32 %v3758_v37, %v3690_v60  ;;  %v3420_v60 = vrot.slane %v7774_v57, 3 }
 0x3c4   : > { %v3940_v21 = vadd.f32 %v3908_v7, %v3790_v33 }
 0x3c5   : > { %3890 = vrot.lane.b32.xlu0 %v3849_v45, %s4974_s30  ;;  %4038 = vrot.lane.b32.xlu2 %v4013_v44, %s4973_s29  ;;  %v7785_v43 = vpop.f32.mrf.mxu3  ;;  %v7795_v51 = vpop.f32.mrf.mxu1  ;;  %v3660_v44 = vrot.slane %v7570_v42, 1 }
 0x3c6   : > { %v7758_v40 = vadd.f32 %v3956_v3, %v3940_v21  ;;  %3892 = vrot.lane.b32.xlu1 %v3852_v11, %s4974_s30  ;;  %v3717_v3 = vrot.slane %v7795_v51, 4  ;;  %v3422_v45 = vrot.slane %v7785_v43, 3 }
 0x3c7   : > { %v7761_v39 = vpop.permute.xlu2 %3730 }
 0x3c8   : > { %v3433_v47 = vpop.permute.xlu1 %3432 }
 0x3c9   : > { %v3462_v0 = vsel %vm474_vm1, %v7682_v4, %v3433_v47  ;;  %v7768_v53 = vsel %vm474_vm1, %v3433_v47, %v3435_v34  ;;  %v7809_v42 = vpop.f32.mrf.mxu2 }
 0x3ca   : > { %v3494_v25 = vadd.f32 %v3462_v0, %v7436_v32 }
 0x3cd   : > { %4135 = vrot.lane.b32.xlu0 %v3115_v1, %s4974_s30  ;;  %3888 = vrot.lane.b32.xlu2 %v3846_v8, %s4974_s30  ;;  %v7804_v11 = vpop.f32.mrf.mxu3  ;;  %v3562_v1 = vrot.slane %v7809_v42, 6  ;;  %v3558_v8 = vrot.slane %v7774_v57, 6 }
 0x3ce   : > { %4036 = vrot.lane.b32.xlu1 %v4012_v14, %s4973_s29  ;;  %v3663_v14 = vrot.slane %v7586_v19, 1 }
 0x3cf   : > { %v3437_v18 = vpop.permute.xlu0 %3436  ;;  %v3587_v4 = vpop.permute.xlu2 %3586 }
 0x3d0   : > { %v3464_v15 = vsel %vm474_vm1, %v3435_v34, %v3437_v18  ;;  %v7778_v35 = vpop.permute.xlu1 %3438 }
 0x3d1   : > { %v3465_v23 = vsel %vm474_vm1, %v3437_v18, %v7778_v35  ;;  %v3559_v18 = vrot.slane %v7795_v51, 6 }
 0x3d5   : > { %3448 = vrot.lane.b32.xlu0 %v3420_v60, %s4973_s29  ;;  %4133 = vrot.lane.b32.xlu2 %v3086_v16, %s4974_s30  ;;  %v3561_v16 = vrot.slane %v7783_v20, 6 }
 0x3d6   : > { %4131 = vrot.lane.b32.xlu1 %v3057_v17, %s4974_s30 }
 0x3d7   : > { %v3583_v34 = vpop.permute.xlu0 %3582  ;;  %v7793_v38 = vpop.permute.xlu2 %4026 }
 0x3d8   : > { %v3612_v37 = vsel %vm606_vm0, %v7705_v9, %v3583_v34  ;;  %v3729_v7 = vpop.permute.xlu1 %3728 }
 0x3d9   : > { %v3644_v33 = vadd.f32 %v3612_v37, %v3494_v25  ;;  %v3759_v21 = vsel %vm474_vm1, %v3727_v49, %v3729_v7  ;;  %v3760_v32 = vsel %vm474_vm1, %v3729_v7, %v7761_v39  ;;  %v3497_v49 = vadd.f32 %v3465_v23, %v7561_v50  ;;  %v7837_v7 = vpop.f32.mrf.mxu1 }
 0x3da   : > { %v3791_v9 = vadd.f32 %v3759_v21, %v7737_v54  ;;  %v3563_v25 = vsel %vm1371_vm3, %v3561_v16, %v3562_v1  ;;  %v3421_v37 = vrot.slane %v7783_v20, 3  ;;  %v4014_v16 = vrot.slane %v7837_v7, 5 }
 0x3db   : > { %v3692_v17 = vadd.f32 %v3660_v44, %v3644_v33  ;;  %v3560_v44 = vsel %vm1371_vm3, %v3558_v8, %v3559_v18  ;;  %v7833_v33 = vpop.f32.mrf.mxu3  ;;  %v3662_v8 = vrot.slane %v7603_v62, 1  ;;  %v3853_v62 = vrot.slane %v7795_v51, 7 }
 0x3dd   : > { %v7806_v10 = vadd.f32 %v3760_v32, %v3692_v17  ;;  %3744 = vrot.lane.b32.xlu0 %v3717_v3, %s4973_s29  ;;  %3452 = vrot.lane.b32.xlu2 %v3422_v45, %s4973_s29  ;;  %v7845_v45 = vpop.f32.mrf.mxu0  ;;  %v3495_v17 = vadd.f32 %v7768_v53, %v7543_v28  ;;  %v3718_v28 = vrot.slane %v7809_v42, 4 }
 0x3de   : > { %4137 = vrot.lane.b32.xlu1 %v3144_v30, %s4974_s30  ;;  %v3496_v30 = vadd.f32 %v3464_v15, %v7572_v58 }
 0x3df   : > { %v7814_v47 = vpop.permute.xlu0 %3588  ;;  %v7819_v0 = vpop.permute.xlu2 %3882 }
 0x3e0   : > { %v3615_v54 = vsel %vm606_vm0, %v3587_v4, %v7814_v47  ;;  %v7825_v60 = vpop.permute.xlu1 %3734 }
 0x3e1   : > { %v3647_v50 = vadd.f32 %v3615_v54, %v3497_v49 }
 0x3e3   : > { %v7827_v23 = vadd.f32 %v3663_v14, %v3647_v50  ;;  %v3661_v14 = vrot.slane %v7590_v22, 1  ;;  %v7858_v58 = vpop.f32.mrf.mxu3  ;;  %v3957_v22 = vrot.slane %v7615_v36, 2  ;;  %v3564_v36 = vrot.slane %v7785_v43, 6 }
 0x3e5   : > { %3600 = vrot.lane.b32.xlu0 %v3563_v25, %s4974_s30  ;;  %3598 = vrot.lane.b32.xlu2 %v3560_v44, %s4974_s30 }
 0x3e6   : > { %3450 = vrot.lane.b32.xlu1 %v3421_v37, %s4973_s29 }
 0x3e7   : > { %v3733_v19 = vpop.permute.xlu0 %3732  ;;  %v7843_v32 = vpop.permute.xlu2 %4127 }
 0x3e8   : > { %v3761_v3 = vsel %vm474_vm1, %v7761_v39, %v3733_v19  ;;  %v3762_v21 = vsel %vm474_vm1, %v3733_v19, %v7825_v60  ;;  %v3585_v49 = vpop.permute.xlu1 %3584  ;;  %v3719_v39 = vrot.slane %v7804_v11, 4  ;;  %v3854_v19 = vrot.slane %v7837_v7, 7 }
 0x3e9   : > { %v3613_v54 = vsel %vm606_vm0, %v3583_v34, %v3585_v49  ;;  %v3614_v1 = vsel %vm606_vm0, %v3585_v49, %v3587_v4 }
 0x3ea   : > { %v3645_v18 = vadd.f32 %v3613_v54, %v3495_v17  ;;  %v3646_v50 = vadd.f32 %v3614_v1, %v3496_v30  ;;  %v7881_v54 = vpop.f32.mrf.mxu0 }
 0x3ec   : > { %v3693_v25 = vadd.f32 %v3661_v14, %v3645_v18  ;;  %v3694_v37 = vadd.f32 %v3662_v8, %v3646_v50  ;;  %v7886_v14 = vpop.f32.mrf.mxu2  ;;  %v3338_v8 = vpop.f32.mrf.mxu3  ;;  %v3856_v50 = vrot.slane %v7809_v42, 7 }
 0x3ed   : > { %4040 = vrot.lane.b32.xlu0 %v4014_v16, %s4973_s29  ;;  %3748 = vrot.lane.b32.xlu2 %v3719_v39, %s4973_s29  ;;  %v3855_v39 = vsel %vm1311_vm2, %v3853_v62, %v3854_v19  ;;  %v3720_v8 = vrot.slane %v7881_v54, 4 }
 0x3ee   : > { %3746 = vrot.lane.b32.xlu1 %v3718_v28, %s4973_s29  ;;  %v3794_v15 = vadd.f32 %v3762_v21, %v3694_v37  ;;  %v3793_v4 = vadd.f32 %v3761_v3, %v3693_v25  ;;  %v3423_v3 = vrot.slane %v7845_v45, 3  ;;  %v3565_v21 = vrot.slane %v7804_v11, 6 }
 0x3ef   : > { %v3879_v53 = vpop.permute.xlu0 %3878  ;;  %v7866_v44 = vpop.permute.xlu2 %3440  ;;  %v3857_v37 = vrot.slane %v7886_v14, 7  ;;  %v3960_v28 = vrot.slane %v7630_v48, 2 }
 0x3f0   : > { %v3909_v34 = vsel %vm606_vm0, %v7719_v6, %v3879_v53  ;;  %v7872_v30 = vsel %vm474_vm1, %v7778_v35, %v7866_v44  ;;  %v4025_v49 = vpop.permute.xlu1 %4024 }
 0x3f1   : > { %v3941_v17 = vadd.f32 %v3909_v34, %v3791_v9  ;;  %v4056_v6 = vsel %vm474_vm1, %v7721_v13, %v4025_v49  ;;  %v4057_v16 = vsel %vm474_vm1, %v4025_v49, %v7793_v38  ;;  %v3566_v13 = vsel %vm1371_vm3, %v3564_v36, %v3565_v21 }
 0x3f2   : > { %v4088_v1 = vadd.f32 %v4056_v6, %v7758_v40  ;;  %v4016_v34 = vrot.slane %v7833_v33, 5  ;;  %v7904_v19 = vpop.f32.mrf.mxu0 }
 0x3f3   : > { %v3989_v9 = vadd.f32 %v3957_v22, %v3941_v17  ;;  %v4015_v17 = vrot.slane %v7886_v14, 5 }
 0x3f5   : > { %v4089_v35 = vadd.f32 %v4057_v16, %v3989_v9  ;;  %3454 = vrot.lane.b32.xlu0 %v3423_v3, %s4973_s29  ;;  %3894 = vrot.lane.b32.xlu2 %v3855_v39, %s4974_s30  ;;  %v3858_v3 = vsel %vm1311_vm2, %v3856_v50, %v3857_v37  ;;  %v3859_v16 = vrot.slane %v7804_v11, 7 }
 0x3f6   : > { %3602 = vrot.lane.b32.xlu1 %v3566_v13, %s4974_s30  ;;  %v3860_v13 = vrot.slane %v7833_v33, 7 }
 0x3f7   : > { %v7891_v18 = vpop.permute.xlu0 %3884  ;;  %v7897_v25 = vpop.permute.xlu2 %3446 }
 0x3f8   : > { %v3912_v40 = vsel %vm606_vm0, %v7819_v0, %v7891_v18  ;;  %v7901_v62 = vpop.permute.xlu1 %4030 }
 0x3f9   : > { %v3944_v22 = vadd.f32 %v3912_v40, %v3794_v15  ;;  %v3173_v15 = vpop.f32.mrf.mxu1 }
 0x3fa   : > { %v7931_v37 = vpop.f32.mrf.mxu0 }
 0x3fb   : > { %v7907_v49 = vadd.f32 %v3960_v28, %v3944_v22  ;;  %v3958_v28 = vrot.slane %v7624_v29, 2  ;;  %v3959_v22 = vrot.slane %v7633_v5, 2 }
 0x3fd   : > { %3896 = vrot.lane.b32.xlu0 %v3858_v3, %s4974_s30  ;;  %4044 = vrot.lane.b32.xlu2 %v4016_v34, %s4973_s29 }
 0x3fe   : > { %4042 = vrot.lane.b32.xlu1 %v4015_v17, %s4973_s29 }
 0x3ff   : > { %v4029_v48 = vpop.permute.xlu0 %4028  ;;  %v7917_v6 = vpop.permute.xlu2 %3736 }
 0x400   : > { %v4058_v36 = vsel %vm474_vm1, %v7793_v38, %v4029_v48  ;;  %v4059_v21 = vsel %vm474_vm1, %v4029_v48, %v7901_v62  ;;  %v3763_v9 = vsel %vm474_vm1, %v7825_v60, %v7917_v6  ;;  %v3881_v39 = vpop.permute.xlu1 %3880 }
 0x401   : > { %v7926_v50 = vadd.f32 %v3763_v9, %v7827_v23  ;;  %v3910_v38 = vsel %vm606_vm0, %v3879_v53, %v3881_v39  ;;  %v3911_v40 = vsel %vm606_vm0, %v3881_v39, %v7819_v0  ;;  %v3861_v23 = vsel %vm1311_vm2, %v3859_v16, %v3860_v13  ;;  %v7948_v16 = vpop.f32.mrf.mxu1 }
 0x402   : > { %v3942_v60 = vadd.f32 %v3910_v38, %v7806_v10  ;;  %v3943_v34 = vadd.f32 %v3911_v40, %v3793_v4  ;;  %v3567_v10 = vrot.slane %v7845_v45, 6  ;;  %v3568_v4 = vrot.slane %v7881_v54, 6 }
 0x404   : > { %v3990_v17 = vadd.f32 %v3958_v28, %v3942_v60  ;;  %v3991_v3 = vadd.f32 %v3959_v22, %v3943_v34  ;;  %v3569_v38 = vsel %vm1371_vm3, %v3567_v10, %v3568_v4  ;;  %v3863_v34 = vrot.slane %v7904_v19, 7 }
 0x405   : > { %3750 = vrot.lane.b32.xlu0 %v3720_v8, %s4973_s29  ;;  %4139 = vrot.lane.b32.xlu2 %v3173_v15, %s4974_s30  ;;  %v3366_v8 = vpop.f32.mrf.mxu0 }
 0x406   : > { %3898 = vrot.lane.b32.xlu1 %v3861_v23, %s4974_s30  ;;  %v4090_v53 = vadd.f32 %v4058_v36, %v3990_v17  ;;  %v4091_v48 = vadd.f32 %v4059_v21, %v3991_v3  ;;  %v3202_v21 = vpop.f32.mrf.mxu2  ;;  %v4017_v17 = vrot.slane %v7904_v19, 5  ;;  %v3424_v23 = vrot.slane %v7948_v16, 3 }
 0x407   : > { %v4124_v0 = vpop.permute.xlu0 %4123  ;;  %v7942_v5 = vpop.permute.xlu2 %3742  ;;  %v3664_v8 = vrot.slane %v7671_v61, 1 }
 0x408   : > { %v4155_v29 = vsel %vm606_vm0, %v7689_v12, %v4124_v0  ;;  %v4126_v39 = vpop.permute.xlu1 %4125 }
 0x409   : > { %v7946_v9 = vadd.f32 %v4155_v29, %v4088_v1  ;;  %v4156_v15 = vsel %vm606_vm0, %v4124_v0, %v4126_v39  ;;  %v4157_v36 = vsel %vm606_vm0, %v4126_v39, %v7843_v32  ;;  %v3498_v39 = vadd.f32 %v7872_v30, %v7563_v2 }
 0x40a   : > { %v7953_v13 = vadd.f32 %v4156_v15, %v4089_v35  ;;  %v7955_v12 = vadd.f32 %v4157_v36, %v4090_v53  ;;  %v3862_v35 = vrot.slane %v7881_v54, 7  ;;  %v3570_v53 = vrot.slane %v7948_v16, 6 }
 0x40c   : > { %v3864_v0 = vsel %vm1311_vm2, %v3862_v35, %v3863_v34  ;;  %v3665_v35 = vrot.slane %v7691_v52, 1 }
 0x40d   : > { %4141 = vrot.lane.b32.xlu0 %v3202_v21, %s4974_s30  ;;  %3604 = vrot.lane.b32.xlu2 %v3569_v38, %s4974_s30  ;;  %v3368_v3 = vpop.f32.mrf.mxu0 }
 0x40e   : > { %4143 = vrot.lane.b32.xlu1 %v7858_v58, %s4974_s30  ;;  %v7973_v58 = vpop.f32.mrf.mxu1  ;;  %v3309_v34 = vpop.f32.mrf.mxu2 }
 0x40f   : > { %v7962_v1 = vpop.permute.xlu0 %4129  ;;  %v3593_v28 = vpop.permute.xlu2 %3592  ;;  %v3571_v4 = vrot.slane %v7973_v58, 6  ;;  %v3865_v52 = vrot.slane %v7973_v58, 7 }
 0x410   : > { %v4158_v40 = vsel %vm606_vm0, %v7843_v32, %v7962_v1  ;;  %v3445_v60 = vpop.permute.xlu1 %3444 }
 0x411   : > { %v7968_v22 = vadd.f32 %v4158_v40, %v4091_v48 }
 0x415   : > { %4046 = vrot.lane.b32.xlu0 %v4017_v17, %s4973_s29  ;;  %3900 = vrot.lane.b32.xlu2 %v3864_v0, %s4974_s30 }
 0x416   : > { %3456 = vrot.lane.b32.xlu1 %v3424_v23, %s4973_s29  ;;  %v8003_v17 = vpop.f32.mrf.mxu1 }
 0x417   : > { %v3443_v32 = vpop.permute.xlu0 %3442  ;;  %v7983_v10 = vpop.permute.xlu2 %4032  ;;  %v3866_v0 = vrot.slane %v8003_v17, 7 }
 0x418   : > { %v3467_v48 = vsel %vm474_vm1, %v7866_v44, %v3443_v32  ;;  %v3468_v29 = vsel %vm474_vm1, %v3443_v32, %v3445_v60  ;;  %v4060_v36 = vsel %vm474_vm1, %v7901_v62, %v7983_v10  ;;  %v3591_v21 = vpop.permute.xlu1 %3590  ;;  %v3572_v62 = vsel %vm1371_vm3, %v3570_v53, %v3571_v4 }
 0x419   : > { %v3499_v15 = vadd.f32 %v3467_v48, %v7653_v59  ;;  %v7994_v44 = vadd.f32 %v4060_v36, %v7907_v49  ;;  %v3616_v38 = vsel %vm606_vm0, %v7814_v47, %v3591_v21  ;;  %v3617_v40 = vsel %vm606_vm0, %v3591_v21, %v3593_v28 }
 0x41a   : > { %v3648_v2 = vadd.f32 %v3616_v38, %v3498_v39  ;;  %v3721_v59 = vrot.slane %v7973_v58, 4  ;;  %v3425_v48 = vrot.slane %v3309_v34, 3  ;;  %v4018_v4 = vrot.slane %v8003_v17, 5 }
 0x41b   : > { %v3649_v30 = vadd.f32 %v3617_v40, %v3499_v15  ;;  %v3867_v39 = vsel %vm1311_vm2, %v3865_v52, %v3866_v0  ;;  %v8021_v15 = vpop.f32.mrf.mxu2  ;;  %v3500_v36 = vadd.f32 %v3468_v29, %v7668_v63 }
 0x41c   : > { %v3696_v61 = vadd.f32 %v3664_v8, %v3648_v2  ;;  %v3667_v8 = vrot.slane %v7687_v27, 1  ;;  %v3573_v2 = vrot.slane %v3309_v34, 6  ;;  %v3574_v29 = vrot.slane %v8021_v15, 6 }
 0x41d   : > { %3606 = vrot.lane.b32.xlu0 %v3572_v62, %s4974_s30  ;;  %v3697_v49 = vadd.f32 %v3665_v35, %v3649_v30  ;;  %4145 = vrot.lane.b32.xlu2 %v7931_v37, %s4974_s30  ;;  %v3469_v37 = vsel %vm474_vm1, %v3445_v60, %v7897_v25  ;;  %v3666_v35 = vrot.slane %v7698_v46, 1  ;;  %v3722_v27 = vrot.slane %v8021_v15, 4 }
 0x41e   : > { %3752 = vrot.lane.b32.xlu1 %v3721_v59, %s4973_s29  ;;  %v3575_v34 = vsel %vm1371_vm3, %v3573_v2, %v3574_v29  ;;  %v3370_v29 = vpop.f32.mrf.mxu0 }
 0x41f   : > { %v3739_v47 = vpop.permute.xlu0 %3738  ;;  %v8011_v23 = vpop.permute.xlu2 %4038 }
 0x420   : > { %v3764_v3 = vsel %vm474_vm1, %v7917_v6, %v3739_v47  ;;  %v8014_v53 = vpop.permute.xlu1 %3596  ;;  %v3501_v6 = vadd.f32 %v3469_v37, %v7663_v26 }
 0x421   : > { %v3796_v32 = vadd.f32 %v3764_v3, %v3696_v61  ;;  %v3289_v61 = vpop.f32.mrf.mxu1 }
 0x425   : > { %3902 = vrot.lane.b32.xlu0 %v3867_v39, %s4974_s30  ;;  %3458 = vrot.lane.b32.xlu2 %v3425_v48, %s4973_s29  ;;  %v8043_v48 = vpop.f32.mrf.mxu2 }
 0x426   : > { %4048 = vrot.lane.b32.xlu1 %v4018_v4, %s4973_s29 }
 0x427   : > { %v3595_v21 = vpop.permute.xlu0 %3594  ;;  %v3889_v38 = vpop.permute.xlu2 %3888 }
 0x428   : > { %v3618_v60 = vsel %vm606_vm0, %v3593_v28, %v3595_v21  ;;  %v3619_v40 = vsel %vm606_vm0, %v3595_v21, %v8014_v53  ;;  %v3741_v62 = vpop.permute.xlu1 %3740  ;;  %v3340_v28 = vpop.f32.mrf.mxu3 }
 0x429   : > { %v3650_v30 = vadd.f32 %v3618_v60, %v3500_v36  ;;  %v3651_v59 = vadd.f32 %v3619_v40, %v3501_v6  ;;  %v3765_v26 = vsel %vm474_vm1, %v3739_v47, %v3741_v62  ;;  %v3766_v63 = vsel %vm474_vm1, %v3741_v62, %v7942_v5 }
 0x42a   : > { %v3797_v3 = vadd.f32 %v3765_v26, %v3697_v49  ;;  %v3868_v49 = vrot.slane %v8021_v15, 7  ;;  %v3723_v6 = vrot.slane %v3340_v28, 4  ;;  %v4019_v60 = vrot.slane %v8043_v48, 5 }
 0x42b   : > { %v3698_v52 = vadd.f32 %v3666_v35, %v3650_v30  ;;  %v8037_v0 = vadd.f32 %v3667_v8, %v3651_v59  ;;  %v3869_v8 = vrot.slane %v8043_v48, 7  ;;  %v3961_v40 = vrot.slane %v7714_v41, 2 }
 0x42c   : > { %v3962_v35 = vrot.slane %v7717_v55, 2  ;;  %v3871_v26 = vrot.slane %v3340_v28, 7  ;;  %v3964_v28 = vrot.slane %v7741_v56, 2 }
 0x42d   : > { %v3798_v46 = vadd.f32 %v3766_v63, %v3698_v52  ;;  %4147 = vrot.lane.b32.xlu0 %v3289_v61, %s4974_s30  ;;  %3754 = vrot.lane.b32.xlu2 %v3722_v27, %s4973_s29  ;;  %v3963_v27 = vrot.slane %v7735_v24, 2 }
 0x42e   : > { %3608 = vrot.lane.b32.xlu1 %v3575_v34, %s4974_s30 }
 0x42f   : > { %v4035_v47 = vpop.permute.xlu0 %4034  ;;  %v8045_v4 = vpop.permute.xlu2 %4133 }
 0x430   : > { %v4061_v37 = vsel %vm474_vm1, %v7983_v10, %v4035_v47  ;;  %v3887_v39 = vpop.permute.xlu1 %3886  ;;  %v8058_v30 = vpop.f32.mrf.mxu3 }
 0x431   : > { %v3913_v36 = vsel %vm606_vm0, %v7891_v18, %v3887_v39  ;;  %v3914_v21 = vsel %vm606_vm0, %v3887_v39, %v3889_v38  ;;  %v3870_v18 = vsel %vm1311_vm2, %v3868_v49, %v3869_v8  ;;  %v3872_v41 = vrot.slane %v8058_v30, 7 }
 0x432   : > { %v3945_v2 = vadd.f32 %v3913_v36, %v7926_v50  ;;  %v3946_v10 = vadd.f32 %v3914_v21, %v3796_v32  ;;  %v4020_v34 = vrot.slane %v8058_v30, 5 }
 0x433   : > { %v3873_v36 = vsel %vm1311_vm2, %v3871_v26, %v3872_v41 }
 0x434   : > { %v3993_v59 = vadd.f32 %v3961_v40, %v3945_v2  ;;  %v3994_v62 = vadd.f32 %v3962_v35, %v3946_v10  ;;  %v3373_v40 = vpop.f32.mrf.mxu0  ;;  %v4021_v35 = vrot.slane %v3370_v29, 5  ;;  %v3668_v29 = vrot.slane %v7795_v51, 1 }
 0x435   : > { %3756 = vrot.lane.b32.xlu0 %v3723_v6, %s4973_s29  ;;  %4050 = vrot.lane.b32.xlu2 %v4019_v60, %s4973_s29 }
 0x436   : > { %3904 = vrot.lane.b32.xlu1 %v3870_v18, %s4974_s30  ;;  %v4093_v55 = vadd.f32 %v4061_v37, %v3993_v59  ;;  %v3318_v37 = vpop.f32.mrf.mxu2 }
 0x437   : > { %v3891_v63 = vpop.permute.xlu0 %3890  ;;  %v8066_v32 = vpop.permute.xlu2 %3452 }
 0x438   : > { %v3915_v50 = vsel %vm606_vm0, %v3889_v38, %v3891_v63  ;;  %v3893_v52 = vpop.permute.xlu1 %3892  ;;  %v3346_v59 = vpop.f32.mrf.mxu3 }
 0x439   : > { %v3947_v61 = vadd.f32 %v3915_v50, %v3797_v3  ;;  %v3916_v49 = vsel %vm606_vm0, %v3891_v63, %v3893_v52 }
 0x43a   : > { %v3948_v39 = vadd.f32 %v3916_v49, %v3798_v46 }
 0x43b   : > { %v3995_v6 = vadd.f32 %v3963_v27, %v3947_v61 }
 0x43c   : > { %v3996_v38 = vadd.f32 %v3964_v28, %v3948_v39 }
 0x43d   : > { %4052 = vrot.lane.b32.xlu0 %v4020_v34, %s4973_s29  ;;  %3906 = vrot.lane.b32.xlu2 %v3873_v36, %s4974_s30 }
 0x43e   : > { %4149 = vrot.lane.b32.xlu1 %v3318_v37, %s4974_s30 }
 0x43f   : > { %v4136_v24 = vpop.permute.xlu0 %4135  ;;  %v3599_v21 = vpop.permute.xlu2 %3598 }
 0x440   : > { %v4161_v3 = vsel %vm606_vm0, %v8045_v4, %v4136_v24  ;;  %v3620_v56 = vsel %vm606_vm0, %v8014_v53, %v3599_v21  ;;  %v4037_v46 = vpop.permute.xlu1 %4036 }
 0x441   : > { %v4062_v8 = vsel %vm474_vm1, %v4035_v47, %v4037_v46  ;;  %v4063_v60 = vsel %vm474_vm1, %v4037_v46, %v8011_v23 }
 0x442   : > { %v4094_v2 = vadd.f32 %v4062_v8, %v3994_v62  ;;  %v4095_v10 = vadd.f32 %v4063_v60, %v3995_v6 }
 0x444   : > { %v8083_v18 = vadd.f32 %v4161_v3, %v4094_v2 }
 0x445   : > { %4153 = vrot.lane.b32.xlu0 %v3373_v40, %s4974_s30  ;;  %4151 = vrot.lane.b32.xlu2 %v3346_v59, %s4974_s30 }
 0x446   : > { %4054 = vrot.lane.b32.xlu1 %v4021_v35, %s4973_s29 }
 0x447   : > { %v3449_v53 = vpop.permute.xlu0 %3448  ;;  %v8090_v26 = vpop.permute.xlu2 %3748 }
 0x448   : > { %v3470_v47 = vsel %vm474_vm1, %v7897_v25, %v3449_v53  ;;  %v4132_v41 = vpop.permute.xlu1 %4131  ;;  %v4203_v25 = vld [vmem:[%s8234_s5] sm:$0x7] }
 0x449   : > { %v3502_v63 = vadd.f32 %v3470_v47, %v7658_v31  ;;  %v4159_v62 = vsel %vm606_vm0, %v7962_v1, %v4132_v41  ;;  %v4160_v50 = vsel %vm606_vm0, %v4132_v41, %v8045_v4 }
 0x44a   : > { %v8099_v61 = vadd.f32 %v4159_v62, %v7994_v44  ;;  %v8101_v34 = vadd.f32 %v4160_v50, %v4093_v55  ;;  %v3965_v55 = vrot.slane %v7837_v7, 2 }
 0x44b   : > { %v3652_v27 = vadd.f32 %v3620_v56, %v3502_v63 }
 0x44d   : > { %v3700_v31 = vadd.f32 %v3668_v29, %v3652_v27 }
 0x44e   : > { %4206 = vperm.xlu1 %4933, %v4203_v25  }
 0x44f   : > { %v3745_v49 = vpop.permute.xlu0 %3744  ;;  %v3895_v28 = vpop.permute.xlu2 %3894 }
 0x450   : > { %v3767_v1 = vsel %vm474_vm1, %v7942_v5, %v3745_v49  ;;  %v3917_v51 = vsel %vm606_vm0, %v3893_v52, %v3895_v28  ;;  %v4138_v39 = vpop.permute.xlu1 %4137 }
 0x451   : > { %v3799_v4 = vadd.f32 %v3767_v1, %v8037_v0  ;;  %v4162_v44 = vsel %vm606_vm0, %v4136_v24, %v4138_v39  ;;  %v3669_v24 = vrot.slane %v7809_v42, 1 }
 0x452   : > { %v8112_v36 = vadd.f32 %v4162_v44, %v4095_v10 }
 0x453   : > { %v3949_v6 = vadd.f32 %v3917_v51, %v3799_v4 }
 0x455   : > { %v3997_v37 = vadd.f32 %v3965_v55, %v3949_v6 }
 0x457   : > { %v3601_v3 = vpop.permute.xlu0 %3600  ;;  %v8115_v46 = vpop.permute.xlu2 %4044 }
 0x458   : > { %v3621_v56 = vsel %vm606_vm0, %v3599_v21, %v3601_v3  ;;  %v3451_v5 = vpop.permute.xlu1 %3450 }
 0x459   : > { %v3471_v8 = vsel %vm474_vm1, %v3449_v53, %v3451_v5  ;;  %v3472_v0 = vsel %vm474_vm1, %v3451_v5, %v8066_v32 }
 0x45a   : > { %v3503_v52 = vadd.f32 %v3471_v8, %v7774_v57 }
 0x45c   : > { %v3653_v7 = vadd.f32 %v3621_v56, %v3503_v52 }
 0x45e   : > { %v3701_v40 = vadd.f32 %v3669_v24, %v3653_v7  ;;  %v3967_v7 = vrot.slane %v7833_v33, 2 }
 0x45f   : > { %v4041_v60 = vpop.permute.xlu0 %4040  ;;  %v8124_v2 = vpop.permute.xlu2 %4139 }
 0x460   : > { %v4064_v35 = vsel %vm474_vm1, %v8011_v23, %v4041_v60  ;;  %v3747_v10 = vpop.permute.xlu1 %3746  ;;  %v4163_v57 = vsel %vm606_vm0, %v4138_v39, %v8124_v2 }
 0x461   : > { %v4096_v21 = vadd.f32 %v4064_v35, %v3996_v38  ;;  %v3768_v59 = vsel %vm474_vm1, %v3745_v49, %v3747_v10  ;;  %v3769_v53 = vsel %vm474_vm1, %v3747_v10, %v8090_v26  ;;  %v3504_v38 = vadd.f32 %v3472_v0, %v7783_v20 }
 0x462   : > { %v3800_v47 = vadd.f32 %v3768_v59, %v3700_v31  ;;  %v3801_v42 = vadd.f32 %v3769_v53, %v3701_v40  ;;  %v3670_v49 = vrot.slane %v7804_v11, 1  ;;  %v3671_v31 = vrot.slane %v7881_v54, 1 }
 0x463   : > { %v8131_v63 = vadd.f32 %v4163_v57, %v4096_v21  ;;  %v3966_v20 = vrot.slane %v7886_v14, 2 }
 0x467   : > { %v3455_v41 = vpop.permute.xlu0 %3454  ;;  %v3605_v62 = vpop.permute.xlu2 %3604 }
 0x468   : > { %v3473_v23 = vsel %vm474_vm1, %v8066_v32, %v3455_v41  ;;  %v3603_v29 = vpop.permute.xlu1 %3602 }
 0x469   : > { %v3505_v50 = vadd.f32 %v3473_v23, %v7785_v43  ;;  %v3622_v27 = vsel %vm606_vm0, %v3601_v3, %v3603_v29  ;;  %v3623_v25 = vsel %vm606_vm0, %v3603_v29, %v3605_v62 }
 0x46a   : > { %v3654_v1 = vadd.f32 %v3622_v27, %v3504_v38 }
 0x46b   : > { %v3655_v4 = vadd.f32 %v3623_v25, %v3505_v50 }
 0x46c   : > { %v3702_v51 = vadd.f32 %v3670_v49, %v3654_v1 }
 0x46d   : > { %v3703_v39 = vadd.f32 %v3671_v31, %v3655_v4  ;;  %v3672_v31 = vrot.slane %v7973_v58, 1 }
 0x46f   : > { %v3897_v44 = vpop.permute.xlu0 %3896  ;;  %v3901_v8 = vpop.permute.xlu2 %3900 }
 0x470   : > { %v3918_v32 = vsel %vm606_vm0, %v3895_v28, %v3897_v44  ;;  %v4043_v43 = vpop.permute.xlu1 %4042 }
 0x471   : > { %v3950_v55 = vadd.f32 %v3918_v32, %v3800_v47  ;;  %v4065_v6 = vsel %vm474_vm1, %v4041_v60, %v4043_v43  ;;  %v4066_v3 = vsel %vm474_vm1, %v4043_v43, %v8115_v46  ;;  %v3968_v60 = vrot.slane %v7904_v19, 2 }
 0x472   : > { %v8146_v11 = vadd.f32 %v4065_v6, %v3997_v37  ;;  %v3969_v43 = vrot.slane %v8003_v17, 2 }
 0x473   : > { %v3998_v56 = vadd.f32 %v3966_v20, %v3950_v55 }
 0x475   : > { %v4098_v54 = vadd.f32 %v4066_v3, %v3998_v56 }
 0x477   : > { %v3751_v5 = vpop.permute.xlu0 %3750  ;;  %v8156_v59 = vpop.permute.xlu2 %4145 }
 0x478   : > { %v3770_v0 = vsel %vm474_vm1, %v8090_v26, %v3751_v5  ;;  %v3899_v28 = vpop.permute.xlu1 %3898 }
 0x479   : > { %v3802_v52 = vadd.f32 %v3770_v0, %v3702_v51  ;;  %v3919_v14 = vsel %vm606_vm0, %v3897_v44, %v3899_v28  ;;  %v3920_v24 = vsel %vm606_vm0, %v3899_v28, %v3901_v8 }
 0x47a   : > { %v3951_v40 = vadd.f32 %v3919_v14, %v3801_v42 }
 0x47b   : > { %v3952_v35 = vadd.f32 %v3920_v24, %v3802_v52 }
 0x47c   : > { %v3999_v37 = vadd.f32 %v3967_v7, %v3951_v40 }
 0x47d   : > { %v8154_v21 = vadd.f32 %v3968_v60, %v3952_v35  ;;  %v3970_v35 = vrot.slane %v8043_v48, 2 }
 0x47f   : > { %v4142_v10 = vpop.permute.xlu0 %4141  ;;  %v3459_v50 = vpop.permute.xlu2 %3458 }
 0x480   : > { %v4144_v53 = vpop.permute.xlu1 %4143  ;;  %v4164_v48 = vsel %vm606_vm0, %v8124_v2, %v4142_v10 }
 0x481   : > { %v4165_v26 = vsel %vm606_vm0, %v4142_v10, %v4144_v53  ;;  %v4166_v19 = vsel %vm606_vm0, %v4144_v53, %v8156_v59 }
 0x482   : > { %v8159_v57 = vadd.f32 %v4165_v26, %v4098_v54 }
 0x487   : > { %v4047_v47 = vpop.permute.xlu0 %4046  ;;  %v3755_v44 = vpop.permute.xlu2 %3754 }
 0x488   : > { %v4067_v23 = vsel %vm474_vm1, %v8115_v46, %v4047_v47  ;;  %v3457_v38 = vpop.permute.xlu1 %3456 }
 0x489   : > { %v4099_v33 = vadd.f32 %v4067_v23, %v3999_v37  ;;  %v3474_v29 = vsel %vm474_vm1, %v3455_v41, %v3457_v38  ;;  %v3475_v3 = vsel %vm474_vm1, %v3457_v38, %v3459_v50  ;;  %v3971_v37 = vrot.slane %v8058_v30, 2 }
 0x48a   : > { %v3506_v27 = vadd.f32 %v3474_v29, %v7845_v45  ;;  %v3507_v58 = vadd.f32 %v3475_v3, %v7948_v16 }
 0x48b   : > { %v8165_v42 = vadd.f32 %v4166_v19, %v4099_v33 }
 0x48f   : > { %v3607_v25 = vpop.permute.xlu0 %3606 }
 0x490   : > { %v3624_v49 = vsel %vm606_vm0, %v3605_v62, %v3607_v25  ;;  %v3753_v4 = vpop.permute.xlu1 %3752  ;;  %v4051_v62 = vpop.permute.xlu2 %4050 }
 0x491   : > { %v3656_v1 = vadd.f32 %v3624_v49, %v3506_v27  ;;  %v3771_v51 = vsel %vm474_vm1, %v3751_v5, %v3753_v4 }
 0x492   : > { %v3803_v32 = vadd.f32 %v3771_v51, %v3703_v39  ;;  %v3673_v39 = vrot.slane %v8021_v15, 1 }
 0x493   : > { %v3704_v46 = vadd.f32 %v3672_v31, %v3656_v1 }
 0x497   : > { %v3903_v20 = vpop.permute.xlu0 %3902 }
 0x498   : > { %v3921_v55 = vsel %vm606_vm0, %v3901_v8, %v3903_v20  ;;  %v4049_v6 = vpop.permute.xlu1 %4048  ;;  %v3772_v8 = vsel %vm474_vm1, %v3753_v4, %v3755_v44  ;;  %v3907_v60 = vpop.permute.xlu2 %3906 }
 0x499   : > { %v3953_v41 = vadd.f32 %v3921_v55, %v3803_v32  ;;  %v3804_v14 = vadd.f32 %v3772_v8, %v3704_v46  ;;  %v4068_v49 = vsel %vm474_vm1, %v4047_v47, %v4049_v6  ;;  %v4069_v30 = vsel %vm474_vm1, %v4049_v6, %v4051_v62 }
 0x49a   : > { %v4100_v32 = vadd.f32 %v4068_v49, %v8154_v21 }
 0x49b   : > { %v4001_v45 = vadd.f32 %v3969_v43, %v3953_v41 }
 0x49d   : > { %v4101_v47 = vadd.f32 %v4069_v30, %v4001_v45 }
 0x49f   : > { %v4148_v56 = vpop.permute.xlu0 %4147 }
 0x4a0   : > { %v3609_v54 = vpop.permute.xlu1 %3608  ;;  %v4152_v27 = vpop.permute.xlu2 %4151  ;;  %v4167_v4 = vsel %vm606_vm0, %v8156_v59, %v4148_v56 }
 0x4a1   : > { %v3625_v0 = vsel %vm606_vm0, %v3607_v25, %v3609_v54  ;;  %v4199_v2 = vadd.f32 %v4167_v4, %v4100_v32 }
 0x4a2   : > { %v3657_v5 = vadd.f32 %v3625_v0, %v3507_v58 }
 0x4a4   : > { %v3705_v52 = vadd.f32 %v3673_v39, %v3657_v5 }
 0x4a7   : > { %v3757_v28 = vpop.permute.xlu0 %3756 }
 0x4a8   : > { %v3773_v17 = vsel %vm474_vm1, %v3755_v44, %v3757_v28  ;;  %v3905_v7 = vpop.permute.xlu1 %3904 }
 0x4a9   : > { %v3805_v24 = vadd.f32 %v3773_v17, %v3705_v52  ;;  %v3922_v40 = vsel %vm606_vm0, %v3903_v20, %v3905_v7  ;;  %v3923_v16 = vsel %vm606_vm0, %v3905_v7, %v3907_v60  ;;  %v4196_v20 = vadd.f32 %v4164_v48, %v8146_v11 }
 0x4aa   : > { %v3954_v53 = vadd.f32 %v3922_v40, %v3804_v14 }
 0x4ab   : > { %v3955_v15 = vadd.f32 %v3923_v16, %v3805_v24 }
 0x4ac   : > { %v4002_v26 = vadd.f32 %v3970_v35, %v3954_v53 }
 0x4ad   : > { %v4003_v23 = vadd.f32 %v3971_v37, %v3955_v15 }
 0x4af   : > { %v4053_v38 = vpop.permute.xlu0 %4052 }
 0x4b0   : > { %v4150_v33 = vpop.permute.xlu1 %4149  ;;  %v4070_v50 = vsel %vm474_vm1, %v4051_v62, %v4053_v38 }
 0x4b1   : > { %v4102_v31 = vadd.f32 %v4070_v50, %v4002_v26  ;;  %v4168_v46 = vsel %vm606_vm0, %v4148_v56, %v4150_v33  ;;  %v4169_v51 = vsel %vm606_vm0, %v4150_v33, %v4152_v27 }
 0x4b2   : > { %v4200_v10 = vadd.f32 %v4168_v46, %v4101_v47 }
 0x4b3   : > { %v4201_v55 = vadd.f32 %v4169_v51, %v4102_v31 }
 0x4b7   : > { %v4154_v25 = vpop.permute.xlu0 %4153 }
 0x4b8   : > { %v4055_v19 = vpop.permute.xlu1 %4054  ;;  %v4170_v44 = vsel %vm606_vm0, %v4152_v27, %v4154_v25 }
 0x4b9   : > { %v4071_v29 = vsel %vm474_vm1, %v4053_v38, %v4055_v19 }
 0x4ba   : > { %v4103_v1 = vadd.f32 %v4071_v29, %v4003_v23 }
 0x4bc   : > { %v4202_v43 = vadd.f32 %v4170_v44, %v4103_v1 }
 0x4c0   : > { %v4207_v41 = vpop.permute.xlu1 %4206 }
 0x4c1   : > { %v4209_v6 = vadd.f32 %v4207_v41, %v7946_v9  ;;  %v4210_v59 = vadd.f32 %v4207_v41, %v7953_v13  ;;  %v4211_v3 = vadd.f32 %v4207_v41, %v7955_v12  ;;  %v4212_v62 = vadd.f32 %v4207_v41, %v7968_v22 }
 0x4c2   : > { %v4213_v56 = vadd.f32 %v4207_v41, %v8099_v61  ;;  %v4214_v21 = vadd.f32 %v4207_v41, %v8101_v34  ;;  %v4215_v11 = vadd.f32 %v4207_v41, %v8083_v18  ;;  %v4216_v45 = vadd.f32 %v4207_v41, %v8112_v36 }
 0x4c3   : > { %v4217_v58 = vadd.f32 %v4207_v41, %v8131_v63  ;;  %v4218_v54 = vadd.f32 %v4207_v41, %v4196_v20  ;;  %v4219_v9 = vadd.f32 %v4207_v41, %v8159_v57  ;;  %v4220_v13 = vadd.f32 %v4207_v41, %v8165_v42 }
 0x4c4   : > { %v4221_v0 = vadd.f32 %v4207_v41, %v4199_v2  ;;  %v4222_v12 = vadd.f32 %v4207_v41, %v4200_v10  ;;  %v4223_v5 = vadd.f32 %v4207_v41, %v4201_v55  ;;  %v4224_v22 = vadd.f32 %v4207_v41, %v4202_v43 }
 0x4c5   : > { %v4241_v61 = vrot.slane %v4210_v59, 4  ;;  %v4242_v34 = vrot.slane %v4212_v62, 4  ;;  %v4243_v18 = vrot.slane %v4214_v21, 4  ;;  %v4244_v39 = vrot.slane %v4216_v45, 4 }
 0x4c6   : > { %v4245_v36 = vrot.slane %v4218_v54, 4  ;;  %v4246_v52 = vrot.slane %v4220_v13, 4  ;;  %v4247_v63 = vrot.slane %v4222_v12, 4  ;;  %v4248_v28 = vrot.slane %v4224_v22, 4 }
 0x4c7   : > { %v4249_v57 = vsel %vm1331_vm5, %v4209_v6, %v4241_v61  ;;  %v4250_v42 = vsel %vm1331_vm5, %v4211_v3, %v4242_v34  ;;  %v4251_v8 = vsel %vm1331_vm5, %v4213_v56, %v4243_v18  ;;  %v4252_v17 = vsel %vm1331_vm5, %v4215_v11, %v4244_v39 }
 0x4c8   : > { %v4253_v14 = vsel %vm1331_vm5, %v4217_v58, %v4245_v36  ;;  %v4254_v24 = vsel %vm1331_vm5, %v4219_v9, %v4246_v52  ;;  %v4255_v7 = vsel %vm1331_vm5, %v4221_v0, %v4247_v63  ;;  %v4256_v60 = vsel %vm1331_vm5, %v4223_v5, %v4248_v28  ;;  %4265 = vst [vmem:[%s273_s9] sm:$0x77] %v4249_v57 }
 0x4c9   : > { %4266 = vst [vmem:[%s273_s9 + $0x8] sm:$0x77] %v4250_v42 }
 0x4ca   : > { %4267 = vst [vmem:[%s273_s9 + $0x10] sm:$0x77] %v4251_v8 }
 0x4cb   : > { %4268 = vst [vmem:[%s273_s9 + $0x18] sm:$0x77] %v4252_v17 }
 0x4cc   : > { %4269 = vst [vmem:[%s273_s9 + $0x20] sm:$0x77] %v4253_v14 }
 0x4cd   : > { %4270 = vst [vmem:[%s273_s9 + $0x28] sm:$0x77] %v4254_v24 }
 0x4ce   : > { %4271 = vst [vmem:[%s273_s9 + $0x30] sm:$0x77] %v4255_v7 }
 0x4cf   : > { %4272 = vst [vmem:[%s273_s9 + $0x38] sm:$0x77] %v4256_v60 }
 0x4d0 PF: > { %s16_s23 = sadd.s32 1, %s4971_s23   ;;  %s8430_s21 = smov %s4967_s22 }
 0x4d1   : > { %p13_p5 = scmp.ge.s32.totalorder %s16_s23, 4   ;;  %s8431_s22 = smov %s8433_s24 }
 0x4d3   :  { %15 = sbr.rel (!%p13_p5) target bundleno = 2 (0x2), region = 105 }

</bundles_post_ra>
